<compile_context>
chip_gen: v7x
topology: tpu7x:2x2x1
jax: 0.10.0
libtpu: 0.0.40
codegen_flags: <defaults>
</compile_context>

<pallas_src>
import math
from functools import partial

import jax
import jax.numpy as jnp
from jax.experimental import pallas as pl
from jax.experimental.pallas import tpu as pltpu  # noqa: F401  (referenced in TODOs)


# --------------------------------- fused kernel ----------------------------------------
def _fused_kernel(*refs, B, L, S, D, C_in, nhead, H, num_layers):
    it = iter(refs)
    sens_ref = next(it)       # (C_in, B*L)   sensors, transposed in wrapper
    enc_w_ref = next(it)      # (S, C_in)
    enc_b_ref = next(it)      # (S, 1)
    inp_w_ref = next(it)      # (D, 3D)       (Q slice pre-scaled by 1/sqrt(hd))
    inp_b_ref = next(it)      # (1, 3D)
    outp_w_ref = next(it)     # (D, D)
    outp_b_ref = next(it)     # (1, D)
    ln1_g_ref = next(it); ln1_b_ref = next(it)
    ff1_w_ref = next(it); ff1_b_ref = next(it)
    ff2_w_ref = next(it); ff2_b_ref = next(it)
    ln2_g_ref = next(it); ln2_b_ref = next(it)
    lstm_refs = [(next(it), next(it), next(it)) for _ in range(num_layers)]
    p1_w_ref = next(it); p1_b_ref = next(it)
    p2_w_ref = next(it); p2_b_ref = next(it)
    o_ref = next(it)

    f32 = jnp.float32
    hd = D // nhead
    BH = B * H

    # --- channelEncoder fused over batch: one (S,C_in)@(C_in,B*L) matmul ---
    x_all = (jnp.dot(enc_w_ref[...], sens_ref[...], preferred_element_type=f32)
             + enc_b_ref[...])                                               # (S, B*L)
    # permute(2,0,1): rows = (b, s) tokens on sublanes, cols = d_model (=L) on lanes
    x2d = jnp.concatenate([x_all[:, b * L:(b + 1) * L] for b in range(B)], axis=0)  # (B*S, D)

    # --- TransformerEncoderLayer (post-norm, ReLU FF; dropout inert in eval) ---
    qkv = jnp.dot(x2d, inp_w_ref[...], preferred_element_type=f32) + inp_b_ref[...]
    q = qkv[:, 0:D]                    # 1/sqrt(hd) already folded into weights
    k = qkv[:, D:2 * D]
    v = qkv[:, 2 * D:3 * D]
    kT = jnp.transpose(k)              # (D, B*S): one transpose shared by all heads

    ctx_rows = []
    for b in range(B):                 # statically unrolled, all values stay in vregs
        r0, r1 = b * S, (b + 1) * S
        head_outs = []
        for h in range(nhead):
            c0, c1 = h * hd, (h + 1) * hd
            qh = q[r0:r1, c0:c1]       # (S, hd)
            khT = kT[c0:c1, r0:r1]     # (hd, S)
            vh = v[r0:r1, c0:c1]       # (S, hd)
            # scores via hd broadcast-FMAs on the VPU (hd == 2): no depth-2 MXU pushes
            s_ = qh[:, 0:1] * khT[0:1, :]
            for d in range(1, hd):
                s_ = s_ + qh[:, d:d + 1] * khT[d:d + 1, :]
            m_ = jnp.max(s_, axis=-1, keepdims=True)
            e_ = jnp.exp(s_ - m_)
            p_ = e_ * pl.reciprocal(jnp.sum(e_, axis=-1, keepdims=True), approx=True)
            head_outs.append(jnp.dot(p_, vh, preferred_element_type=f32))   # (S, hd)
        ctx_rows.append(jnp.concatenate(head_outs, axis=1))   # per-batch along lanes
    attn_ctx = jnp.concatenate(ctx_rows, axis=0)              # (B*S, D) along sublanes

    attn = (jnp.dot(attn_ctx, outp_w_ref[...], preferred_element_type=f32)
            + outp_b_ref[...])

    def _ln(xv, g, bta):
        mu = jnp.mean(xv, axis=-1, keepdims=True)
        xc = xv - mu
        var = jnp.mean(xc * xc, axis=-1, keepdims=True)
        return xc * jax.lax.rsqrt(var + 1e-5) * g + bta

    x2d = _ln(x2d + attn, ln1_g_ref[...], ln1_b_ref[...])
    ffh = jnp.maximum(
        jnp.dot(x2d, ff1_w_ref[...], preferred_element_type=f32) + ff1_b_ref[...], 0.0)
    ffo = jnp.dot(ffh, ff2_w_ref[...], preferred_element_type=f32) + ff2_b_ref[...]
    y2d = _ln(x2d + ffo, ln2_g_ref[...], ln2_b_ref[...])                     # (B*S, D)

    # --- permute(2,1,0): LSTM input as (time=L on sublanes, flat (b, feat) on lanes) ---
    lstm_in = jnp.transpose(y2d)                                             # (L, B*S)

    h_last = None
    for layer in range(num_layers):
        wih_bd_ref, whh_bd_ref, bias_ref = lstm_refs[layer]
        # weight-stationary recurrent RHS: read once, lives in vregs across all steps
        whh = whh_bd_ref[...]                                                # (B*H, 4*B*H)
        # per-timestep input projection hoisted out of the recurrence (one matmul)
        xg = (jnp.dot(lstm_in, wih_bd_ref[...], preferred_element_type=f32)
              + bias_ref[...])                                               # (L, 4*B*H)

        h_f = jnp.zeros((1, BH), f32)
        c_f = jnp.zeros((1, BH), f32)
        hs = []
        for t in range(L):             # statically unrolled, static value slices only
            gates = xg[t:t + 1, :] + jnp.dot(h_f, whh, preferred_element_type=f32)
            # gate-major layout [ i | f | o | g ]: sigmoid lanes contiguous, tanh last
            sig = jax.nn.sigmoid(gates[:, 0:3 * BH])
            g_g = jnp.tanh(gates[:, 3 * BH:4 * BH])
            i_g = sig[:, 0:BH]
            f_g = sig[:, BH:2 * BH]
            o_g = sig[:, 2 * BH:3 * BH]
            c_f = f_g * c_f + i_g * g_g
            h_f = o_g * jnp.tanh(c_f)
            hs.append(h_f)
        h_last = h_f
        lstm_in = jnp.concatenate(hs, axis=0)      # (L, B*H) layer output kept in vregs

    # --- out[-1] -> (B, H); predLayer: Linear -> ReLU -> Linear ---
    h_bt = jnp.concatenate([h_last[:, b * H:(b + 1) * H] for b in range(B)], axis=0)
    p1 = jnp.maximum(
        jnp.dot(h_bt, p1_w_ref[...], preferred_element_type=f32) + p1_b_ref[...], 0.0)
    out = jnp.dot(p1, p2_w_ref[...], preferred_element_type=f32) + p2_b_ref[...]
    o_ref[...] = out.astype(o_ref.dtype)


# ------------------------ wrapper-side weight layout plumbing --------------------------
_GATE_PERM = (0, 1, 3, 2)   # PyTorch gate order [i,f,g,o] -> kernel lane order [i,f,o,g]


def _lstm_flat_weights(w_ih_t, w_hh_t, b_ih, b_hh, B, H):
    """Batch-block-diagonal, gate-major LSTM weights for the flat (1, 4*B*H) gate layout.

    w_ih_t: (In, 4H), w_hh_t: (H, 4H), PyTorch gate blocks [i|f|g|o] along the 4H axis.
    Returns (all in the reordered [i|f|o|g] gate order):
      wih_bd:   (B*In, 4*B*H) with wih_bd[b*In+s, gate*B*H + b*H + j] = w_ih_g[s, gate, j]
      whh_bd:   (B*H,  4*B*H)
      bias_flat:(1,    4*B*H) tiled (b_ih + b_hh)
    """
    In = w_ih_t.shape[0]
    dt = w_ih_t.dtype
    w_ih_g = w_ih_t.reshape(In, 4, H)[:, _GATE_PERM, :]
    w_hh_g = w_hh_t.reshape(H, 4, H)[:, _GATE_PERM, :]
    bias_g = (b_ih + b_hh).reshape(4, H)[_GATE_PERM, :]
    wih_bd = jnp.zeros((B, In, 4, B, H), dt)
    whh_bd = jnp.zeros((B, H, 4, B, H), dt)
    for b in range(B):
        wih_bd = wih_bd.at[b, :, :, b, :].set(w_ih_g)
        whh_bd = whh_bd.at[b, :, :, b, :].set(w_hh_g)
    wih_bd = wih_bd.reshape(B * In, 4 * B * H)
    whh_bd = whh_bd.reshape(B * H, 4 * B * H)
    bias_flat = jnp.broadcast_to(bias_g[:, None, :], (4, B, H)).reshape(1, 4 * B * H)
    return wih_bd, whh_bd, bias_flat


def attention_lstm_forward(params, sensors, *, nhead=8):
    B, L, C_in = sensors.shape            # sensors: (batch, window_length, 5)
    D = L                                  # transformer d_model == window_length
    S = params["enc_w"].shape[1]           # d_channel (transformer sequence length)
    H = params["pred1_w"].shape[0]         # d_lstm_hidden
    num_layers = len(params["lstm"])
    n_out = params["pred2_w"].shape[1]
    f32 = jnp.float32
    hd = D // nhead

    # layout plumbing outside the kernel (tiny, one-time XLA ops)
    sens_all = jnp.transpose(sensors, (2, 0, 1)).reshape(C_in, B * L)

    # fold 1/sqrt(hd) into the Q slice of the in-projection (weight-side constant fold)
    scale = 1.0 / math.sqrt(hd)
    in_w = params["in_proj_w"].at[:, 0:D].multiply(scale)
    in_b = params["in_proj_b"].at[0:D].multiply(scale)

    inputs = [
        sens_all,
        params["enc_w"].T, params["enc_b"].reshape(S, 1),
        in_w, in_b.reshape(1, 3 * D),
        params["out_proj_w"], params["out_proj_b"].reshape(1, D),
        params["ln1_g"].reshape(1, D), params["ln1_b"].reshape(1, D),
        params["ff1_w"], params["ff1_b"].reshape(1, -1),
        params["ff2_w"], params["ff2_b"].reshape(1, D),
        params["ln2_g"].reshape(1, D), params["ln2_b"].reshape(1, D),
    ]
    for (w_ih, w_hh, b_ih, b_hh) in params["lstm"]:
        inputs += list(_lstm_flat_weights(w_ih, w_hh, b_ih, b_hh, B, H))
    inputs += [
        params["pred1_w"], params["pred1_b"].reshape(1, H),
        params["pred2_w"], params["pred2_b"].reshape(1, n_out),
    ]

    kernel = partial(_fused_kernel, B=B, L=L, S=S, D=D, C_in=C_in,
                     nhead=nhead, H=H, num_layers=num_layers)
    # No grid, no scratch: everything lives in VMEM / vregs for the single invocation.
    return pl.pallas_call(
        kernel,
        out_shape=jax.ShapeDtypeStruct((B, n_out), f32),
    )(*inputs)


# --------------------------------- parameter init --------------------------------------
def init_params(key, d_channel, d_lstm_hidden, lstm_num_layers, window_length, d_ff=512):
    D = window_length
    H = d_lstm_hidden
    keys = iter(jax.random.split(key, 64))

    def w(shape, scale=0.05):
        return scale * jax.random.normal(next(keys), shape, jnp.float32)

    p = {
        "enc_w": w((5, d_channel)), "enc_b": w((d_channel,)),
        "in_proj_w": w((D, 3 * D)), "in_proj_b": w((3 * D,)),
        "out_proj_w": w((D, D)), "out_proj_b": w((D,)),
        "ln1_g": jnp.ones((D,), jnp.float32), "ln1_b": jnp.zeros((D,), jnp.float32),
        "ff1_w": w((D, d_ff)), "ff1_b": w((d_ff,)),
        "ff2_w": w((d_ff, D)), "ff2_b": w((D,)),
        "ln2_g": jnp.ones((D,), jnp.float32), "ln2_b": jnp.zeros((D,), jnp.float32),
        "pred1_w": w((H, H)), "pred1_b": w((H,)),
        "pred2_w": w((H, 6)), "pred2_b": w((6,)),
    }
    lstm = []
    in_sz = d_channel
    for _ in range(lstm_num_layers):
        lstm.append((w((in_sz, 4 * H)), w((H, 4 * H)), w((4 * H,)), w((4 * H,))))
        in_sz = H
    p["lstm"] = lstm
    return p


if __name__ == "__main__":
    # Module hyperparameters (small, consistent with the forward pass):
    batch = 2
    window_length = 16          # = transformer d_model; divisible by nhead=8
    d_channel = 8
    d_lstm_hidden = 32          # 4*B*H = 256 -> two full lane tiles for the gate vector
    lstm_num_layers = 2
    # dropout = 0.0 (eval mode -> identity); d_temporal unused by forward.

    key = jax.random.PRNGKey(0)
    pkey, xkey = jax.random.split(key)
    params = init_params(pkey, d_channel, d_lstm_hidden, lstm_num_layers, window_length)
    sensors = jax.random.normal(xkey, (batch, window_length, 5), jnp.float32)

    fwd = jax.jit(attention_lstm_forward)
    out = fwd(params, sensors)
    out = jax.block_until_ready(out)

    assert out.shape == (batch, 6), out.shape
    assert bool(jnp.all(jnp.isfinite(out)))
    print("KERNEL_OK")
</pallas_src>

<mosaic_0001>
module attributes {stable_mosaic.version = 11 : i64} {
  func.func @_fused_kernel(%arg0: memref<5x32xf32, #tpu.memory_space<vmem>>, %arg1: memref<8x5xf32, #tpu.memory_space<vmem>>, %arg2: memref<8x1xf32, #tpu.memory_space<vmem>>, %arg3: memref<16x48xf32, #tpu.memory_space<vmem>>, %arg4: memref<1x48xf32, #tpu.memory_space<vmem>>, %arg5: memref<16x16xf32, #tpu.memory_space<vmem>>, %arg6: memref<1x16xf32, #tpu.memory_space<vmem>>, %arg7: memref<1x16xf32, #tpu.memory_space<vmem>>, %arg8: memref<1x16xf32, #tpu.memory_space<vmem>>, %arg9: memref<16x512xf32, #tpu.memory_space<vmem>>, %arg10: memref<1x512xf32, #tpu.memory_space<vmem>>, %arg11: memref<512x16xf32, #tpu.memory_space<vmem>>, %arg12: memref<1x16xf32, #tpu.memory_space<vmem>>, %arg13: memref<1x16xf32, #tpu.memory_space<vmem>>, %arg14: memref<1x16xf32, #tpu.memory_space<vmem>>, %arg15: memref<16x256xf32, #tpu.memory_space<vmem>>, %arg16: memref<64x256xf32, #tpu.memory_space<vmem>>, %arg17: memref<1x256xf32, #tpu.memory_space<vmem>>, %arg18: memref<64x256xf32, #tpu.memory_space<vmem>>, %arg19: memref<64x256xf32, #tpu.memory_space<vmem>>, %arg20: memref<1x256xf32, #tpu.memory_space<vmem>>, %arg21: memref<32x32xf32, #tpu.memory_space<vmem>>, %arg22: memref<1x32xf32, #tpu.memory_space<vmem>>, %arg23: memref<32x6xf32, #tpu.memory_space<vmem>>, %arg24: memref<1x6xf32, #tpu.memory_space<vmem>>, %arg25: memref<2x6xf32, #tpu.memory_space<vmem>>) attributes {dimension_semantics = [], scalar_prefetch = 0 : i64, scratch_operands = 0 : i64, tpu.core_type = #tpu.core_type<tc>} {
    %c0 = arith.constant 0 : index
    %c0_0 = arith.constant 0 : index
    %0 = vector.load %arg1[%c0, %c0_0] : memref<8x5xf32, #tpu.memory_space<vmem>>, vector<8x5xf32>
    %c0_1 = arith.constant 0 : index
    %c0_2 = arith.constant 0 : index
    %1 = vector.load %arg0[%c0_1, %c0_2] : memref<5x32xf32, #tpu.memory_space<vmem>>, vector<5x32xf32>
    %cst = arith.constant dense<0.000000e+00> : vector<8x32xf32>
    %2 = tpu.matmul %0, %1, %cst {dimension_numbers = #tpu.dot_dimension_numbers<[1], [0], [0], [1], [0, 0, 1, 1], [], []>} : vector<8x5xf32>, vector<5x32xf32>, vector<8x32xf32> -> vector<8x32xf32>
    %c0_3 = arith.constant 0 : index
    %c0_4 = arith.constant 0 : index
    %3 = vector.load %arg2[%c0_3, %c0_4] : memref<8x1xf32, #tpu.memory_space<vmem>>, vector<8x1xf32>
    %4 = vector.broadcast %3 : vector<8x1xf32> to vector<8x32xf32>
    %5 = arith.addf %2, %4 : vector<8x32xf32>
    %6 = vector.extract_strided_slice %5 {offsets = [0, 0], sizes = [8, 16], strides = [1, 1]} : vector<8x32xf32> to vector<8x16xf32>
    %7 = vector.extract_strided_slice %5 {offsets = [0, 16], sizes = [8, 16], strides = [1, 1]} : vector<8x32xf32> to vector<8x16xf32>
    %8 = tpu.concatenate %6, %7 in 0 : vector<8x16xf32>, vector<8x16xf32> -> vector<16x16xf32>
    %c0_5 = arith.constant 0 : index
    %c0_6 = arith.constant 0 : index
    %9 = vector.load %arg3[%c0_5, %c0_6] : memref<16x48xf32, #tpu.memory_space<vmem>>, vector<16x48xf32>
    %cst_7 = arith.constant dense<0.000000e+00> : vector<16x48xf32>
    %10 = tpu.matmul %8, %9, %cst_7 {dimension_numbers = #tpu.dot_dimension_numbers<[1], [0], [0], [1], [0, 0, 1, 1], [], []>} : vector<16x16xf32>, vector<16x48xf32>, vector<16x48xf32> -> vector<16x48xf32>
    %c0_8 = arith.constant 0 : index
    %c0_9 = arith.constant 0 : index
    %11 = vector.load %arg4[%c0_8, %c0_9] : memref<1x48xf32, #tpu.memory_space<vmem>>, vector<1x48xf32>
    %12 = vector.broadcast %11 : vector<1x48xf32> to vector<16x48xf32>
    %13 = arith.addf %10, %12 : vector<16x48xf32>
    %14 = vector.extract_strided_slice %13 {offsets = [0, 0], sizes = [16, 16], strides = [1, 1]} : vector<16x48xf32> to vector<16x16xf32>
    %15 = vector.extract_strided_slice %13 {offsets = [0, 16], sizes = [16, 16], strides = [1, 1]} : vector<16x48xf32> to vector<16x16xf32>
    %16 = vector.extract_strided_slice %13 {offsets = [0, 32], sizes = [16, 16], strides = [1, 1]} : vector<16x48xf32> to vector<16x16xf32>
    %17 = tpu.transpose %15, [1, 0] : vector<16x16xf32> -> vector<16x16xf32>
    %18 = vector.extract_strided_slice %14 {offsets = [0, 0], sizes = [8, 2], strides = [1, 1]} : vector<16x16xf32> to vector<8x2xf32>
    %19 = vector.extract_strided_slice %17 {offsets = [0, 0], sizes = [2, 8], strides = [1, 1]} : vector<16x16xf32> to vector<2x8xf32>
    %20 = vector.extract_strided_slice %16 {offsets = [0, 0], sizes = [8, 2], strides = [1, 1]} : vector<16x16xf32> to vector<8x2xf32>
    %21 = vector.extract_strided_slice %18 {offsets = [0, 0], sizes = [8, 1], strides = [1, 1]} : vector<8x2xf32> to vector<8x1xf32>
    %22 = vector.extract_strided_slice %19 {offsets = [0, 0], sizes = [1, 8], strides = [1, 1]} : vector<2x8xf32> to vector<1x8xf32>
    %23 = vector.broadcast %21 : vector<8x1xf32> to vector<8x8xf32>
    %24 = vector.broadcast %22 : vector<1x8xf32> to vector<8x8xf32>
    %25 = arith.mulf %23, %24 : vector<8x8xf32>
    %26 = vector.extract_strided_slice %18 {offsets = [0, 1], sizes = [8, 1], strides = [1, 1]} : vector<8x2xf32> to vector<8x1xf32>
    %27 = vector.extract_strided_slice %19 {offsets = [1, 0], sizes = [1, 8], strides = [1, 1]} : vector<2x8xf32> to vector<1x8xf32>
    %28 = vector.broadcast %26 : vector<8x1xf32> to vector<8x8xf32>
    %29 = vector.broadcast %27 : vector<1x8xf32> to vector<8x8xf32>
    %30 = arith.mulf %28, %29 : vector<8x8xf32>
    %31 = arith.addf %25, %30 : vector<8x8xf32>
    %cst_10 = arith.constant dense<0xFF800000> : vector<8xf32>
    %32 = vector.multi_reduction <maximumf>, %31, %cst_10 [1] : vector<8x8xf32> to vector<8xf32>
    %33 = vector.shape_cast %32 : vector<8xf32> to vector<8x1xf32>
    %34 = vector.broadcast %33 : vector<8x1xf32> to vector<8x8xf32>
    %35 = arith.subf %31, %34 : vector<8x8xf32>
    %36 = math.exp %35 : vector<8x8xf32>
    %cst_11 = arith.constant dense<0.000000e+00> : vector<8xf32>
    %37 = vector.multi_reduction <add>, %36, %cst_11 [1] : vector<8x8xf32> to vector<8xf32>
    %38 = vector.shape_cast %37 : vector<8xf32> to vector<8x1xf32>
    %39 = tpu.reciprocal %38 {approx = true} : vector<8x1xf32> -> vector<8x1xf32>
    %40 = vector.broadcast %39 : vector<8x1xf32> to vector<8x8xf32>
    %41 = arith.mulf %36, %40 : vector<8x8xf32>
    %cst_12 = arith.constant dense<0.000000e+00> : vector<8x2xf32>
    %42 = tpu.matmul %41, %20, %cst_12 {dimension_numbers = #tpu.dot_dimension_numbers<[1], [0], [0], [1], [0, 0, 1, 1], [], []>} : vector<8x8xf32>, vector<8x2xf32>, vector<8x2xf32> -> vector<8x2xf32>
    %43 = vector.extract_strided_slice %14 {offsets = [0, 2], sizes = [8, 2], strides = [1, 1]} : vector<16x16xf32> to vector<8x2xf32>
    %44 = vector.extract_strided_slice %17 {offsets = [2, 0], sizes = [2, 8], strides = [1, 1]} : vector<16x16xf32> to vector<2x8xf32>
    %45 = vector.extract_strided_slice %16 {offsets = [0, 2], sizes = [8, 2], strides = [1, 1]} : vector<16x16xf32> to vector<8x2xf32>
    %46 = vector.extract_strided_slice %43 {offsets = [0, 0], sizes = [8, 1], strides = [1, 1]} : vector<8x2xf32> to vector<8x1xf32>
    %47 = vector.extract_strided_slice %44 {offsets = [0, 0], sizes = [1, 8], strides = [1, 1]} : vector<2x8xf32> to vector<1x8xf32>
    %48 = vector.broadcast %46 : vector<8x1xf32> to vector<8x8xf32>
    %49 = vector.broadcast %47 : vector<1x8xf32> to vector<8x8xf32>
    %50 = arith.mulf %48, %49 : vector<8x8xf32>
    %51 = vector.extract_strided_slice %43 {offsets = [0, 1], sizes = [8, 1], strides = [1, 1]} : vector<8x2xf32> to vector<8x1xf32>
    %52 = vector.extract_strided_slice %44 {offsets = [1, 0], sizes = [1, 8], strides = [1, 1]} : vector<2x8xf32> to vector<1x8xf32>
    %53 = vector.broadcast %51 : vector<8x1xf32> to vector<8x8xf32>
    %54 = vector.broadcast %52 : vector<1x8xf32> to vector<8x8xf32>
    %55 = arith.mulf %53, %54 : vector<8x8xf32>
    %56 = arith.addf %50, %55 : vector<8x8xf32>
    %cst_13 = arith.constant dense<0xFF800000> : vector<8xf32>
    %57 = vector.multi_reduction <maximumf>, %56, %cst_13 [1] : vector<8x8xf32> to vector<8xf32>
    %58 = vector.shape_cast %57 : vector<8xf32> to vector<8x1xf32>
    %59 = vector.broadcast %58 : vector<8x1xf32> to vector<8x8xf32>
    %60 = arith.subf %56, %59 : vector<8x8xf32>
    %61 = math.exp %60 : vector<8x8xf32>
    %cst_14 = arith.constant dense<0.000000e+00> : vector<8xf32>
    %62 = vector.multi_reduction <add>, %61, %cst_14 [1] : vector<8x8xf32> to vector<8xf32>
    %63 = vector.shape_cast %62 : vector<8xf32> to vector<8x1xf32>
    %64 = tpu.reciprocal %63 {approx = true} : vector<8x1xf32> -> vector<8x1xf32>
    %65 = vector.broadcast %64 : vector<8x1xf32> to vector<8x8xf32>
    %66 = arith.mulf %61, %65 : vector<8x8xf32>
    %cst_15 = arith.constant dense<0.000000e+00> : vector<8x2xf32>
    %67 = tpu.matmul %66, %45, %cst_15 {dimension_numbers = #tpu.dot_dimension_numbers<[1], [0], [0], [1], [0, 0, 1, 1], [], []>} : vector<8x8xf32>, vector<8x2xf32>, vector<8x2xf32> -> vector<8x2xf32>
    %68 = vector.extract_strided_slice %14 {offsets = [0, 4], sizes = [8, 2], strides = [1, 1]} : vector<16x16xf32> to vector<8x2xf32>
    %69 = vector.extract_strided_slice %17 {offsets = [4, 0], sizes = [2, 8], strides = [1, 1]} : vector<16x16xf32> to vector<2x8xf32>
    %70 = vector.extract_strided_slice %16 {offsets = [0, 4], sizes = [8, 2], strides = [1, 1]} : vector<16x16xf32> to vector<8x2xf32>
    %71 = vector.extract_strided_slice %68 {offsets = [0, 0], sizes = [8, 1], strides = [1, 1]} : vector<8x2xf32> to vector<8x1xf32>
    %72 = vector.extract_strided_slice %69 {offsets = [0, 0], sizes = [1, 8], strides = [1, 1]} : vector<2x8xf32> to vector<1x8xf32>
    %73 = vector.broadcast %71 : vector<8x1xf32> to vector<8x8xf32>
    %74 = vector.broadcast %72 : vector<1x8xf32> to vector<8x8xf32>
    %75 = arith.mulf %73, %74 : vector<8x8xf32>
    %76 = vector.extract_strided_slice %68 {offsets = [0, 1], sizes = [8, 1], strides = [1, 1]} : vector<8x2xf32> to vector<8x1xf32>
    %77 = vector.extract_strided_slice %69 {offsets = [1, 0], sizes = [1, 8], strides = [1, 1]} : vector<2x8xf32> to vector<1x8xf32>
    %78 = vector.broadcast %76 : vector<8x1xf32> to vector<8x8xf32>
    %79 = vector.broadcast %77 : vector<1x8xf32> to vector<8x8xf32>
    %80 = arith.mulf %78, %79 : vector<8x8xf32>
    %81 = arith.addf %75, %80 : vector<8x8xf32>
    %cst_16 = arith.constant dense<0xFF800000> : vector<8xf32>
    %82 = vector.multi_reduction <maximumf>, %81, %cst_16 [1] : vector<8x8xf32> to vector<8xf32>
    %83 = vector.shape_cast %82 : vector<8xf32> to vector<8x1xf32>
    %84 = vector.broadcast %83 : vector<8x1xf32> to vector<8x8xf32>
    %85 = arith.subf %81, %84 : vector<8x8xf32>
    %86 = math.exp %85 : vector<8x8xf32>
    %cst_17 = arith.constant dense<0.000000e+00> : vector<8xf32>
    %87 = vector.multi_reduction <add>, %86, %cst_17 [1] : vector<8x8xf32> to vector<8xf32>
    %88 = vector.shape_cast %87 : vector<8xf32> to vector<8x1xf32>
    %89 = tpu.reciprocal %88 {approx = true} : vector<8x1xf32> -> vector<8x1xf32>
    %90 = vector.broadcast %89 : vector<8x1xf32> to vector<8x8xf32>
    %91 = arith.mulf %86, %90 : vector<8x8xf32>
    %cst_18 = arith.constant dense<0.000000e+00> : vector<8x2xf32>
    %92 = tpu.matmul %91, %70, %cst_18 {dimension_numbers = #tpu.dot_dimension_numbers<[1], [0], [0], [1], [0, 0, 1, 1], [], []>} : vector<8x8xf32>, vector<8x2xf32>, vector<8x2xf32> -> vector<8x2xf32>
    %93 = vector.extract_strided_slice %14 {offsets = [0, 6], sizes = [8, 2], strides = [1, 1]} : vector<16x16xf32> to vector<8x2xf32>
    %94 = vector.extract_strided_slice %17 {offsets = [6, 0], sizes = [2, 8], strides = [1, 1]} : vector<16x16xf32> to vector<2x8xf32>
    %95 = vector.extract_strided_slice %16 {offsets = [0, 6], sizes = [8, 2], strides = [1, 1]} : vector<16x16xf32> to vector<8x2xf32>
    %96 = vector.extract_strided_slice %93 {offsets = [0, 0], sizes = [8, 1], strides = [1, 1]} : vector<8x2xf32> to vector<8x1xf32>
    %97 = vector.extract_strided_slice %94 {offsets = [0, 0], sizes = [1, 8], strides = [1, 1]} : vector<2x8xf32> to vector<1x8xf32>
    %98 = vector.broadcast %96 : vector<8x1xf32> to vector<8x8xf32>
    %99 = vector.broadcast %97 : vector<1x8xf32> to vector<8x8xf32>
    %100 = arith.mulf %98, %99 : vector<8x8xf32>
    %101 = vector.extract_strided_slice %93 {offsets = [0, 1], sizes = [8, 1], strides = [1, 1]} : vector<8x2xf32> to vector<8x1xf32>
    %102 = vector.extract_strided_slice %94 {offsets = [1, 0], sizes = [1, 8], strides = [1, 1]} : vector<2x8xf32> to vector<1x8xf32>
    %103 = vector.broadcast %101 : vector<8x1xf32> to vector<8x8xf32>
    %104 = vector.broadcast %102 : vector<1x8xf32> to vector<8x8xf32>
    %105 = arith.mulf %103, %104 : vector<8x8xf32>
    %106 = arith.addf %100, %105 : vector<8x8xf32>
    %cst_19 = arith.constant dense<0xFF800000> : vector<8xf32>
    %107 = vector.multi_reduction <maximumf>, %106, %cst_19 [1] : vector<8x8xf32> to vector<8xf32>
    %108 = vector.shape_cast %107 : vector<8xf32> to vector<8x1xf32>
    %109 = vector.broadcast %108 : vector<8x1xf32> to vector<8x8xf32>
    %110 = arith.subf %106, %109 : vector<8x8xf32>
    %111 = math.exp %110 : vector<8x8xf32>
    %cst_20 = arith.constant dense<0.000000e+00> : vector<8xf32>
    %112 = vector.multi_reduction <add>, %111, %cst_20 [1] : vector<8x8xf32> to vector<8xf32>
    %113 = vector.shape_cast %112 : vector<8xf32> to vector<8x1xf32>
    %114 = tpu.reciprocal %113 {approx = true} : vector<8x1xf32> -> vector<8x1xf32>
    %115 = vector.broadcast %114 : vector<8x1xf32> to vector<8x8xf32>
    %116 = arith.mulf %111, %115 : vector<8x8xf32>
    %cst_21 = arith.constant dense<0.000000e+00> : vector<8x2xf32>
    %117 = tpu.matmul %116, %95, %cst_21 {dimension_numbers = #tpu.dot_dimension_numbers<[1], [0], [0], [1], [0, 0, 1, 1], [], []>} : vector<8x8xf32>, vector<8x2xf32>, vector<8x2xf32> -> vector<8x2xf32>
    %118 = vector.extract_strided_slice %14 {offsets = [0, 8], sizes = [8, 2], strides = [1, 1]} : vector<16x16xf32> to vector<8x2xf32>
    %119 = vector.extract_strided_slice %17 {offsets = [8, 0], sizes = [2, 8], strides = [1, 1]} : vector<16x16xf32> to vector<2x8xf32>
    %120 = vector.extract_strided_slice %16 {offsets = [0, 8], sizes = [8, 2], strides = [1, 1]} : vector<16x16xf32> to vector<8x2xf32>
    %121 = vector.extract_strided_slice %118 {offsets = [0, 0], sizes = [8, 1], strides = [1, 1]} : vector<8x2xf32> to vector<8x1xf32>
    %122 = vector.extract_strided_slice %119 {offsets = [0, 0], sizes = [1, 8], strides = [1, 1]} : vector<2x8xf32> to vector<1x8xf32>
    %123 = vector.broadcast %121 : vector<8x1xf32> to vector<8x8xf32>
    %124 = vector.broadcast %122 : vector<1x8xf32> to vector<8x8xf32>
    %125 = arith.mulf %123, %124 : vector<8x8xf32>
    %126 = vector.extract_strided_slice %118 {offsets = [0, 1], sizes = [8, 1], strides = [1, 1]} : vector<8x2xf32> to vector<8x1xf32>
    %127 = vector.extract_strided_slice %119 {offsets = [1, 0], sizes = [1, 8], strides = [1, 1]} : vector<2x8xf32> to vector<1x8xf32>
    %128 = vector.broadcast %126 : vector<8x1xf32> to vector<8x8xf32>
    %129 = vector.broadcast %127 : vector<1x8xf32> to vector<8x8xf32>
    %130 = arith.mulf %128, %129 : vector<8x8xf32>
    %131 = arith.addf %125, %130 : vector<8x8xf32>
    %cst_22 = arith.constant dense<0xFF800000> : vector<8xf32>
    %132 = vector.multi_reduction <maximumf>, %131, %cst_22 [1] : vector<8x8xf32> to vector<8xf32>
    %133 = vector.shape_cast %132 : vector<8xf32> to vector<8x1xf32>
    %134 = vector.broadcast %133 : vector<8x1xf32> to vector<8x8xf32>
    %135 = arith.subf %131, %134 : vector<8x8xf32>
    %136 = math.exp %135 : vector<8x8xf32>
    %cst_23 = arith.constant dense<0.000000e+00> : vector<8xf32>
    %137 = vector.multi_reduction <add>, %136, %cst_23 [1] : vector<8x8xf32> to vector<8xf32>
    %138 = vector.shape_cast %137 : vector<8xf32> to vector<8x1xf32>
    %139 = tpu.reciprocal %138 {approx = true} : vector<8x1xf32> -> vector<8x1xf32>
    %140 = vector.broadcast %139 : vector<8x1xf32> to vector<8x8xf32>
    %141 = arith.mulf %136, %140 : vector<8x8xf32>
    %cst_24 = arith.constant dense<0.000000e+00> : vector<8x2xf32>
    %142 = tpu.matmul %141, %120, %cst_24 {dimension_numbers = #tpu.dot_dimension_numbers<[1], [0], [0], [1], [0, 0, 1, 1], [], []>} : vector<8x8xf32>, vector<8x2xf32>, vector<8x2xf32> -> vector<8x2xf32>
    %143 = vector.extract_strided_slice %14 {offsets = [0, 10], sizes = [8, 2], strides = [1, 1]} : vector<16x16xf32> to vector<8x2xf32>
    %144 = vector.extract_strided_slice %17 {offsets = [10, 0], sizes = [2, 8], strides = [1, 1]} : vector<16x16xf32> to vector<2x8xf32>
    %145 = vector.extract_strided_slice %16 {offsets = [0, 10], sizes = [8, 2], strides = [1, 1]} : vector<16x16xf32> to vector<8x2xf32>
    %146 = vector.extract_strided_slice %143 {offsets = [0, 0], sizes = [8, 1], strides = [1, 1]} : vector<8x2xf32> to vector<8x1xf32>
    %147 = vector.extract_strided_slice %144 {offsets = [0, 0], sizes = [1, 8], strides = [1, 1]} : vector<2x8xf32> to vector<1x8xf32>
    %148 = vector.broadcast %146 : vector<8x1xf32> to vector<8x8xf32>
    %149 = vector.broadcast %147 : vector<1x8xf32> to vector<8x8xf32>
    %150 = arith.mulf %148, %149 : vector<8x8xf32>
    %151 = vector.extract_strided_slice %143 {offsets = [0, 1], sizes = [8, 1], strides = [1, 1]} : vector<8x2xf32> to vector<8x1xf32>
    %152 = vector.extract_strided_slice %144 {offsets = [1, 0], sizes = [1, 8], strides = [1, 1]} : vector<2x8xf32> to vector<1x8xf32>
    %153 = vector.broadcast %151 : vector<8x1xf32> to vector<8x8xf32>
    %154 = vector.broadcast %152 : vector<1x8xf32> to vector<8x8xf32>
    %155 = arith.mulf %153, %154 : vector<8x8xf32>
    %156 = arith.addf %150, %155 : vector<8x8xf32>
    %cst_25 = arith.constant dense<0xFF800000> : vector<8xf32>
    %157 = vector.multi_reduction <maximumf>, %156, %cst_25 [1] : vector<8x8xf32> to vector<8xf32>
    %158 = vector.shape_cast %157 : vector<8xf32> to vector<8x1xf32>
    %159 = vector.broadcast %158 : vector<8x1xf32> to vector<8x8xf32>
    %160 = arith.subf %156, %159 : vector<8x8xf32>
    %161 = math.exp %160 : vector<8x8xf32>
    %cst_26 = arith.constant dense<0.000000e+00> : vector<8xf32>
    %162 = vector.multi_reduction <add>, %161, %cst_26 [1] : vector<8x8xf32> to vector<8xf32>
    %163 = vector.shape_cast %162 : vector<8xf32> to vector<8x1xf32>
    %164 = tpu.reciprocal %163 {approx = true} : vector<8x1xf32> -> vector<8x1xf32>
    %165 = vector.broadcast %164 : vector<8x1xf32> to vector<8x8xf32>
    %166 = arith.mulf %161, %165 : vector<8x8xf32>
    %cst_27 = arith.constant dense<0.000000e+00> : vector<8x2xf32>
    %167 = tpu.matmul %166, %145, %cst_27 {dimension_numbers = #tpu.dot_dimension_numbers<[1], [0], [0], [1], [0, 0, 1, 1], [], []>} : vector<8x8xf32>, vector<8x2xf32>, vector<8x2xf32> -> vector<8x2xf32>
    %168 = vector.extract_strided_slice %14 {offsets = [0, 12], sizes = [8, 2], strides = [1, 1]} : vector<16x16xf32> to vector<8x2xf32>
    %169 = vector.extract_strided_slice %17 {offsets = [12, 0], sizes = [2, 8], strides = [1, 1]} : vector<16x16xf32> to vector<2x8xf32>
    %170 = vector.extract_strided_slice %16 {offsets = [0, 12], sizes = [8, 2], strides = [1, 1]} : vector<16x16xf32> to vector<8x2xf32>
    %171 = vector.extract_strided_slice %168 {offsets = [0, 0], sizes = [8, 1], strides = [1, 1]} : vector<8x2xf32> to vector<8x1xf32>
    %172 = vector.extract_strided_slice %169 {offsets = [0, 0], sizes = [1, 8], strides = [1, 1]} : vector<2x8xf32> to vector<1x8xf32>
    %173 = vector.broadcast %171 : vector<8x1xf32> to vector<8x8xf32>
    %174 = vector.broadcast %172 : vector<1x8xf32> to vector<8x8xf32>
    %175 = arith.mulf %173, %174 : vector<8x8xf32>
    %176 = vector.extract_strided_slice %168 {offsets = [0, 1], sizes = [8, 1], strides = [1, 1]} : vector<8x2xf32> to vector<8x1xf32>
    %177 = vector.extract_strided_slice %169 {offsets = [1, 0], sizes = [1, 8], strides = [1, 1]} : vector<2x8xf32> to vector<1x8xf32>
    %178 = vector.broadcast %176 : vector<8x1xf32> to vector<8x8xf32>
    %179 = vector.broadcast %177 : vector<1x8xf32> to vector<8x8xf32>
    %180 = arith.mulf %178, %179 : vector<8x8xf32>
    %181 = arith.addf %175, %180 : vector<8x8xf32>
    %cst_28 = arith.constant dense<0xFF800000> : vector<8xf32>
    %182 = vector.multi_reduction <maximumf>, %181, %cst_28 [1] : vector<8x8xf32> to vector<8xf32>
    %183 = vector.shape_cast %182 : vector<8xf32> to vector<8x1xf32>
    %184 = vector.broadcast %183 : vector<8x1xf32> to vector<8x8xf32>
    %185 = arith.subf %181, %184 : vector<8x8xf32>
    %186 = math.exp %185 : vector<8x8xf32>
    %cst_29 = arith.constant dense<0.000000e+00> : vector<8xf32>
    %187 = vector.multi_reduction <add>, %186, %cst_29 [1] : vector<8x8xf32> to vector<8xf32>
    %188 = vector.shape_cast %187 : vector<8xf32> to vector<8x1xf32>
    %189 = tpu.reciprocal %188 {approx = true} : vector<8x1xf32> -> vector<8x1xf32>
    %190 = vector.broadcast %189 : vector<8x1xf32> to vector<8x8xf32>
    %191 = arith.mulf %186, %190 : vector<8x8xf32>
    %cst_30 = arith.constant dense<0.000000e+00> : vector<8x2xf32>
    %192 = tpu.matmul %191, %170, %cst_30 {dimension_numbers = #tpu.dot_dimension_numbers<[1], [0], [0], [1], [0, 0, 1, 1], [], []>} : vector<8x8xf32>, vector<8x2xf32>, vector<8x2xf32> -> vector<8x2xf32>
    %193 = vector.extract_strided_slice %14 {offsets = [0, 14], sizes = [8, 2], strides = [1, 1]} : vector<16x16xf32> to vector<8x2xf32>
    %194 = vector.extract_strided_slice %17 {offsets = [14, 0], sizes = [2, 8], strides = [1, 1]} : vector<16x16xf32> to vector<2x8xf32>
    %195 = vector.extract_strided_slice %16 {offsets = [0, 14], sizes = [8, 2], strides = [1, 1]} : vector<16x16xf32> to vector<8x2xf32>
    %196 = vector.extract_strided_slice %193 {offsets = [0, 0], sizes = [8, 1], strides = [1, 1]} : vector<8x2xf32> to vector<8x1xf32>
    %197 = vector.extract_strided_slice %194 {offsets = [0, 0], sizes = [1, 8], strides = [1, 1]} : vector<2x8xf32> to vector<1x8xf32>
    %198 = vector.broadcast %196 : vector<8x1xf32> to vector<8x8xf32>
    %199 = vector.broadcast %197 : vector<1x8xf32> to vector<8x8xf32>
    %200 = arith.mulf %198, %199 : vector<8x8xf32>
    %201 = vector.extract_strided_slice %193 {offsets = [0, 1], sizes = [8, 1], strides = [1, 1]} : vector<8x2xf32> to vector<8x1xf32>
    %202 = vector.extract_strided_slice %194 {offsets = [1, 0], sizes = [1, 8], strides = [1, 1]} : vector<2x8xf32> to vector<1x8xf32>
    %203 = vector.broadcast %201 : vector<8x1xf32> to vector<8x8xf32>
    %204 = vector.broadcast %202 : vector<1x8xf32> to vector<8x8xf32>
    %205 = arith.mulf %203, %204 : vector<8x8xf32>
    %206 = arith.addf %200, %205 : vector<8x8xf32>
    %cst_31 = arith.constant dense<0xFF800000> : vector<8xf32>
    %207 = vector.multi_reduction <maximumf>, %206, %cst_31 [1] : vector<8x8xf32> to vector<8xf32>
    %208 = vector.shape_cast %207 : vector<8xf32> to vector<8x1xf32>
    %209 = vector.broadcast %208 : vector<8x1xf32> to vector<8x8xf32>
    %210 = arith.subf %206, %209 : vector<8x8xf32>
    %211 = math.exp %210 : vector<8x8xf32>
    %cst_32 = arith.constant dense<0.000000e+00> : vector<8xf32>
    %212 = vector.multi_reduction <add>, %211, %cst_32 [1] : vector<8x8xf32> to vector<8xf32>
    %213 = vector.shape_cast %212 : vector<8xf32> to vector<8x1xf32>
    %214 = tpu.reciprocal %213 {approx = true} : vector<8x1xf32> -> vector<8x1xf32>
    %215 = vector.broadcast %214 : vector<8x1xf32> to vector<8x8xf32>
    %216 = arith.mulf %211, %215 : vector<8x8xf32>
    %cst_33 = arith.constant dense<0.000000e+00> : vector<8x2xf32>
    %217 = tpu.matmul %216, %195, %cst_33 {dimension_numbers = #tpu.dot_dimension_numbers<[1], [0], [0], [1], [0, 0, 1, 1], [], []>} : vector<8x8xf32>, vector<8x2xf32>, vector<8x2xf32> -> vector<8x2xf32>
    %218 = tpu.concatenate %42, %67, %92, %117, %142, %167, %192, %217 in 1 : vector<8x2xf32>, vector<8x2xf32>, vector<8x2xf32>, vector<8x2xf32>, vector<8x2xf32>, vector<8x2xf32>, vector<8x2xf32>, vector<8x2xf32> -> vector<8x16xf32>
    %219 = vector.extract_strided_slice %14 {offsets = [8, 0], sizes = [8, 2], strides = [1, 1]} : vector<16x16xf32> to vector<8x2xf32>
    %220 = vector.extract_strided_slice %17 {offsets = [0, 8], sizes = [2, 8], strides = [1, 1]} : vector<16x16xf32> to vector<2x8xf32>
    %221 = vector.extract_strided_slice %16 {offsets = [8, 0], sizes = [8, 2], strides = [1, 1]} : vector<16x16xf32> to vector<8x2xf32>
    %222 = vector.extract_strided_slice %219 {offsets = [0, 0], sizes = [8, 1], strides = [1, 1]} : vector<8x2xf32> to vector<8x1xf32>
    %223 = vector.extract_strided_slice %220 {offsets = [0, 0], sizes = [1, 8], strides = [1, 1]} : vector<2x8xf32> to vector<1x8xf32>
    %224 = vector.broadcast %222 : vector<8x1xf32> to vector<8x8xf32>
    %225 = vector.broadcast %223 : vector<1x8xf32> to vector<8x8xf32>
    %226 = arith.mulf %224, %225 : vector<8x8xf32>
    %227 = vector.extract_strided_slice %219 {offsets = [0, 1], sizes = [8, 1], strides = [1, 1]} : vector<8x2xf32> to vector<8x1xf32>
    %228 = vector.extract_strided_slice %220 {offsets = [1, 0], sizes = [1, 8], strides = [1, 1]} : vector<2x8xf32> to vector<1x8xf32>
    %229 = vector.broadcast %227 : vector<8x1xf32> to vector<8x8xf32>
    %230 = vector.broadcast %228 : vector<1x8xf32> to vector<8x8xf32>
    %231 = arith.mulf %229, %230 : vector<8x8xf32>
    %232 = arith.addf %226, %231 : vector<8x8xf32>
    %cst_34 = arith.constant dense<0xFF800000> : vector<8xf32>
    %233 = vector.multi_reduction <maximumf>, %232, %cst_34 [1] : vector<8x8xf32> to vector<8xf32>
    %234 = vector.shape_cast %233 : vector<8xf32> to vector<8x1xf32>
    %235 = vector.broadcast %234 : vector<8x1xf32> to vector<8x8xf32>
    %236 = arith.subf %232, %235 : vector<8x8xf32>
    %237 = math.exp %236 : vector<8x8xf32>
    %cst_35 = arith.constant dense<0.000000e+00> : vector<8xf32>
    %238 = vector.multi_reduction <add>, %237, %cst_35 [1] : vector<8x8xf32> to vector<8xf32>
    %239 = vector.shape_cast %238 : vector<8xf32> to vector<8x1xf32>
    %240 = tpu.reciprocal %239 {approx = true} : vector<8x1xf32> -> vector<8x1xf32>
    %241 = vector.broadcast %240 : vector<8x1xf32> to vector<8x8xf32>
    %242 = arith.mulf %237, %241 : vector<8x8xf32>
    %cst_36 = arith.constant dense<0.000000e+00> : vector<8x2xf32>
    %243 = tpu.matmul %242, %221, %cst_36 {dimension_numbers = #tpu.dot_dimension_numbers<[1], [0], [0], [1], [0, 0, 1, 1], [], []>} : vector<8x8xf32>, vector<8x2xf32>, vector<8x2xf32> -> vector<8x2xf32>
    %244 = vector.extract_strided_slice %14 {offsets = [8, 2], sizes = [8, 2], strides = [1, 1]} : vector<16x16xf32> to vector<8x2xf32>
    %245 = vector.extract_strided_slice %17 {offsets = [2, 8], sizes = [2, 8], strides = [1, 1]} : vector<16x16xf32> to vector<2x8xf32>
    %246 = vector.extract_strided_slice %16 {offsets = [8, 2], sizes = [8, 2], strides = [1, 1]} : vector<16x16xf32> to vector<8x2xf32>
    %247 = vector.extract_strided_slice %244 {offsets = [0, 0], sizes = [8, 1], strides = [1, 1]} : vector<8x2xf32> to vector<8x1xf32>
    %248 = vector.extract_strided_slice %245 {offsets = [0, 0], sizes = [1, 8], strides = [1, 1]} : vector<2x8xf32> to vector<1x8xf32>
    %249 = vector.broadcast %247 : vector<8x1xf32> to vector<8x8xf32>
    %250 = vector.broadcast %248 : vector<1x8xf32> to vector<8x8xf32>
    %251 = arith.mulf %249, %250 : vector<8x8xf32>
    %252 = vector.extract_strided_slice %244 {offsets = [0, 1], sizes = [8, 1], strides = [1, 1]} : vector<8x2xf32> to vector<8x1xf32>
    %253 = vector.extract_strided_slice %245 {offsets = [1, 0], sizes = [1, 8], strides = [1, 1]} : vector<2x8xf32> to vector<1x8xf32>
    %254 = vector.broadcast %252 : vector<8x1xf32> to vector<8x8xf32>
    %255 = vector.broadcast %253 : vector<1x8xf32> to vector<8x8xf32>
    %256 = arith.mulf %254, %255 : vector<8x8xf32>
    %257 = arith.addf %251, %256 : vector<8x8xf32>
    %cst_37 = arith.constant dense<0xFF800000> : vector<8xf32>
    %258 = vector.multi_reduction <maximumf>, %257, %cst_37 [1] : vector<8x8xf32> to vector<8xf32>
    %259 = vector.shape_cast %258 : vector<8xf32> to vector<8x1xf32>
    %260 = vector.broadcast %259 : vector<8x1xf32> to vector<8x8xf32>
    %261 = arith.subf %257, %260 : vector<8x8xf32>
    %262 = math.exp %261 : vector<8x8xf32>
    %cst_38 = arith.constant dense<0.000000e+00> : vector<8xf32>
    %263 = vector.multi_reduction <add>, %262, %cst_38 [1] : vector<8x8xf32> to vector<8xf32>
    %264 = vector.shape_cast %263 : vector<8xf32> to vector<8x1xf32>
    %265 = tpu.reciprocal %264 {approx = true} : vector<8x1xf32> -> vector<8x1xf32>
    %266 = vector.broadcast %265 : vector<8x1xf32> to vector<8x8xf32>
    %267 = arith.mulf %262, %266 : vector<8x8xf32>
    %cst_39 = arith.constant dense<0.000000e+00> : vector<8x2xf32>
    %268 = tpu.matmul %267, %246, %cst_39 {dimension_numbers = #tpu.dot_dimension_numbers<[1], [0], [0], [1], [0, 0, 1, 1], [], []>} : vector<8x8xf32>, vector<8x2xf32>, vector<8x2xf32> -> vector<8x2xf32>
    %269 = vector.extract_strided_slice %14 {offsets = [8, 4], sizes = [8, 2], strides = [1, 1]} : vector<16x16xf32> to vector<8x2xf32>
    %270 = vector.extract_strided_slice %17 {offsets = [4, 8], sizes = [2, 8], strides = [1, 1]} : vector<16x16xf32> to vector<2x8xf32>
    %271 = vector.extract_strided_slice %16 {offsets = [8, 4], sizes = [8, 2], strides = [1, 1]} : vector<16x16xf32> to vector<8x2xf32>
    %272 = vector.extract_strided_slice %269 {offsets = [0, 0], sizes = [8, 1], strides = [1, 1]} : vector<8x2xf32> to vector<8x1xf32>
    %273 = vector.extract_strided_slice %270 {offsets = [0, 0], sizes = [1, 8], strides = [1, 1]} : vector<2x8xf32> to vector<1x8xf32>
    %274 = vector.broadcast %272 : vector<8x1xf32> to vector<8x8xf32>
    %275 = vector.broadcast %273 : vector<1x8xf32> to vector<8x8xf32>
    %276 = arith.mulf %274, %275 : vector<8x8xf32>
    %277 = vector.extract_strided_slice %269 {offsets = [0, 1], sizes = [8, 1], strides = [1, 1]} : vector<8x2xf32> to vector<8x1xf32>
    %278 = vector.extract_strided_slice %270 {offsets = [1, 0], sizes = [1, 8], strides = [1, 1]} : vector<2x8xf32> to vector<1x8xf32>
    %279 = vector.broadcast %277 : vector<8x1xf32> to vector<8x8xf32>
    %280 = vector.broadcast %278 : vector<1x8xf32> to vector<8x8xf32>
    %281 = arith.mulf %279, %280 : vector<8x8xf32>
    %282 = arith.addf %276, %281 : vector<8x8xf32>
    %cst_40 = arith.constant dense<0xFF800000> : vector<8xf32>
    %283 = vector.multi_reduction <maximumf>, %282, %cst_40 [1] : vector<8x8xf32> to vector<8xf32>
    %284 = vector.shape_cast %283 : vector<8xf32> to vector<8x1xf32>
    %285 = vector.broadcast %284 : vector<8x1xf32> to vector<8x8xf32>
    %286 = arith.subf %282, %285 : vector<8x8xf32>
    %287 = math.exp %286 : vector<8x8xf32>
    %cst_41 = arith.constant dense<0.000000e+00> : vector<8xf32>
    %288 = vector.multi_reduction <add>, %287, %cst_41 [1] : vector<8x8xf32> to vector<8xf32>
    %289 = vector.shape_cast %288 : vector<8xf32> to vector<8x1xf32>
    %290 = tpu.reciprocal %289 {approx = true} : vector<8x1xf32> -> vector<8x1xf32>
    %291 = vector.broadcast %290 : vector<8x1xf32> to vector<8x8xf32>
    %292 = arith.mulf %287, %291 : vector<8x8xf32>
    %cst_42 = arith.constant dense<0.000000e+00> : vector<8x2xf32>
    %293 = tpu.matmul %292, %271, %cst_42 {dimension_numbers = #tpu.dot_dimension_numbers<[1], [0], [0], [1], [0, 0, 1, 1], [], []>} : vector<8x8xf32>, vector<8x2xf32>, vector<8x2xf32> -> vector<8x2xf32>
    %294 = vector.extract_strided_slice %14 {offsets = [8, 6], sizes = [8, 2], strides = [1, 1]} : vector<16x16xf32> to vector<8x2xf32>
    %295 = vector.extract_strided_slice %17 {offsets = [6, 8], sizes = [2, 8], strides = [1, 1]} : vector<16x16xf32> to vector<2x8xf32>
    %296 = vector.extract_strided_slice %16 {offsets = [8, 6], sizes = [8, 2], strides = [1, 1]} : vector<16x16xf32> to vector<8x2xf32>
    %297 = vector.extract_strided_slice %294 {offsets = [0, 0], sizes = [8, 1], strides = [1, 1]} : vector<8x2xf32> to vector<8x1xf32>
    %298 = vector.extract_strided_slice %295 {offsets = [0, 0], sizes = [1, 8], strides = [1, 1]} : vector<2x8xf32> to vector<1x8xf32>
    %299 = vector.broadcast %297 : vector<8x1xf32> to vector<8x8xf32>
    %300 = vector.broadcast %298 : vector<1x8xf32> to vector<8x8xf32>
    %301 = arith.mulf %299, %300 : vector<8x8xf32>
    %302 = vector.extract_strided_slice %294 {offsets = [0, 1], sizes = [8, 1], strides = [1, 1]} : vector<8x2xf32> to vector<8x1xf32>
    %303 = vector.extract_strided_slice %295 {offsets = [1, 0], sizes = [1, 8], strides = [1, 1]} : vector<2x8xf32> to vector<1x8xf32>
    %304 = vector.broadcast %302 : vector<8x1xf32> to vector<8x8xf32>
    %305 = vector.broadcast %303 : vector<1x8xf32> to vector<8x8xf32>
    %306 = arith.mulf %304, %305 : vector<8x8xf32>
    %307 = arith.addf %301, %306 : vector<8x8xf32>
    %cst_43 = arith.constant dense<0xFF800000> : vector<8xf32>
    %308 = vector.multi_reduction <maximumf>, %307, %cst_43 [1] : vector<8x8xf32> to vector<8xf32>
    %309 = vector.shape_cast %308 : vector<8xf32> to vector<8x1xf32>
    %310 = vector.broadcast %309 : vector<8x1xf32> to vector<8x8xf32>
    %311 = arith.subf %307, %310 : vector<8x8xf32>
    %312 = math.exp %311 : vector<8x8xf32>
    %cst_44 = arith.constant dense<0.000000e+00> : vector<8xf32>
    %313 = vector.multi_reduction <add>, %312, %cst_44 [1] : vector<8x8xf32> to vector<8xf32>
    %314 = vector.shape_cast %313 : vector<8xf32> to vector<8x1xf32>
    %315 = tpu.reciprocal %314 {approx = true} : vector<8x1xf32> -> vector<8x1xf32>
    %316 = vector.broadcast %315 : vector<8x1xf32> to vector<8x8xf32>
    %317 = arith.mulf %312, %316 : vector<8x8xf32>
    %cst_45 = arith.constant dense<0.000000e+00> : vector<8x2xf32>
    %318 = tpu.matmul %317, %296, %cst_45 {dimension_numbers = #tpu.dot_dimension_numbers<[1], [0], [0], [1], [0, 0, 1, 1], [], []>} : vector<8x8xf32>, vector<8x2xf32>, vector<8x2xf32> -> vector<8x2xf32>
    %319 = vector.extract_strided_slice %14 {offsets = [8, 8], sizes = [8, 2], strides = [1, 1]} : vector<16x16xf32> to vector<8x2xf32>
    %320 = vector.extract_strided_slice %17 {offsets = [8, 8], sizes = [2, 8], strides = [1, 1]} : vector<16x16xf32> to vector<2x8xf32>
    %321 = vector.extract_strided_slice %16 {offsets = [8, 8], sizes = [8, 2], strides = [1, 1]} : vector<16x16xf32> to vector<8x2xf32>
    %322 = vector.extract_strided_slice %319 {offsets = [0, 0], sizes = [8, 1], strides = [1, 1]} : vector<8x2xf32> to vector<8x1xf32>
    %323 = vector.extract_strided_slice %320 {offsets = [0, 0], sizes = [1, 8], strides = [1, 1]} : vector<2x8xf32> to vector<1x8xf32>
    %324 = vector.broadcast %322 : vector<8x1xf32> to vector<8x8xf32>
    %325 = vector.broadcast %323 : vector<1x8xf32> to vector<8x8xf32>
    %326 = arith.mulf %324, %325 : vector<8x8xf32>
    %327 = vector.extract_strided_slice %319 {offsets = [0, 1], sizes = [8, 1], strides = [1, 1]} : vector<8x2xf32> to vector<8x1xf32>
    %328 = vector.extract_strided_slice %320 {offsets = [1, 0], sizes = [1, 8], strides = [1, 1]} : vector<2x8xf32> to vector<1x8xf32>
    %329 = vector.broadcast %327 : vector<8x1xf32> to vector<8x8xf32>
    %330 = vector.broadcast %328 : vector<1x8xf32> to vector<8x8xf32>
    %331 = arith.mulf %329, %330 : vector<8x8xf32>
    %332 = arith.addf %326, %331 : vector<8x8xf32>
    %cst_46 = arith.constant dense<0xFF800000> : vector<8xf32>
    %333 = vector.multi_reduction <maximumf>, %332, %cst_46 [1] : vector<8x8xf32> to vector<8xf32>
    %334 = vector.shape_cast %333 : vector<8xf32> to vector<8x1xf32>
    %335 = vector.broadcast %334 : vector<8x1xf32> to vector<8x8xf32>
    %336 = arith.subf %332, %335 : vector<8x8xf32>
    %337 = math.exp %336 : vector<8x8xf32>
    %cst_47 = arith.constant dense<0.000000e+00> : vector<8xf32>
    %338 = vector.multi_reduction <add>, %337, %cst_47 [1] : vector<8x8xf32> to vector<8xf32>
    %339 = vector.shape_cast %338 : vector<8xf32> to vector<8x1xf32>
    %340 = tpu.reciprocal %339 {approx = true} : vector<8x1xf32> -> vector<8x1xf32>
    %341 = vector.broadcast %340 : vector<8x1xf32> to vector<8x8xf32>
    %342 = arith.mulf %337, %341 : vector<8x8xf32>
    %cst_48 = arith.constant dense<0.000000e+00> : vector<8x2xf32>
    %343 = tpu.matmul %342, %321, %cst_48 {dimension_numbers = #tpu.dot_dimension_numbers<[1], [0], [0], [1], [0, 0, 1, 1], [], []>} : vector<8x8xf32>, vector<8x2xf32>, vector<8x2xf32> -> vector<8x2xf32>
    %344 = vector.extract_strided_slice %14 {offsets = [8, 10], sizes = [8, 2], strides = [1, 1]} : vector<16x16xf32> to vector<8x2xf32>
    %345 = vector.extract_strided_slice %17 {offsets = [10, 8], sizes = [2, 8], strides = [1, 1]} : vector<16x16xf32> to vector<2x8xf32>
    %346 = vector.extract_strided_slice %16 {offsets = [8, 10], sizes = [8, 2], strides = [1, 1]} : vector<16x16xf32> to vector<8x2xf32>
    %347 = vector.extract_strided_slice %344 {offsets = [0, 0], sizes = [8, 1], strides = [1, 1]} : vector<8x2xf32> to vector<8x1xf32>
    %348 = vector.extract_strided_slice %345 {offsets = [0, 0], sizes = [1, 8], strides = [1, 1]} : vector<2x8xf32> to vector<1x8xf32>
    %349 = vector.broadcast %347 : vector<8x1xf32> to vector<8x8xf32>
    %350 = vector.broadcast %348 : vector<1x8xf32> to vector<8x8xf32>
    %351 = arith.mulf %349, %350 : vector<8x8xf32>
    %352 = vector.extract_strided_slice %344 {offsets = [0, 1], sizes = [8, 1], strides = [1, 1]} : vector<8x2xf32> to vector<8x1xf32>
    %353 = vector.extract_strided_slice %345 {offsets = [1, 0], sizes = [1, 8], strides = [1, 1]} : vector<2x8xf32> to vector<1x8xf32>
    %354 = vector.broadcast %352 : vector<8x1xf32> to vector<8x8xf32>
    %355 = vector.broadcast %353 : vector<1x8xf32> to vector<8x8xf32>
    %356 = arith.mulf %354, %355 : vector<8x8xf32>
    %357 = arith.addf %351, %356 : vector<8x8xf32>
    %cst_49 = arith.constant dense<0xFF800000> : vector<8xf32>
    %358 = vector.multi_reduction <maximumf>, %357, %cst_49 [1] : vector<8x8xf32> to vector<8xf32>
    %359 = vector.shape_cast %358 : vector<8xf32> to vector<8x1xf32>
    %360 = vector.broadcast %359 : vector<8x1xf32> to vector<8x8xf32>
    %361 = arith.subf %357, %360 : vector<8x8xf32>
    %362 = math.exp %361 : vector<8x8xf32>
    %cst_50 = arith.constant dense<0.000000e+00> : vector<8xf32>
    %363 = vector.multi_reduction <add>, %362, %cst_50 [1] : vector<8x8xf32> to vector<8xf32>
    %364 = vector.shape_cast %363 : vector<8xf32> to vector<8x1xf32>
    %365 = tpu.reciprocal %364 {approx = true} : vector<8x1xf32> -> vector<8x1xf32>
    %366 = vector.broadcast %365 : vector<8x1xf32> to vector<8x8xf32>
    %367 = arith.mulf %362, %366 : vector<8x8xf32>
    %cst_51 = arith.constant dense<0.000000e+00> : vector<8x2xf32>
    %368 = tpu.matmul %367, %346, %cst_51 {dimension_numbers = #tpu.dot_dimension_numbers<[1], [0], [0], [1], [0, 0, 1, 1], [], []>} : vector<8x8xf32>, vector<8x2xf32>, vector<8x2xf32> -> vector<8x2xf32>
    %369 = vector.extract_strided_slice %14 {offsets = [8, 12], sizes = [8, 2], strides = [1, 1]} : vector<16x16xf32> to vector<8x2xf32>
    %370 = vector.extract_strided_slice %17 {offsets = [12, 8], sizes = [2, 8], strides = [1, 1]} : vector<16x16xf32> to vector<2x8xf32>
    %371 = vector.extract_strided_slice %16 {offsets = [8, 12], sizes = [8, 2], strides = [1, 1]} : vector<16x16xf32> to vector<8x2xf32>
    %372 = vector.extract_strided_slice %369 {offsets = [0, 0], sizes = [8, 1], strides = [1, 1]} : vector<8x2xf32> to vector<8x1xf32>
    %373 = vector.extract_strided_slice %370 {offsets = [0, 0], sizes = [1, 8], strides = [1, 1]} : vector<2x8xf32> to vector<1x8xf32>
    %374 = vector.broadcast %372 : vector<8x1xf32> to vector<8x8xf32>
    %375 = vector.broadcast %373 : vector<1x8xf32> to vector<8x8xf32>
    %376 = arith.mulf %374, %375 : vector<8x8xf32>
    %377 = vector.extract_strided_slice %369 {offsets = [0, 1], sizes = [8, 1], strides = [1, 1]} : vector<8x2xf32> to vector<8x1xf32>
    %378 = vector.extract_strided_slice %370 {offsets = [1, 0], sizes = [1, 8], strides = [1, 1]} : vector<2x8xf32> to vector<1x8xf32>
    %379 = vector.broadcast %377 : vector<8x1xf32> to vector<8x8xf32>
    %380 = vector.broadcast %378 : vector<1x8xf32> to vector<8x8xf32>
    %381 = arith.mulf %379, %380 : vector<8x8xf32>
    %382 = arith.addf %376, %381 : vector<8x8xf32>
    %cst_52 = arith.constant dense<0xFF800000> : vector<8xf32>
    %383 = vector.multi_reduction <maximumf>, %382, %cst_52 [1] : vector<8x8xf32> to vector<8xf32>
    %384 = vector.shape_cast %383 : vector<8xf32> to vector<8x1xf32>
    %385 = vector.broadcast %384 : vector<8x1xf32> to vector<8x8xf32>
    %386 = arith.subf %382, %385 : vector<8x8xf32>
    %387 = math.exp %386 : vector<8x8xf32>
    %cst_53 = arith.constant dense<0.000000e+00> : vector<8xf32>
    %388 = vector.multi_reduction <add>, %387, %cst_53 [1] : vector<8x8xf32> to vector<8xf32>
    %389 = vector.shape_cast %388 : vector<8xf32> to vector<8x1xf32>
    %390 = tpu.reciprocal %389 {approx = true} : vector<8x1xf32> -> vector<8x1xf32>
    %391 = vector.broadcast %390 : vector<8x1xf32> to vector<8x8xf32>
    %392 = arith.mulf %387, %391 : vector<8x8xf32>
    %cst_54 = arith.constant dense<0.000000e+00> : vector<8x2xf32>
    %393 = tpu.matmul %392, %371, %cst_54 {dimension_numbers = #tpu.dot_dimension_numbers<[1], [0], [0], [1], [0, 0, 1, 1], [], []>} : vector<8x8xf32>, vector<8x2xf32>, vector<8x2xf32> -> vector<8x2xf32>
    %394 = vector.extract_strided_slice %14 {offsets = [8, 14], sizes = [8, 2], strides = [1, 1]} : vector<16x16xf32> to vector<8x2xf32>
    %395 = vector.extract_strided_slice %17 {offsets = [14, 8], sizes = [2, 8], strides = [1, 1]} : vector<16x16xf32> to vector<2x8xf32>
    %396 = vector.extract_strided_slice %16 {offsets = [8, 14], sizes = [8, 2], strides = [1, 1]} : vector<16x16xf32> to vector<8x2xf32>
    %397 = vector.extract_strided_slice %394 {offsets = [0, 0], sizes = [8, 1], strides = [1, 1]} : vector<8x2xf32> to vector<8x1xf32>
    %398 = vector.extract_strided_slice %395 {offsets = [0, 0], sizes = [1, 8], strides = [1, 1]} : vector<2x8xf32> to vector<1x8xf32>
    %399 = vector.broadcast %397 : vector<8x1xf32> to vector<8x8xf32>
    %400 = vector.broadcast %398 : vector<1x8xf32> to vector<8x8xf32>
    %401 = arith.mulf %399, %400 : vector<8x8xf32>
    %402 = vector.extract_strided_slice %394 {offsets = [0, 1], sizes = [8, 1], strides = [1, 1]} : vector<8x2xf32> to vector<8x1xf32>
    %403 = vector.extract_strided_slice %395 {offsets = [1, 0], sizes = [1, 8], strides = [1, 1]} : vector<2x8xf32> to vector<1x8xf32>
    %404 = vector.broadcast %402 : vector<8x1xf32> to vector<8x8xf32>
    %405 = vector.broadcast %403 : vector<1x8xf32> to vector<8x8xf32>
    %406 = arith.mulf %404, %405 : vector<8x8xf32>
    %407 = arith.addf %401, %406 : vector<8x8xf32>
    %cst_55 = arith.constant dense<0xFF800000> : vector<8xf32>
    %408 = vector.multi_reduction <maximumf>, %407, %cst_55 [1] : vector<8x8xf32> to vector<8xf32>
    %409 = vector.shape_cast %408 : vector<8xf32> to vector<8x1xf32>
    %410 = vector.broadcast %409 : vector<8x1xf32> to vector<8x8xf32>
    %411 = arith.subf %407, %410 : vector<8x8xf32>
    %412 = math.exp %411 : vector<8x8xf32>
    %cst_56 = arith.constant dense<0.000000e+00> : vector<8xf32>
    %413 = vector.multi_reduction <add>, %412, %cst_56 [1] : vector<8x8xf32> to vector<8xf32>
    %414 = vector.shape_cast %413 : vector<8xf32> to vector<8x1xf32>
    %415 = tpu.reciprocal %414 {approx = true} : vector<8x1xf32> -> vector<8x1xf32>
    %416 = vector.broadcast %415 : vector<8x1xf32> to vector<8x8xf32>
    %417 = arith.mulf %412, %416 : vector<8x8xf32>
    %cst_57 = arith.constant dense<0.000000e+00> : vector<8x2xf32>
    %418 = tpu.matmul %417, %396, %cst_57 {dimension_numbers = #tpu.dot_dimension_numbers<[1], [0], [0], [1], [0, 0, 1, 1], [], []>} : vector<8x8xf32>, vector<8x2xf32>, vector<8x2xf32> -> vector<8x2xf32>
    %419 = tpu.concatenate %243, %268, %293, %318, %343, %368, %393, %418 in 1 : vector<8x2xf32>, vector<8x2xf32>, vector<8x2xf32>, vector<8x2xf32>, vector<8x2xf32>, vector<8x2xf32>, vector<8x2xf32>, vector<8x2xf32> -> vector<8x16xf32>
    %420 = tpu.concatenate %218, %419 in 0 : vector<8x16xf32>, vector<8x16xf32> -> vector<16x16xf32>
    %c0_58 = arith.constant 0 : index
    %c0_59 = arith.constant 0 : index
    %421 = vector.load %arg5[%c0_58, %c0_59] : memref<16x16xf32, #tpu.memory_space<vmem>>, vector<16x16xf32>
    %cst_60 = arith.constant dense<0.000000e+00> : vector<16x16xf32>
    %422 = tpu.matmul %420, %421, %cst_60 {dimension_numbers = #tpu.dot_dimension_numbers<[1], [0], [0], [1], [0, 0, 1, 1], [], []>} : vector<16x16xf32>, vector<16x16xf32>, vector<16x16xf32> -> vector<16x16xf32>
    %c0_61 = arith.constant 0 : index
    %c0_62 = arith.constant 0 : index
    %423 = vector.load %arg6[%c0_61, %c0_62] : memref<1x16xf32, #tpu.memory_space<vmem>>, vector<1x16xf32>
    %424 = vector.broadcast %423 : vector<1x16xf32> to vector<16x16xf32>
    %425 = arith.addf %422, %424 : vector<16x16xf32>
    %426 = arith.addf %8, %425 : vector<16x16xf32>
    %c0_63 = arith.constant 0 : index
    %c0_64 = arith.constant 0 : index
    %427 = vector.load %arg7[%c0_63, %c0_64] : memref<1x16xf32, #tpu.memory_space<vmem>>, vector<1x16xf32>
    %c0_65 = arith.constant 0 : index
    %c0_66 = arith.constant 0 : index
    %428 = vector.load %arg8[%c0_65, %c0_66] : memref<1x16xf32, #tpu.memory_space<vmem>>, vector<1x16xf32>
    %cst_67 = arith.constant dense<0.000000e+00> : vector<16xf32>
    %429 = vector.multi_reduction <add>, %426, %cst_67 [1] : vector<16x16xf32> to vector<16xf32>
    %430 = vector.shape_cast %429 : vector<16xf32> to vector<16x1xf32>
    %cst_68 = arith.constant 1.600000e+01 : f32
    %431 = vector.broadcast %cst_68 : f32 to vector<16x1xf32>
    %432 = arith.divf %430, %431 : vector<16x1xf32>
    %433 = vector.broadcast %432 : vector<16x1xf32> to vector<16x16xf32>
    %434 = arith.subf %426, %433 : vector<16x16xf32>
    %435 = arith.mulf %434, %434 : vector<16x16xf32>
    %cst_69 = arith.constant dense<0.000000e+00> : vector<16xf32>
    %436 = vector.multi_reduction <add>, %435, %cst_69 [1] : vector<16x16xf32> to vector<16xf32>
    %437 = vector.shape_cast %436 : vector<16xf32> to vector<16x1xf32>
    %cst_70 = arith.constant 1.600000e+01 : f32
    %438 = vector.broadcast %cst_70 : f32 to vector<16x1xf32>
    %439 = arith.divf %437, %438 : vector<16x1xf32>
    %cst_71 = arith.constant 9.99999974E-6 : f32
    %440 = vector.broadcast %cst_71 : f32 to vector<16x1xf32>
    %441 = arith.addf %439, %440 : vector<16x1xf32>
    %442 = math.rsqrt %441 : vector<16x1xf32>
    %443 = vector.broadcast %442 : vector<16x1xf32> to vector<16x16xf32>
    %444 = arith.mulf %434, %443 : vector<16x16xf32>
    %445 = vector.broadcast %427 : vector<1x16xf32> to vector<16x16xf32>
    %446 = arith.mulf %444, %445 : vector<16x16xf32>
    %447 = vector.broadcast %428 : vector<1x16xf32> to vector<16x16xf32>
    %448 = arith.addf %446, %447 : vector<16x16xf32>
    %c0_72 = arith.constant 0 : index
    %c0_73 = arith.constant 0 : index
    %449 = vector.load %arg9[%c0_72, %c0_73] : memref<16x512xf32, #tpu.memory_space<vmem>>, vector<16x512xf32>
    %cst_74 = arith.constant dense<0.000000e+00> : vector<16x512xf32>
    %450 = tpu.matmul %448, %449, %cst_74 {dimension_numbers = #tpu.dot_dimension_numbers<[1], [0], [0], [1], [0, 0, 1, 1], [], []>} : vector<16x16xf32>, vector<16x512xf32>, vector<16x512xf32> -> vector<16x512xf32>
    %c0_75 = arith.constant 0 : index
    %c0_76 = arith.constant 0 : index
    %451 = vector.load %arg10[%c0_75, %c0_76] : memref<1x512xf32, #tpu.memory_space<vmem>>, vector<1x512xf32>
    %452 = vector.broadcast %451 : vector<1x512xf32> to vector<16x512xf32>
    %453 = arith.addf %450, %452 : vector<16x512xf32>
    %cst_77 = arith.constant 0.000000e+00 : f32
    %454 = vector.broadcast %cst_77 : f32 to vector<16x512xf32>
    %455 = arith.maximumf %453, %454 : vector<16x512xf32>
    %c0_78 = arith.constant 0 : index
    %c0_79 = arith.constant 0 : index
    %456 = vector.load %arg11[%c0_78, %c0_79] : memref<512x16xf32, #tpu.memory_space<vmem>>, vector<512x16xf32>
    %cst_80 = arith.constant dense<0.000000e+00> : vector<16x16xf32>
    %457 = tpu.matmul %455, %456, %cst_80 {dimension_numbers = #tpu.dot_dimension_numbers<[1], [0], [0], [1], [0, 0, 1, 1], [], []>} : vector<16x512xf32>, vector<512x16xf32>, vector<16x16xf32> -> vector<16x16xf32>
    %c0_81 = arith.constant 0 : index
    %c0_82 = arith.constant 0 : index
    %458 = vector.load %arg12[%c0_81, %c0_82] : memref<1x16xf32, #tpu.memory_space<vmem>>, vector<1x16xf32>
    %459 = vector.broadcast %458 : vector<1x16xf32> to vector<16x16xf32>
    %460 = arith.addf %457, %459 : vector<16x16xf32>
    %461 = arith.addf %448, %460 : vector<16x16xf32>
    %c0_83 = arith.constant 0 : index
    %c0_84 = arith.constant 0 : index
    %462 = vector.load %arg13[%c0_83, %c0_84] : memref<1x16xf32, #tpu.memory_space<vmem>>, vector<1x16xf32>
    %c0_85 = arith.constant 0 : index
    %c0_86 = arith.constant 0 : index
    %463 = vector.load %arg14[%c0_85, %c0_86] : memref<1x16xf32, #tpu.memory_space<vmem>>, vector<1x16xf32>
    %cst_87 = arith.constant dense<0.000000e+00> : vector<16xf32>
    %464 = vector.multi_reduction <add>, %461, %cst_87 [1] : vector<16x16xf32> to vector<16xf32>
    %465 = vector.shape_cast %464 : vector<16xf32> to vector<16x1xf32>
    %cst_88 = arith.constant 1.600000e+01 : f32
    %466 = vector.broadcast %cst_88 : f32 to vector<16x1xf32>
    %467 = arith.divf %465, %466 : vector<16x1xf32>
    %468 = vector.broadcast %467 : vector<16x1xf32> to vector<16x16xf32>
    %469 = arith.subf %461, %468 : vector<16x16xf32>
    %470 = arith.mulf %469, %469 : vector<16x16xf32>
    %cst_89 = arith.constant dense<0.000000e+00> : vector<16xf32>
    %471 = vector.multi_reduction <add>, %470, %cst_89 [1] : vector<16x16xf32> to vector<16xf32>
    %472 = vector.shape_cast %471 : vector<16xf32> to vector<16x1xf32>
    %cst_90 = arith.constant 1.600000e+01 : f32
    %473 = vector.broadcast %cst_90 : f32 to vector<16x1xf32>
    %474 = arith.divf %472, %473 : vector<16x1xf32>
    %cst_91 = arith.constant 9.99999974E-6 : f32
    %475 = vector.broadcast %cst_91 : f32 to vector<16x1xf32>
    %476 = arith.addf %474, %475 : vector<16x1xf32>
    %477 = math.rsqrt %476 : vector<16x1xf32>
    %478 = vector.broadcast %477 : vector<16x1xf32> to vector<16x16xf32>
    %479 = arith.mulf %469, %478 : vector<16x16xf32>
    %480 = vector.broadcast %462 : vector<1x16xf32> to vector<16x16xf32>
    %481 = arith.mulf %479, %480 : vector<16x16xf32>
    %482 = vector.broadcast %463 : vector<1x16xf32> to vector<16x16xf32>
    %483 = arith.addf %481, %482 : vector<16x16xf32>
    %484 = tpu.transpose %483, [1, 0] : vector<16x16xf32> -> vector<16x16xf32>
    %c0_92 = arith.constant 0 : index
    %c0_93 = arith.constant 0 : index
    %485 = vector.load %arg16[%c0_92, %c0_93] : memref<64x256xf32, #tpu.memory_space<vmem>>, vector<64x256xf32>
    %c0_94 = arith.constant 0 : index
    %c0_95 = arith.constant 0 : index
    %486 = vector.load %arg15[%c0_94, %c0_95] : memref<16x256xf32, #tpu.memory_space<vmem>>, vector<16x256xf32>
    %cst_96 = arith.constant dense<0.000000e+00> : vector<16x256xf32>
    %487 = tpu.matmul %484, %486, %cst_96 {dimension_numbers = #tpu.dot_dimension_numbers<[1], [0], [0], [1], [0, 0, 1, 1], [], []>} : vector<16x16xf32>, vector<16x256xf32>, vector<16x256xf32> -> vector<16x256xf32>
    %c0_97 = arith.constant 0 : index
    %c0_98 = arith.constant 0 : index
    %488 = vector.load %arg17[%c0_97, %c0_98] : memref<1x256xf32, #tpu.memory_space<vmem>>, vector<1x256xf32>
    %489 = vector.broadcast %488 : vector<1x256xf32> to vector<16x256xf32>
    %490 = arith.addf %487, %489 : vector<16x256xf32>
    %cst_99 = arith.constant 0.000000e+00 : f32
    %491 = vector.broadcast %cst_99 : f32 to vector<1x64xf32>
    %cst_100 = arith.constant 0.000000e+00 : f32
    %492 = vector.broadcast %cst_100 : f32 to vector<1x64xf32>
    %493 = vector.extract_strided_slice %490 {offsets = [0, 0], sizes = [1, 256], strides = [1, 1]} : vector<16x256xf32> to vector<1x256xf32>
    %cst_101 = arith.constant dense<0.000000e+00> : vector<1x256xf32>
    %494 = tpu.matmul %491, %485, %cst_101 {dimension_numbers = #tpu.dot_dimension_numbers<[1], [0], [0], [1], [0, 0, 1, 1], [], []>} : vector<1x64xf32>, vector<64x256xf32>, vector<1x256xf32> -> vector<1x256xf32>
    %495 = arith.addf %493, %494 : vector<1x256xf32>
    %496 = vector.extract_strided_slice %495 {offsets = [0, 0], sizes = [1, 192], strides = [1, 1]} : vector<1x256xf32> to vector<1x192xf32>
    %497 = arith.negf %496 : vector<1x192xf32>
    %498 = math.exp %497 : vector<1x192xf32>
    %cst_102 = arith.constant 1.000000e+00 : f32
    %499 = vector.broadcast %cst_102 : f32 to vector<1x192xf32>
    %500 = arith.addf %499, %498 : vector<1x192xf32>
    %501 = arith.divf %499, %500 : vector<1x192xf32>
    %502 = vector.extract_strided_slice %495 {offsets = [0, 192], sizes = [1, 64], strides = [1, 1]} : vector<1x256xf32> to vector<1x64xf32>
    %503 = math.tanh %502 : vector<1x64xf32>
    %504 = vector.extract_strided_slice %501 {offsets = [0, 0], sizes = [1, 64], strides = [1, 1]} : vector<1x192xf32> to vector<1x64xf32>
    %505 = vector.extract_strided_slice %501 {offsets = [0, 64], sizes = [1, 64], strides = [1, 1]} : vector<1x192xf32> to vector<1x64xf32>
    %506 = vector.extract_strided_slice %501 {offsets = [0, 128], sizes = [1, 64], strides = [1, 1]} : vector<1x192xf32> to vector<1x64xf32>
    %507 = arith.mulf %505, %492 : vector<1x64xf32>
    %508 = arith.mulf %504, %503 : vector<1x64xf32>
    %509 = arith.addf %507, %508 : vector<1x64xf32>
    %510 = math.tanh %509 : vector<1x64xf32>
    %511 = arith.mulf %506, %510 : vector<1x64xf32>
    %512 = vector.extract_strided_slice %490 {offsets = [1, 0], sizes = [1, 256], strides = [1, 1]} : vector<16x256xf32> to vector<1x256xf32>
    %cst_103 = arith.constant dense<0.000000e+00> : vector<1x256xf32>
    %513 = tpu.matmul %511, %485, %cst_103 {dimension_numbers = #tpu.dot_dimension_numbers<[1], [0], [0], [1], [0, 0, 1, 1], [], []>} : vector<1x64xf32>, vector<64x256xf32>, vector<1x256xf32> -> vector<1x256xf32>
    %514 = arith.addf %512, %513 : vector<1x256xf32>
    %515 = vector.extract_strided_slice %514 {offsets = [0, 0], sizes = [1, 192], strides = [1, 1]} : vector<1x256xf32> to vector<1x192xf32>
    %516 = arith.negf %515 : vector<1x192xf32>
    %517 = math.exp %516 : vector<1x192xf32>
    %cst_104 = arith.constant 1.000000e+00 : f32
    %518 = vector.broadcast %cst_104 : f32 to vector<1x192xf32>
    %519 = arith.addf %518, %517 : vector<1x192xf32>
    %520 = arith.divf %518, %519 : vector<1x192xf32>
    %521 = vector.extract_strided_slice %514 {offsets = [0, 192], sizes = [1, 64], strides = [1, 1]} : vector<1x256xf32> to vector<1x64xf32>
    %522 = math.tanh %521 : vector<1x64xf32>
    %523 = vector.extract_strided_slice %520 {offsets = [0, 0], sizes = [1, 64], strides = [1, 1]} : vector<1x192xf32> to vector<1x64xf32>
    %524 = vector.extract_strided_slice %520 {offsets = [0, 64], sizes = [1, 64], strides = [1, 1]} : vector<1x192xf32> to vector<1x64xf32>
    %525 = vector.extract_strided_slice %520 {offsets = [0, 128], sizes = [1, 64], strides = [1, 1]} : vector<1x192xf32> to vector<1x64xf32>
    %526 = arith.mulf %524, %509 : vector<1x64xf32>
    %527 = arith.mulf %523, %522 : vector<1x64xf32>
    %528 = arith.addf %526, %527 : vector<1x64xf32>
    %529 = math.tanh %528 : vector<1x64xf32>
    %530 = arith.mulf %525, %529 : vector<1x64xf32>
    %531 = vector.extract_strided_slice %490 {offsets = [2, 0], sizes = [1, 256], strides = [1, 1]} : vector<16x256xf32> to vector<1x256xf32>
    %cst_105 = arith.constant dense<0.000000e+00> : vector<1x256xf32>
    %532 = tpu.matmul %530, %485, %cst_105 {dimension_numbers = #tpu.dot_dimension_numbers<[1], [0], [0], [1], [0, 0, 1, 1], [], []>} : vector<1x64xf32>, vector<64x256xf32>, vector<1x256xf32> -> vector<1x256xf32>
    %533 = arith.addf %531, %532 : vector<1x256xf32>
    %534 = vector.extract_strided_slice %533 {offsets = [0, 0], sizes = [1, 192], strides = [1, 1]} : vector<1x256xf32> to vector<1x192xf32>
    %535 = arith.negf %534 : vector<1x192xf32>
    %536 = math.exp %535 : vector<1x192xf32>
    %cst_106 = arith.constant 1.000000e+00 : f32
    %537 = vector.broadcast %cst_106 : f32 to vector<1x192xf32>
    %538 = arith.addf %537, %536 : vector<1x192xf32>
    %539 = arith.divf %537, %538 : vector<1x192xf32>
    %540 = vector.extract_strided_slice %533 {offsets = [0, 192], sizes = [1, 64], strides = [1, 1]} : vector<1x256xf32> to vector<1x64xf32>
    %541 = math.tanh %540 : vector<1x64xf32>
    %542 = vector.extract_strided_slice %539 {offsets = [0, 0], sizes = [1, 64], strides = [1, 1]} : vector<1x192xf32> to vector<1x64xf32>
    %543 = vector.extract_strided_slice %539 {offsets = [0, 64], sizes = [1, 64], strides = [1, 1]} : vector<1x192xf32> to vector<1x64xf32>
    %544 = vector.extract_strided_slice %539 {offsets = [0, 128], sizes = [1, 64], strides = [1, 1]} : vector<1x192xf32> to vector<1x64xf32>
    %545 = arith.mulf %543, %528 : vector<1x64xf32>
    %546 = arith.mulf %542, %541 : vector<1x64xf32>
    %547 = arith.addf %545, %546 : vector<1x64xf32>
    %548 = math.tanh %547 : vector<1x64xf32>
    %549 = arith.mulf %544, %548 : vector<1x64xf32>
    %550 = vector.extract_strided_slice %490 {offsets = [3, 0], sizes = [1, 256], strides = [1, 1]} : vector<16x256xf32> to vector<1x256xf32>
    %cst_107 = arith.constant dense<0.000000e+00> : vector<1x256xf32>
    %551 = tpu.matmul %549, %485, %cst_107 {dimension_numbers = #tpu.dot_dimension_numbers<[1], [0], [0], [1], [0, 0, 1, 1], [], []>} : vector<1x64xf32>, vector<64x256xf32>, vector<1x256xf32> -> vector<1x256xf32>
    %552 = arith.addf %550, %551 : vector<1x256xf32>
    %553 = vector.extract_strided_slice %552 {offsets = [0, 0], sizes = [1, 192], strides = [1, 1]} : vector<1x256xf32> to vector<1x192xf32>
    %554 = arith.negf %553 : vector<1x192xf32>
    %555 = math.exp %554 : vector<1x192xf32>
    %cst_108 = arith.constant 1.000000e+00 : f32
    %556 = vector.broadcast %cst_108 : f32 to vector<1x192xf32>
    %557 = arith.addf %556, %555 : vector<1x192xf32>
    %558 = arith.divf %556, %557 : vector<1x192xf32>
    %559 = vector.extract_strided_slice %552 {offsets = [0, 192], sizes = [1, 64], strides = [1, 1]} : vector<1x256xf32> to vector<1x64xf32>
    %560 = math.tanh %559 : vector<1x64xf32>
    %561 = vector.extract_strided_slice %558 {offsets = [0, 0], sizes = [1, 64], strides = [1, 1]} : vector<1x192xf32> to vector<1x64xf32>
    %562 = vector.extract_strided_slice %558 {offsets = [0, 64], sizes = [1, 64], strides = [1, 1]} : vector<1x192xf32> to vector<1x64xf32>
    %563 = vector.extract_strided_slice %558 {offsets = [0, 128], sizes = [1, 64], strides = [1, 1]} : vector<1x192xf32> to vector<1x64xf32>
    %564 = arith.mulf %562, %547 : vector<1x64xf32>
    %565 = arith.mulf %561, %560 : vector<1x64xf32>
    %566 = arith.addf %564, %565 : vector<1x64xf32>
    %567 = math.tanh %566 : vector<1x64xf32>
    %568 = arith.mulf %563, %567 : vector<1x64xf32>
    %569 = vector.extract_strided_slice %490 {offsets = [4, 0], sizes = [1, 256], strides = [1, 1]} : vector<16x256xf32> to vector<1x256xf32>
    %cst_109 = arith.constant dense<0.000000e+00> : vector<1x256xf32>
    %570 = tpu.matmul %568, %485, %cst_109 {dimension_numbers = #tpu.dot_dimension_numbers<[1], [0], [0], [1], [0, 0, 1, 1], [], []>} : vector<1x64xf32>, vector<64x256xf32>, vector<1x256xf32> -> vector<1x256xf32>
    %571 = arith.addf %569, %570 : vector<1x256xf32>
    %572 = vector.extract_strided_slice %571 {offsets = [0, 0], sizes = [1, 192], strides = [1, 1]} : vector<1x256xf32> to vector<1x192xf32>
    %573 = arith.negf %572 : vector<1x192xf32>
    %574 = math.exp %573 : vector<1x192xf32>
    %cst_110 = arith.constant 1.000000e+00 : f32
    %575 = vector.broadcast %cst_110 : f32 to vector<1x192xf32>
    %576 = arith.addf %575, %574 : vector<1x192xf32>
    %577 = arith.divf %575, %576 : vector<1x192xf32>
    %578 = vector.extract_strided_slice %571 {offsets = [0, 192], sizes = [1, 64], strides = [1, 1]} : vector<1x256xf32> to vector<1x64xf32>
    %579 = math.tanh %578 : vector<1x64xf32>
    %580 = vector.extract_strided_slice %577 {offsets = [0, 0], sizes = [1, 64], strides = [1, 1]} : vector<1x192xf32> to vector<1x64xf32>
    %581 = vector.extract_strided_slice %577 {offsets = [0, 64], sizes = [1, 64], strides = [1, 1]} : vector<1x192xf32> to vector<1x64xf32>
    %582 = vector.extract_strided_slice %577 {offsets = [0, 128], sizes = [1, 64], strides = [1, 1]} : vector<1x192xf32> to vector<1x64xf32>
    %583 = arith.mulf %581, %566 : vector<1x64xf32>
    %584 = arith.mulf %580, %579 : vector<1x64xf32>
    %585 = arith.addf %583, %584 : vector<1x64xf32>
    %586 = math.tanh %585 : vector<1x64xf32>
    %587 = arith.mulf %582, %586 : vector<1x64xf32>
    %588 = vector.extract_strided_slice %490 {offsets = [5, 0], sizes = [1, 256], strides = [1, 1]} : vector<16x256xf32> to vector<1x256xf32>
    %cst_111 = arith.constant dense<0.000000e+00> : vector<1x256xf32>
    %589 = tpu.matmul %587, %485, %cst_111 {dimension_numbers = #tpu.dot_dimension_numbers<[1], [0], [0], [1], [0, 0, 1, 1], [], []>} : vector<1x64xf32>, vector<64x256xf32>, vector<1x256xf32> -> vector<1x256xf32>
    %590 = arith.addf %588, %589 : vector<1x256xf32>
    %591 = vector.extract_strided_slice %590 {offsets = [0, 0], sizes = [1, 192], strides = [1, 1]} : vector<1x256xf32> to vector<1x192xf32>
    %592 = arith.negf %591 : vector<1x192xf32>
    %593 = math.exp %592 : vector<1x192xf32>
    %cst_112 = arith.constant 1.000000e+00 : f32
    %594 = vector.broadcast %cst_112 : f32 to vector<1x192xf32>
    %595 = arith.addf %594, %593 : vector<1x192xf32>
    %596 = arith.divf %594, %595 : vector<1x192xf32>
    %597 = vector.extract_strided_slice %590 {offsets = [0, 192], sizes = [1, 64], strides = [1, 1]} : vector<1x256xf32> to vector<1x64xf32>
    %598 = math.tanh %597 : vector<1x64xf32>
    %599 = vector.extract_strided_slice %596 {offsets = [0, 0], sizes = [1, 64], strides = [1, 1]} : vector<1x192xf32> to vector<1x64xf32>
    %600 = vector.extract_strided_slice %596 {offsets = [0, 64], sizes = [1, 64], strides = [1, 1]} : vector<1x192xf32> to vector<1x64xf32>
    %601 = vector.extract_strided_slice %596 {offsets = [0, 128], sizes = [1, 64], strides = [1, 1]} : vector<1x192xf32> to vector<1x64xf32>
    %602 = arith.mulf %600, %585 : vector<1x64xf32>
    %603 = arith.mulf %599, %598 : vector<1x64xf32>
    %604 = arith.addf %602, %603 : vector<1x64xf32>
    %605 = math.tanh %604 : vector<1x64xf32>
    %606 = arith.mulf %601, %605 : vector<1x64xf32>
    %607 = vector.extract_strided_slice %490 {offsets = [6, 0], sizes = [1, 256], strides = [1, 1]} : vector<16x256xf32> to vector<1x256xf32>
    %cst_113 = arith.constant dense<0.000000e+00> : vector<1x256xf32>
    %608 = tpu.matmul %606, %485, %cst_113 {dimension_numbers = #tpu.dot_dimension_numbers<[1], [0], [0], [1], [0, 0, 1, 1], [], []>} : vector<1x64xf32>, vector<64x256xf32>, vector<1x256xf32> -> vector<1x256xf32>
    %609 = arith.addf %607, %608 : vector<1x256xf32>
    %610 = vector.extract_strided_slice %609 {offsets = [0, 0], sizes = [1, 192], strides = [1, 1]} : vector<1x256xf32> to vector<1x192xf32>
    %611 = arith.negf %610 : vector<1x192xf32>
    %612 = math.exp %611 : vector<1x192xf32>
    %cst_114 = arith.constant 1.000000e+00 : f32
    %613 = vector.broadcast %cst_114 : f32 to vector<1x192xf32>
    %614 = arith.addf %613, %612 : vector<1x192xf32>
    %615 = arith.divf %613, %614 : vector<1x192xf32>
    %616 = vector.extract_strided_slice %609 {offsets = [0, 192], sizes = [1, 64], strides = [1, 1]} : vector<1x256xf32> to vector<1x64xf32>
    %617 = math.tanh %616 : vector<1x64xf32>
    %618 = vector.extract_strided_slice %615 {offsets = [0, 0], sizes = [1, 64], strides = [1, 1]} : vector<1x192xf32> to vector<1x64xf32>
    %619 = vector.extract_strided_slice %615 {offsets = [0, 64], sizes = [1, 64], strides = [1, 1]} : vector<1x192xf32> to vector<1x64xf32>
    %620 = vector.extract_strided_slice %615 {offsets = [0, 128], sizes = [1, 64], strides = [1, 1]} : vector<1x192xf32> to vector<1x64xf32>
    %621 = arith.mulf %619, %604 : vector<1x64xf32>
    %622 = arith.mulf %618, %617 : vector<1x64xf32>
    %623 = arith.addf %621, %622 : vector<1x64xf32>
    %624 = math.tanh %623 : vector<1x64xf32>
    %625 = arith.mulf %620, %624 : vector<1x64xf32>
    %626 = vector.extract_strided_slice %490 {offsets = [7, 0], sizes = [1, 256], strides = [1, 1]} : vector<16x256xf32> to vector<1x256xf32>
    %cst_115 = arith.constant dense<0.000000e+00> : vector<1x256xf32>
    %627 = tpu.matmul %625, %485, %cst_115 {dimension_numbers = #tpu.dot_dimension_numbers<[1], [0], [0], [1], [0, 0, 1, 1], [], []>} : vector<1x64xf32>, vector<64x256xf32>, vector<1x256xf32> -> vector<1x256xf32>
    %628 = arith.addf %626, %627 : vector<1x256xf32>
    %629 = vector.extract_strided_slice %628 {offsets = [0, 0], sizes = [1, 192], strides = [1, 1]} : vector<1x256xf32> to vector<1x192xf32>
    %630 = arith.negf %629 : vector<1x192xf32>
    %631 = math.exp %630 : vector<1x192xf32>
    %cst_116 = arith.constant 1.000000e+00 : f32
    %632 = vector.broadcast %cst_116 : f32 to vector<1x192xf32>
    %633 = arith.addf %632, %631 : vector<1x192xf32>
    %634 = arith.divf %632, %633 : vector<1x192xf32>
    %635 = vector.extract_strided_slice %628 {offsets = [0, 192], sizes = [1, 64], strides = [1, 1]} : vector<1x256xf32> to vector<1x64xf32>
    %636 = math.tanh %635 : vector<1x64xf32>
    %637 = vector.extract_strided_slice %634 {offsets = [0, 0], sizes = [1, 64], strides = [1, 1]} : vector<1x192xf32> to vector<1x64xf32>
    %638 = vector.extract_strided_slice %634 {offsets = [0, 64], sizes = [1, 64], strides = [1, 1]} : vector<1x192xf32> to vector<1x64xf32>
    %639 = vector.extract_strided_slice %634 {offsets = [0, 128], sizes = [1, 64], strides = [1, 1]} : vector<1x192xf32> to vector<1x64xf32>
    %640 = arith.mulf %638, %623 : vector<1x64xf32>
    %641 = arith.mulf %637, %636 : vector<1x64xf32>
    %642 = arith.addf %640, %641 : vector<1x64xf32>
    %643 = math.tanh %642 : vector<1x64xf32>
    %644 = arith.mulf %639, %643 : vector<1x64xf32>
    %645 = vector.extract_strided_slice %490 {offsets = [8, 0], sizes = [1, 256], strides = [1, 1]} : vector<16x256xf32> to vector<1x256xf32>
    %cst_117 = arith.constant dense<0.000000e+00> : vector<1x256xf32>
    %646 = tpu.matmul %644, %485, %cst_117 {dimension_numbers = #tpu.dot_dimension_numbers<[1], [0], [0], [1], [0, 0, 1, 1], [], []>} : vector<1x64xf32>, vector<64x256xf32>, vector<1x256xf32> -> vector<1x256xf32>
    %647 = arith.addf %645, %646 : vector<1x256xf32>
    %648 = vector.extract_strided_slice %647 {offsets = [0, 0], sizes = [1, 192], strides = [1, 1]} : vector<1x256xf32> to vector<1x192xf32>
    %649 = arith.negf %648 : vector<1x192xf32>
    %650 = math.exp %649 : vector<1x192xf32>
    %cst_118 = arith.constant 1.000000e+00 : f32
    %651 = vector.broadcast %cst_118 : f32 to vector<1x192xf32>
    %652 = arith.addf %651, %650 : vector<1x192xf32>
    %653 = arith.divf %651, %652 : vector<1x192xf32>
    %654 = vector.extract_strided_slice %647 {offsets = [0, 192], sizes = [1, 64], strides = [1, 1]} : vector<1x256xf32> to vector<1x64xf32>
    %655 = math.tanh %654 : vector<1x64xf32>
    %656 = vector.extract_strided_slice %653 {offsets = [0, 0], sizes = [1, 64], strides = [1, 1]} : vector<1x192xf32> to vector<1x64xf32>
    %657 = vector.extract_strided_slice %653 {offsets = [0, 64], sizes = [1, 64], strides = [1, 1]} : vector<1x192xf32> to vector<1x64xf32>
    %658 = vector.extract_strided_slice %653 {offsets = [0, 128], sizes = [1, 64], strides = [1, 1]} : vector<1x192xf32> to vector<1x64xf32>
    %659 = arith.mulf %657, %642 : vector<1x64xf32>
    %660 = arith.mulf %656, %655 : vector<1x64xf32>
    %661 = arith.addf %659, %660 : vector<1x64xf32>
    %662 = math.tanh %661 : vector<1x64xf32>
    %663 = arith.mulf %658, %662 : vector<1x64xf32>
    %664 = vector.extract_strided_slice %490 {offsets = [9, 0], sizes = [1, 256], strides = [1, 1]} : vector<16x256xf32> to vector<1x256xf32>
    %cst_119 = arith.constant dense<0.000000e+00> : vector<1x256xf32>
    %665 = tpu.matmul %663, %485, %cst_119 {dimension_numbers = #tpu.dot_dimension_numbers<[1], [0], [0], [1], [0, 0, 1, 1], [], []>} : vector<1x64xf32>, vector<64x256xf32>, vector<1x256xf32> -> vector<1x256xf32>
    %666 = arith.addf %664, %665 : vector<1x256xf32>
    %667 = vector.extract_strided_slice %666 {offsets = [0, 0], sizes = [1, 192], strides = [1, 1]} : vector<1x256xf32> to vector<1x192xf32>
    %668 = arith.negf %667 : vector<1x192xf32>
    %669 = math.exp %668 : vector<1x192xf32>
    %cst_120 = arith.constant 1.000000e+00 : f32
    %670 = vector.broadcast %cst_120 : f32 to vector<1x192xf32>
    %671 = arith.addf %670, %669 : vector<1x192xf32>
    %672 = arith.divf %670, %671 : vector<1x192xf32>
    %673 = vector.extract_strided_slice %666 {offsets = [0, 192], sizes = [1, 64], strides = [1, 1]} : vector<1x256xf32> to vector<1x64xf32>
    %674 = math.tanh %673 : vector<1x64xf32>
    %675 = vector.extract_strided_slice %672 {offsets = [0, 0], sizes = [1, 64], strides = [1, 1]} : vector<1x192xf32> to vector<1x64xf32>
    %676 = vector.extract_strided_slice %672 {offsets = [0, 64], sizes = [1, 64], strides = [1, 1]} : vector<1x192xf32> to vector<1x64xf32>
    %677 = vector.extract_strided_slice %672 {offsets = [0, 128], sizes = [1, 64], strides = [1, 1]} : vector<1x192xf32> to vector<1x64xf32>
    %678 = arith.mulf %676, %661 : vector<1x64xf32>
    %679 = arith.mulf %675, %674 : vector<1x64xf32>
    %680 = arith.addf %678, %679 : vector<1x64xf32>
    %681 = math.tanh %680 : vector<1x64xf32>
    %682 = arith.mulf %677, %681 : vector<1x64xf32>
    %683 = vector.extract_strided_slice %490 {offsets = [10, 0], sizes = [1, 256], strides = [1, 1]} : vector<16x256xf32> to vector<1x256xf32>
    %cst_121 = arith.constant dense<0.000000e+00> : vector<1x256xf32>
    %684 = tpu.matmul %682, %485, %cst_121 {dimension_numbers = #tpu.dot_dimension_numbers<[1], [0], [0], [1], [0, 0, 1, 1], [], []>} : vector<1x64xf32>, vector<64x256xf32>, vector<1x256xf32> -> vector<1x256xf32>
    %685 = arith.addf %683, %684 : vector<1x256xf32>
    %686 = vector.extract_strided_slice %685 {offsets = [0, 0], sizes = [1, 192], strides = [1, 1]} : vector<1x256xf32> to vector<1x192xf32>
    %687 = arith.negf %686 : vector<1x192xf32>
    %688 = math.exp %687 : vector<1x192xf32>
    %cst_122 = arith.constant 1.000000e+00 : f32
    %689 = vector.broadcast %cst_122 : f32 to vector<1x192xf32>
    %690 = arith.addf %689, %688 : vector<1x192xf32>
    %691 = arith.divf %689, %690 : vector<1x192xf32>
    %692 = vector.extract_strided_slice %685 {offsets = [0, 192], sizes = [1, 64], strides = [1, 1]} : vector<1x256xf32> to vector<1x64xf32>
    %693 = math.tanh %692 : vector<1x64xf32>
    %694 = vector.extract_strided_slice %691 {offsets = [0, 0], sizes = [1, 64], strides = [1, 1]} : vector<1x192xf32> to vector<1x64xf32>
    %695 = vector.extract_strided_slice %691 {offsets = [0, 64], sizes = [1, 64], strides = [1, 1]} : vector<1x192xf32> to vector<1x64xf32>
    %696 = vector.extract_strided_slice %691 {offsets = [0, 128], sizes = [1, 64], strides = [1, 1]} : vector<1x192xf32> to vector<1x64xf32>
    %697 = arith.mulf %695, %680 : vector<1x64xf32>
    %698 = arith.mulf %694, %693 : vector<1x64xf32>
    %699 = arith.addf %697, %698 : vector<1x64xf32>
    %700 = math.tanh %699 : vector<1x64xf32>
    %701 = arith.mulf %696, %700 : vector<1x64xf32>
    %702 = vector.extract_strided_slice %490 {offsets = [11, 0], sizes = [1, 256], strides = [1, 1]} : vector<16x256xf32> to vector<1x256xf32>
    %cst_123 = arith.constant dense<0.000000e+00> : vector<1x256xf32>
    %703 = tpu.matmul %701, %485, %cst_123 {dimension_numbers = #tpu.dot_dimension_numbers<[1], [0], [0], [1], [0, 0, 1, 1], [], []>} : vector<1x64xf32>, vector<64x256xf32>, vector<1x256xf32> -> vector<1x256xf32>
    %704 = arith.addf %702, %703 : vector<1x256xf32>
    %705 = vector.extract_strided_slice %704 {offsets = [0, 0], sizes = [1, 192], strides = [1, 1]} : vector<1x256xf32> to vector<1x192xf32>
    %706 = arith.negf %705 : vector<1x192xf32>
    %707 = math.exp %706 : vector<1x192xf32>
    %cst_124 = arith.constant 1.000000e+00 : f32
    %708 = vector.broadcast %cst_124 : f32 to vector<1x192xf32>
    %709 = arith.addf %708, %707 : vector<1x192xf32>
    %710 = arith.divf %708, %709 : vector<1x192xf32>
    %711 = vector.extract_strided_slice %704 {offsets = [0, 192], sizes = [1, 64], strides = [1, 1]} : vector<1x256xf32> to vector<1x64xf32>
    %712 = math.tanh %711 : vector<1x64xf32>
    %713 = vector.extract_strided_slice %710 {offsets = [0, 0], sizes = [1, 64], strides = [1, 1]} : vector<1x192xf32> to vector<1x64xf32>
    %714 = vector.extract_strided_slice %710 {offsets = [0, 64], sizes = [1, 64], strides = [1, 1]} : vector<1x192xf32> to vector<1x64xf32>
    %715 = vector.extract_strided_slice %710 {offsets = [0, 128], sizes = [1, 64], strides = [1, 1]} : vector<1x192xf32> to vector<1x64xf32>
    %716 = arith.mulf %714, %699 : vector<1x64xf32>
    %717 = arith.mulf %713, %712 : vector<1x64xf32>
    %718 = arith.addf %716, %717 : vector<1x64xf32>
    %719 = math.tanh %718 : vector<1x64xf32>
    %720 = arith.mulf %715, %719 : vector<1x64xf32>
    %721 = vector.extract_strided_slice %490 {offsets = [12, 0], sizes = [1, 256], strides = [1, 1]} : vector<16x256xf32> to vector<1x256xf32>
    %cst_125 = arith.constant dense<0.000000e+00> : vector<1x256xf32>
    %722 = tpu.matmul %720, %485, %cst_125 {dimension_numbers = #tpu.dot_dimension_numbers<[1], [0], [0], [1], [0, 0, 1, 1], [], []>} : vector<1x64xf32>, vector<64x256xf32>, vector<1x256xf32> -> vector<1x256xf32>
    %723 = arith.addf %721, %722 : vector<1x256xf32>
    %724 = vector.extract_strided_slice %723 {offsets = [0, 0], sizes = [1, 192], strides = [1, 1]} : vector<1x256xf32> to vector<1x192xf32>
    %725 = arith.negf %724 : vector<1x192xf32>
    %726 = math.exp %725 : vector<1x192xf32>
    %cst_126 = arith.constant 1.000000e+00 : f32
    %727 = vector.broadcast %cst_126 : f32 to vector<1x192xf32>
    %728 = arith.addf %727, %726 : vector<1x192xf32>
    %729 = arith.divf %727, %728 : vector<1x192xf32>
    %730 = vector.extract_strided_slice %723 {offsets = [0, 192], sizes = [1, 64], strides = [1, 1]} : vector<1x256xf32> to vector<1x64xf32>
    %731 = math.tanh %730 : vector<1x64xf32>
    %732 = vector.extract_strided_slice %729 {offsets = [0, 0], sizes = [1, 64], strides = [1, 1]} : vector<1x192xf32> to vector<1x64xf32>
    %733 = vector.extract_strided_slice %729 {offsets = [0, 64], sizes = [1, 64], strides = [1, 1]} : vector<1x192xf32> to vector<1x64xf32>
    %734 = vector.extract_strided_slice %729 {offsets = [0, 128], sizes = [1, 64], strides = [1, 1]} : vector<1x192xf32> to vector<1x64xf32>
    %735 = arith.mulf %733, %718 : vector<1x64xf32>
    %736 = arith.mulf %732, %731 : vector<1x64xf32>
    %737 = arith.addf %735, %736 : vector<1x64xf32>
    %738 = math.tanh %737 : vector<1x64xf32>
    %739 = arith.mulf %734, %738 : vector<1x64xf32>
    %740 = vector.extract_strided_slice %490 {offsets = [13, 0], sizes = [1, 256], strides = [1, 1]} : vector<16x256xf32> to vector<1x256xf32>
    %cst_127 = arith.constant dense<0.000000e+00> : vector<1x256xf32>
    %741 = tpu.matmul %739, %485, %cst_127 {dimension_numbers = #tpu.dot_dimension_numbers<[1], [0], [0], [1], [0, 0, 1, 1], [], []>} : vector<1x64xf32>, vector<64x256xf32>, vector<1x256xf32> -> vector<1x256xf32>
    %742 = arith.addf %740, %741 : vector<1x256xf32>
    %743 = vector.extract_strided_slice %742 {offsets = [0, 0], sizes = [1, 192], strides = [1, 1]} : vector<1x256xf32> to vector<1x192xf32>
    %744 = arith.negf %743 : vector<1x192xf32>
    %745 = math.exp %744 : vector<1x192xf32>
    %cst_128 = arith.constant 1.000000e+00 : f32
    %746 = vector.broadcast %cst_128 : f32 to vector<1x192xf32>
    %747 = arith.addf %746, %745 : vector<1x192xf32>
    %748 = arith.divf %746, %747 : vector<1x192xf32>
    %749 = vector.extract_strided_slice %742 {offsets = [0, 192], sizes = [1, 64], strides = [1, 1]} : vector<1x256xf32> to vector<1x64xf32>
    %750 = math.tanh %749 : vector<1x64xf32>
    %751 = vector.extract_strided_slice %748 {offsets = [0, 0], sizes = [1, 64], strides = [1, 1]} : vector<1x192xf32> to vector<1x64xf32>
    %752 = vector.extract_strided_slice %748 {offsets = [0, 64], sizes = [1, 64], strides = [1, 1]} : vector<1x192xf32> to vector<1x64xf32>
    %753 = vector.extract_strided_slice %748 {offsets = [0, 128], sizes = [1, 64], strides = [1, 1]} : vector<1x192xf32> to vector<1x64xf32>
    %754 = arith.mulf %752, %737 : vector<1x64xf32>
    %755 = arith.mulf %751, %750 : vector<1x64xf32>
    %756 = arith.addf %754, %755 : vector<1x64xf32>
    %757 = math.tanh %756 : vector<1x64xf32>
    %758 = arith.mulf %753, %757 : vector<1x64xf32>
    %759 = vector.extract_strided_slice %490 {offsets = [14, 0], sizes = [1, 256], strides = [1, 1]} : vector<16x256xf32> to vector<1x256xf32>
    %cst_129 = arith.constant dense<0.000000e+00> : vector<1x256xf32>
    %760 = tpu.matmul %758, %485, %cst_129 {dimension_numbers = #tpu.dot_dimension_numbers<[1], [0], [0], [1], [0, 0, 1, 1], [], []>} : vector<1x64xf32>, vector<64x256xf32>, vector<1x256xf32> -> vector<1x256xf32>
    %761 = arith.addf %759, %760 : vector<1x256xf32>
    %762 = vector.extract_strided_slice %761 {offsets = [0, 0], sizes = [1, 192], strides = [1, 1]} : vector<1x256xf32> to vector<1x192xf32>
    %763 = arith.negf %762 : vector<1x192xf32>
    %764 = math.exp %763 : vector<1x192xf32>
    %cst_130 = arith.constant 1.000000e+00 : f32
    %765 = vector.broadcast %cst_130 : f32 to vector<1x192xf32>
    %766 = arith.addf %765, %764 : vector<1x192xf32>
    %767 = arith.divf %765, %766 : vector<1x192xf32>
    %768 = vector.extract_strided_slice %761 {offsets = [0, 192], sizes = [1, 64], strides = [1, 1]} : vector<1x256xf32> to vector<1x64xf32>
    %769 = math.tanh %768 : vector<1x64xf32>
    %770 = vector.extract_strided_slice %767 {offsets = [0, 0], sizes = [1, 64], strides = [1, 1]} : vector<1x192xf32> to vector<1x64xf32>
    %771 = vector.extract_strided_slice %767 {offsets = [0, 64], sizes = [1, 64], strides = [1, 1]} : vector<1x192xf32> to vector<1x64xf32>
    %772 = vector.extract_strided_slice %767 {offsets = [0, 128], sizes = [1, 64], strides = [1, 1]} : vector<1x192xf32> to vector<1x64xf32>
    %773 = arith.mulf %771, %756 : vector<1x64xf32>
    %774 = arith.mulf %770, %769 : vector<1x64xf32>
    %775 = arith.addf %773, %774 : vector<1x64xf32>
    %776 = math.tanh %775 : vector<1x64xf32>
    %777 = arith.mulf %772, %776 : vector<1x64xf32>
    %778 = vector.extract_strided_slice %490 {offsets = [15, 0], sizes = [1, 256], strides = [1, 1]} : vector<16x256xf32> to vector<1x256xf32>
    %cst_131 = arith.constant dense<0.000000e+00> : vector<1x256xf32>
    %779 = tpu.matmul %777, %485, %cst_131 {dimension_numbers = #tpu.dot_dimension_numbers<[1], [0], [0], [1], [0, 0, 1, 1], [], []>} : vector<1x64xf32>, vector<64x256xf32>, vector<1x256xf32> -> vector<1x256xf32>
    %780 = arith.addf %778, %779 : vector<1x256xf32>
    %781 = vector.extract_strided_slice %780 {offsets = [0, 0], sizes = [1, 192], strides = [1, 1]} : vector<1x256xf32> to vector<1x192xf32>
    %782 = arith.negf %781 : vector<1x192xf32>
    %783 = math.exp %782 : vector<1x192xf32>
    %cst_132 = arith.constant 1.000000e+00 : f32
    %784 = vector.broadcast %cst_132 : f32 to vector<1x192xf32>
    %785 = arith.addf %784, %783 : vector<1x192xf32>
    %786 = arith.divf %784, %785 : vector<1x192xf32>
    %787 = vector.extract_strided_slice %780 {offsets = [0, 192], sizes = [1, 64], strides = [1, 1]} : vector<1x256xf32> to vector<1x64xf32>
    %788 = math.tanh %787 : vector<1x64xf32>
    %789 = vector.extract_strided_slice %786 {offsets = [0, 0], sizes = [1, 64], strides = [1, 1]} : vector<1x192xf32> to vector<1x64xf32>
    %790 = vector.extract_strided_slice %786 {offsets = [0, 64], sizes = [1, 64], strides = [1, 1]} : vector<1x192xf32> to vector<1x64xf32>
    %791 = vector.extract_strided_slice %786 {offsets = [0, 128], sizes = [1, 64], strides = [1, 1]} : vector<1x192xf32> to vector<1x64xf32>
    %792 = arith.mulf %790, %775 : vector<1x64xf32>
    %793 = arith.mulf %789, %788 : vector<1x64xf32>
    %794 = arith.addf %792, %793 : vector<1x64xf32>
    %795 = math.tanh %794 : vector<1x64xf32>
    %796 = arith.mulf %791, %795 : vector<1x64xf32>
    %797 = tpu.concatenate %511, %530, %549, %568, %587, %606, %625, %644, %663, %682, %701, %720, %739, %758, %777, %796 in 0 : vector<1x64xf32>, vector<1x64xf32>, vector<1x64xf32>, vector<1x64xf32>, vector<1x64xf32>, vector<1x64xf32>, vector<1x64xf32>, vector<1x64xf32>, vector<1x64xf32>, vector<1x64xf32>, vector<1x64xf32>, vector<1x64xf32>, vector<1x64xf32>, vector<1x64xf32>, vector<1x64xf32>, vector<1x64xf32> -> vector<16x64xf32>
    %c0_133 = arith.constant 0 : index
    %c0_134 = arith.constant 0 : index
    %798 = vector.load %arg19[%c0_133, %c0_134] : memref<64x256xf32, #tpu.memory_space<vmem>>, vector<64x256xf32>
    %c0_135 = arith.constant 0 : index
    %c0_136 = arith.constant 0 : index
    %799 = vector.load %arg18[%c0_135, %c0_136] : memref<64x256xf32, #tpu.memory_space<vmem>>, vector<64x256xf32>
    %cst_137 = arith.constant dense<0.000000e+00> : vector<16x256xf32>
    %800 = tpu.matmul %797, %799, %cst_137 {dimension_numbers = #tpu.dot_dimension_numbers<[1], [0], [0], [1], [0, 0, 1, 1], [], []>} : vector<16x64xf32>, vector<64x256xf32>, vector<16x256xf32> -> vector<16x256xf32>
    %c0_138 = arith.constant 0 : index
    %c0_139 = arith.constant 0 : index
    %801 = vector.load %arg20[%c0_138, %c0_139] : memref<1x256xf32, #tpu.memory_space<vmem>>, vector<1x256xf32>
    %802 = vector.broadcast %801 : vector<1x256xf32> to vector<16x256xf32>
    %803 = arith.addf %800, %802 : vector<16x256xf32>
    %cst_140 = arith.constant 0.000000e+00 : f32
    %804 = vector.broadcast %cst_140 : f32 to vector<1x64xf32>
    %cst_141 = arith.constant 0.000000e+00 : f32
    %805 = vector.broadcast %cst_141 : f32 to vector<1x64xf32>
    %806 = vector.extract_strided_slice %803 {offsets = [0, 0], sizes = [1, 256], strides = [1, 1]} : vector<16x256xf32> to vector<1x256xf32>
    %cst_142 = arith.constant dense<0.000000e+00> : vector<1x256xf32>
    %807 = tpu.matmul %804, %798, %cst_142 {dimension_numbers = #tpu.dot_dimension_numbers<[1], [0], [0], [1], [0, 0, 1, 1], [], []>} : vector<1x64xf32>, vector<64x256xf32>, vector<1x256xf32> -> vector<1x256xf32>
    %808 = arith.addf %806, %807 : vector<1x256xf32>
    %809 = vector.extract_strided_slice %808 {offsets = [0, 0], sizes = [1, 192], strides = [1, 1]} : vector<1x256xf32> to vector<1x192xf32>
    %810 = arith.negf %809 : vector<1x192xf32>
    %811 = math.exp %810 : vector<1x192xf32>
    %cst_143 = arith.constant 1.000000e+00 : f32
    %812 = vector.broadcast %cst_143 : f32 to vector<1x192xf32>
    %813 = arith.addf %812, %811 : vector<1x192xf32>
    %814 = arith.divf %812, %813 : vector<1x192xf32>
    %815 = vector.extract_strided_slice %808 {offsets = [0, 192], sizes = [1, 64], strides = [1, 1]} : vector<1x256xf32> to vector<1x64xf32>
    %816 = math.tanh %815 : vector<1x64xf32>
    %817 = vector.extract_strided_slice %814 {offsets = [0, 0], sizes = [1, 64], strides = [1, 1]} : vector<1x192xf32> to vector<1x64xf32>
    %818 = vector.extract_strided_slice %814 {offsets = [0, 64], sizes = [1, 64], strides = [1, 1]} : vector<1x192xf32> to vector<1x64xf32>
    %819 = vector.extract_strided_slice %814 {offsets = [0, 128], sizes = [1, 64], strides = [1, 1]} : vector<1x192xf32> to vector<1x64xf32>
    %820 = arith.mulf %818, %805 : vector<1x64xf32>
    %821 = arith.mulf %817, %816 : vector<1x64xf32>
    %822 = arith.addf %820, %821 : vector<1x64xf32>
    %823 = math.tanh %822 : vector<1x64xf32>
    %824 = arith.mulf %819, %823 : vector<1x64xf32>
    %825 = vector.extract_strided_slice %803 {offsets = [1, 0], sizes = [1, 256], strides = [1, 1]} : vector<16x256xf32> to vector<1x256xf32>
    %cst_144 = arith.constant dense<0.000000e+00> : vector<1x256xf32>
    %826 = tpu.matmul %824, %798, %cst_144 {dimension_numbers = #tpu.dot_dimension_numbers<[1], [0], [0], [1], [0, 0, 1, 1], [], []>} : vector<1x64xf32>, vector<64x256xf32>, vector<1x256xf32> -> vector<1x256xf32>
    %827 = arith.addf %825, %826 : vector<1x256xf32>
    %828 = vector.extract_strided_slice %827 {offsets = [0, 0], sizes = [1, 192], strides = [1, 1]} : vector<1x256xf32> to vector<1x192xf32>
    %829 = arith.negf %828 : vector<1x192xf32>
    %830 = math.exp %829 : vector<1x192xf32>
    %cst_145 = arith.constant 1.000000e+00 : f32
    %831 = vector.broadcast %cst_145 : f32 to vector<1x192xf32>
    %832 = arith.addf %831, %830 : vector<1x192xf32>
    %833 = arith.divf %831, %832 : vector<1x192xf32>
    %834 = vector.extract_strided_slice %827 {offsets = [0, 192], sizes = [1, 64], strides = [1, 1]} : vector<1x256xf32> to vector<1x64xf32>
    %835 = math.tanh %834 : vector<1x64xf32>
    %836 = vector.extract_strided_slice %833 {offsets = [0, 0], sizes = [1, 64], strides = [1, 1]} : vector<1x192xf32> to vector<1x64xf32>
    %837 = vector.extract_strided_slice %833 {offsets = [0, 64], sizes = [1, 64], strides = [1, 1]} : vector<1x192xf32> to vector<1x64xf32>
    %838 = vector.extract_strided_slice %833 {offsets = [0, 128], sizes = [1, 64], strides = [1, 1]} : vector<1x192xf32> to vector<1x64xf32>
    %839 = arith.mulf %837, %822 : vector<1x64xf32>
    %840 = arith.mulf %836, %835 : vector<1x64xf32>
    %841 = arith.addf %839, %840 : vector<1x64xf32>
    %842 = math.tanh %841 : vector<1x64xf32>
    %843 = arith.mulf %838, %842 : vector<1x64xf32>
    %844 = vector.extract_strided_slice %803 {offsets = [2, 0], sizes = [1, 256], strides = [1, 1]} : vector<16x256xf32> to vector<1x256xf32>
    %cst_146 = arith.constant dense<0.000000e+00> : vector<1x256xf32>
    %845 = tpu.matmul %843, %798, %cst_146 {dimension_numbers = #tpu.dot_dimension_numbers<[1], [0], [0], [1], [0, 0, 1, 1], [], []>} : vector<1x64xf32>, vector<64x256xf32>, vector<1x256xf32> -> vector<1x256xf32>
    %846 = arith.addf %844, %845 : vector<1x256xf32>
    %847 = vector.extract_strided_slice %846 {offsets = [0, 0], sizes = [1, 192], strides = [1, 1]} : vector<1x256xf32> to vector<1x192xf32>
    %848 = arith.negf %847 : vector<1x192xf32>
    %849 = math.exp %848 : vector<1x192xf32>
    %cst_147 = arith.constant 1.000000e+00 : f32
    %850 = vector.broadcast %cst_147 : f32 to vector<1x192xf32>
    %851 = arith.addf %850, %849 : vector<1x192xf32>
    %852 = arith.divf %850, %851 : vector<1x192xf32>
    %853 = vector.extract_strided_slice %846 {offsets = [0, 192], sizes = [1, 64], strides = [1, 1]} : vector<1x256xf32> to vector<1x64xf32>
    %854 = math.tanh %853 : vector<1x64xf32>
    %855 = vector.extract_strided_slice %852 {offsets = [0, 0], sizes = [1, 64], strides = [1, 1]} : vector<1x192xf32> to vector<1x64xf32>
    %856 = vector.extract_strided_slice %852 {offsets = [0, 64], sizes = [1, 64], strides = [1, 1]} : vector<1x192xf32> to vector<1x64xf32>
    %857 = vector.extract_strided_slice %852 {offsets = [0, 128], sizes = [1, 64], strides = [1, 1]} : vector<1x192xf32> to vector<1x64xf32>
    %858 = arith.mulf %856, %841 : vector<1x64xf32>
    %859 = arith.mulf %855, %854 : vector<1x64xf32>
    %860 = arith.addf %858, %859 : vector<1x64xf32>
    %861 = math.tanh %860 : vector<1x64xf32>
    %862 = arith.mulf %857, %861 : vector<1x64xf32>
    %863 = vector.extract_strided_slice %803 {offsets = [3, 0], sizes = [1, 256], strides = [1, 1]} : vector<16x256xf32> to vector<1x256xf32>
    %cst_148 = arith.constant dense<0.000000e+00> : vector<1x256xf32>
    %864 = tpu.matmul %862, %798, %cst_148 {dimension_numbers = #tpu.dot_dimension_numbers<[1], [0], [0], [1], [0, 0, 1, 1], [], []>} : vector<1x64xf32>, vector<64x256xf32>, vector<1x256xf32> -> vector<1x256xf32>
    %865 = arith.addf %863, %864 : vector<1x256xf32>
    %866 = vector.extract_strided_slice %865 {offsets = [0, 0], sizes = [1, 192], strides = [1, 1]} : vector<1x256xf32> to vector<1x192xf32>
    %867 = arith.negf %866 : vector<1x192xf32>
    %868 = math.exp %867 : vector<1x192xf32>
    %cst_149 = arith.constant 1.000000e+00 : f32
    %869 = vector.broadcast %cst_149 : f32 to vector<1x192xf32>
    %870 = arith.addf %869, %868 : vector<1x192xf32>
    %871 = arith.divf %869, %870 : vector<1x192xf32>
    %872 = vector.extract_strided_slice %865 {offsets = [0, 192], sizes = [1, 64], strides = [1, 1]} : vector<1x256xf32> to vector<1x64xf32>
    %873 = math.tanh %872 : vector<1x64xf32>
    %874 = vector.extract_strided_slice %871 {offsets = [0, 0], sizes = [1, 64], strides = [1, 1]} : vector<1x192xf32> to vector<1x64xf32>
    %875 = vector.extract_strided_slice %871 {offsets = [0, 64], sizes = [1, 64], strides = [1, 1]} : vector<1x192xf32> to vector<1x64xf32>
    %876 = vector.extract_strided_slice %871 {offsets = [0, 128], sizes = [1, 64], strides = [1, 1]} : vector<1x192xf32> to vector<1x64xf32>
    %877 = arith.mulf %875, %860 : vector<1x64xf32>
    %878 = arith.mulf %874, %873 : vector<1x64xf32>
    %879 = arith.addf %877, %878 : vector<1x64xf32>
    %880 = math.tanh %879 : vector<1x64xf32>
    %881 = arith.mulf %876, %880 : vector<1x64xf32>
    %882 = vector.extract_strided_slice %803 {offsets = [4, 0], sizes = [1, 256], strides = [1, 1]} : vector<16x256xf32> to vector<1x256xf32>
    %cst_150 = arith.constant dense<0.000000e+00> : vector<1x256xf32>
    %883 = tpu.matmul %881, %798, %cst_150 {dimension_numbers = #tpu.dot_dimension_numbers<[1], [0], [0], [1], [0, 0, 1, 1], [], []>} : vector<1x64xf32>, vector<64x256xf32>, vector<1x256xf32> -> vector<1x256xf32>
    %884 = arith.addf %882, %883 : vector<1x256xf32>
    %885 = vector.extract_strided_slice %884 {offsets = [0, 0], sizes = [1, 192], strides = [1, 1]} : vector<1x256xf32> to vector<1x192xf32>
    %886 = arith.negf %885 : vector<1x192xf32>
    %887 = math.exp %886 : vector<1x192xf32>
    %cst_151 = arith.constant 1.000000e+00 : f32
    %888 = vector.broadcast %cst_151 : f32 to vector<1x192xf32>
    %889 = arith.addf %888, %887 : vector<1x192xf32>
    %890 = arith.divf %888, %889 : vector<1x192xf32>
    %891 = vector.extract_strided_slice %884 {offsets = [0, 192], sizes = [1, 64], strides = [1, 1]} : vector<1x256xf32> to vector<1x64xf32>
    %892 = math.tanh %891 : vector<1x64xf32>
    %893 = vector.extract_strided_slice %890 {offsets = [0, 0], sizes = [1, 64], strides = [1, 1]} : vector<1x192xf32> to vector<1x64xf32>
    %894 = vector.extract_strided_slice %890 {offsets = [0, 64], sizes = [1, 64], strides = [1, 1]} : vector<1x192xf32> to vector<1x64xf32>
    %895 = vector.extract_strided_slice %890 {offsets = [0, 128], sizes = [1, 64], strides = [1, 1]} : vector<1x192xf32> to vector<1x64xf32>
    %896 = arith.mulf %894, %879 : vector<1x64xf32>
    %897 = arith.mulf %893, %892 : vector<1x64xf32>
    %898 = arith.addf %896, %897 : vector<1x64xf32>
    %899 = math.tanh %898 : vector<1x64xf32>
    %900 = arith.mulf %895, %899 : vector<1x64xf32>
    %901 = vector.extract_strided_slice %803 {offsets = [5, 0], sizes = [1, 256], strides = [1, 1]} : vector<16x256xf32> to vector<1x256xf32>
    %cst_152 = arith.constant dense<0.000000e+00> : vector<1x256xf32>
    %902 = tpu.matmul %900, %798, %cst_152 {dimension_numbers = #tpu.dot_dimension_numbers<[1], [0], [0], [1], [0, 0, 1, 1], [], []>} : vector<1x64xf32>, vector<64x256xf32>, vector<1x256xf32> -> vector<1x256xf32>
    %903 = arith.addf %901, %902 : vector<1x256xf32>
    %904 = vector.extract_strided_slice %903 {offsets = [0, 0], sizes = [1, 192], strides = [1, 1]} : vector<1x256xf32> to vector<1x192xf32>
    %905 = arith.negf %904 : vector<1x192xf32>
    %906 = math.exp %905 : vector<1x192xf32>
    %cst_153 = arith.constant 1.000000e+00 : f32
    %907 = vector.broadcast %cst_153 : f32 to vector<1x192xf32>
    %908 = arith.addf %907, %906 : vector<1x192xf32>
    %909 = arith.divf %907, %908 : vector<1x192xf32>
    %910 = vector.extract_strided_slice %903 {offsets = [0, 192], sizes = [1, 64], strides = [1, 1]} : vector<1x256xf32> to vector<1x64xf32>
    %911 = math.tanh %910 : vector<1x64xf32>
    %912 = vector.extract_strided_slice %909 {offsets = [0, 0], sizes = [1, 64], strides = [1, 1]} : vector<1x192xf32> to vector<1x64xf32>
    %913 = vector.extract_strided_slice %909 {offsets = [0, 64], sizes = [1, 64], strides = [1, 1]} : vector<1x192xf32> to vector<1x64xf32>
    %914 = vector.extract_strided_slice %909 {offsets = [0, 128], sizes = [1, 64], strides = [1, 1]} : vector<1x192xf32> to vector<1x64xf32>
    %915 = arith.mulf %913, %898 : vector<1x64xf32>
    %916 = arith.mulf %912, %911 : vector<1x64xf32>
    %917 = arith.addf %915, %916 : vector<1x64xf32>
    %918 = math.tanh %917 : vector<1x64xf32>
    %919 = arith.mulf %914, %918 : vector<1x64xf32>
    %920 = vector.extract_strided_slice %803 {offsets = [6, 0], sizes = [1, 256], strides = [1, 1]} : vector<16x256xf32> to vector<1x256xf32>
    %cst_154 = arith.constant dense<0.000000e+00> : vector<1x256xf32>
    %921 = tpu.matmul %919, %798, %cst_154 {dimension_numbers = #tpu.dot_dimension_numbers<[1], [0], [0], [1], [0, 0, 1, 1], [], []>} : vector<1x64xf32>, vector<64x256xf32>, vector<1x256xf32> -> vector<1x256xf32>
    %922 = arith.addf %920, %921 : vector<1x256xf32>
    %923 = vector.extract_strided_slice %922 {offsets = [0, 0], sizes = [1, 192], strides = [1, 1]} : vector<1x256xf32> to vector<1x192xf32>
    %924 = arith.negf %923 : vector<1x192xf32>
    %925 = math.exp %924 : vector<1x192xf32>
    %cst_155 = arith.constant 1.000000e+00 : f32
    %926 = vector.broadcast %cst_155 : f32 to vector<1x192xf32>
    %927 = arith.addf %926, %925 : vector<1x192xf32>
    %928 = arith.divf %926, %927 : vector<1x192xf32>
    %929 = vector.extract_strided_slice %922 {offsets = [0, 192], sizes = [1, 64], strides = [1, 1]} : vector<1x256xf32> to vector<1x64xf32>
    %930 = math.tanh %929 : vector<1x64xf32>
    %931 = vector.extract_strided_slice %928 {offsets = [0, 0], sizes = [1, 64], strides = [1, 1]} : vector<1x192xf32> to vector<1x64xf32>
    %932 = vector.extract_strided_slice %928 {offsets = [0, 64], sizes = [1, 64], strides = [1, 1]} : vector<1x192xf32> to vector<1x64xf32>
    %933 = vector.extract_strided_slice %928 {offsets = [0, 128], sizes = [1, 64], strides = [1, 1]} : vector<1x192xf32> to vector<1x64xf32>
    %934 = arith.mulf %932, %917 : vector<1x64xf32>
    %935 = arith.mulf %931, %930 : vector<1x64xf32>
    %936 = arith.addf %934, %935 : vector<1x64xf32>
    %937 = math.tanh %936 : vector<1x64xf32>
    %938 = arith.mulf %933, %937 : vector<1x64xf32>
    %939 = vector.extract_strided_slice %803 {offsets = [7, 0], sizes = [1, 256], strides = [1, 1]} : vector<16x256xf32> to vector<1x256xf32>
    %cst_156 = arith.constant dense<0.000000e+00> : vector<1x256xf32>
    %940 = tpu.matmul %938, %798, %cst_156 {dimension_numbers = #tpu.dot_dimension_numbers<[1], [0], [0], [1], [0, 0, 1, 1], [], []>} : vector<1x64xf32>, vector<64x256xf32>, vector<1x256xf32> -> vector<1x256xf32>
    %941 = arith.addf %939, %940 : vector<1x256xf32>
    %942 = vector.extract_strided_slice %941 {offsets = [0, 0], sizes = [1, 192], strides = [1, 1]} : vector<1x256xf32> to vector<1x192xf32>
    %943 = arith.negf %942 : vector<1x192xf32>
    %944 = math.exp %943 : vector<1x192xf32>
    %cst_157 = arith.constant 1.000000e+00 : f32
    %945 = vector.broadcast %cst_157 : f32 to vector<1x192xf32>
    %946 = arith.addf %945, %944 : vector<1x192xf32>
    %947 = arith.divf %945, %946 : vector<1x192xf32>
    %948 = vector.extract_strided_slice %941 {offsets = [0, 192], sizes = [1, 64], strides = [1, 1]} : vector<1x256xf32> to vector<1x64xf32>
    %949 = math.tanh %948 : vector<1x64xf32>
    %950 = vector.extract_strided_slice %947 {offsets = [0, 0], sizes = [1, 64], strides = [1, 1]} : vector<1x192xf32> to vector<1x64xf32>
    %951 = vector.extract_strided_slice %947 {offsets = [0, 64], sizes = [1, 64], strides = [1, 1]} : vector<1x192xf32> to vector<1x64xf32>
    %952 = vector.extract_strided_slice %947 {offsets = [0, 128], sizes = [1, 64], strides = [1, 1]} : vector<1x192xf32> to vector<1x64xf32>
    %953 = arith.mulf %951, %936 : vector<1x64xf32>
    %954 = arith.mulf %950, %949 : vector<1x64xf32>
    %955 = arith.addf %953, %954 : vector<1x64xf32>
    %956 = math.tanh %955 : vector<1x64xf32>
    %957 = arith.mulf %952, %956 : vector<1x64xf32>
    %958 = vector.extract_strided_slice %803 {offsets = [8, 0], sizes = [1, 256], strides = [1, 1]} : vector<16x256xf32> to vector<1x256xf32>
    %cst_158 = arith.constant dense<0.000000e+00> : vector<1x256xf32>
    %959 = tpu.matmul %957, %798, %cst_158 {dimension_numbers = #tpu.dot_dimension_numbers<[1], [0], [0], [1], [0, 0, 1, 1], [], []>} : vector<1x64xf32>, vector<64x256xf32>, vector<1x256xf32> -> vector<1x256xf32>
    %960 = arith.addf %958, %959 : vector<1x256xf32>
    %961 = vector.extract_strided_slice %960 {offsets = [0, 0], sizes = [1, 192], strides = [1, 1]} : vector<1x256xf32> to vector<1x192xf32>
    %962 = arith.negf %961 : vector<1x192xf32>
    %963 = math.exp %962 : vector<1x192xf32>
    %cst_159 = arith.constant 1.000000e+00 : f32
    %964 = vector.broadcast %cst_159 : f32 to vector<1x192xf32>
    %965 = arith.addf %964, %963 : vector<1x192xf32>
    %966 = arith.divf %964, %965 : vector<1x192xf32>
    %967 = vector.extract_strided_slice %960 {offsets = [0, 192], sizes = [1, 64], strides = [1, 1]} : vector<1x256xf32> to vector<1x64xf32>
    %968 = math.tanh %967 : vector<1x64xf32>
    %969 = vector.extract_strided_slice %966 {offsets = [0, 0], sizes = [1, 64], strides = [1, 1]} : vector<1x192xf32> to vector<1x64xf32>
    %970 = vector.extract_strided_slice %966 {offsets = [0, 64], sizes = [1, 64], strides = [1, 1]} : vector<1x192xf32> to vector<1x64xf32>
    %971 = vector.extract_strided_slice %966 {offsets = [0, 128], sizes = [1, 64], strides = [1, 1]} : vector<1x192xf32> to vector<1x64xf32>
    %972 = arith.mulf %970, %955 : vector<1x64xf32>
    %973 = arith.mulf %969, %968 : vector<1x64xf32>
    %974 = arith.addf %972, %973 : vector<1x64xf32>
    %975 = math.tanh %974 : vector<1x64xf32>
    %976 = arith.mulf %971, %975 : vector<1x64xf32>
    %977 = vector.extract_strided_slice %803 {offsets = [9, 0], sizes = [1, 256], strides = [1, 1]} : vector<16x256xf32> to vector<1x256xf32>
    %cst_160 = arith.constant dense<0.000000e+00> : vector<1x256xf32>
    %978 = tpu.matmul %976, %798, %cst_160 {dimension_numbers = #tpu.dot_dimension_numbers<[1], [0], [0], [1], [0, 0, 1, 1], [], []>} : vector<1x64xf32>, vector<64x256xf32>, vector<1x256xf32> -> vector<1x256xf32>
    %979 = arith.addf %977, %978 : vector<1x256xf32>
    %980 = vector.extract_strided_slice %979 {offsets = [0, 0], sizes = [1, 192], strides = [1, 1]} : vector<1x256xf32> to vector<1x192xf32>
    %981 = arith.negf %980 : vector<1x192xf32>
    %982 = math.exp %981 : vector<1x192xf32>
    %cst_161 = arith.constant 1.000000e+00 : f32
    %983 = vector.broadcast %cst_161 : f32 to vector<1x192xf32>
    %984 = arith.addf %983, %982 : vector<1x192xf32>
    %985 = arith.divf %983, %984 : vector<1x192xf32>
    %986 = vector.extract_strided_slice %979 {offsets = [0, 192], sizes = [1, 64], strides = [1, 1]} : vector<1x256xf32> to vector<1x64xf32>
    %987 = math.tanh %986 : vector<1x64xf32>
    %988 = vector.extract_strided_slice %985 {offsets = [0, 0], sizes = [1, 64], strides = [1, 1]} : vector<1x192xf32> to vector<1x64xf32>
    %989 = vector.extract_strided_slice %985 {offsets = [0, 64], sizes = [1, 64], strides = [1, 1]} : vector<1x192xf32> to vector<1x64xf32>
    %990 = vector.extract_strided_slice %985 {offsets = [0, 128], sizes = [1, 64], strides = [1, 1]} : vector<1x192xf32> to vector<1x64xf32>
    %991 = arith.mulf %989, %974 : vector<1x64xf32>
    %992 = arith.mulf %988, %987 : vector<1x64xf32>
    %993 = arith.addf %991, %992 : vector<1x64xf32>
    %994 = math.tanh %993 : vector<1x64xf32>
    %995 = arith.mulf %990, %994 : vector<1x64xf32>
    %996 = vector.extract_strided_slice %803 {offsets = [10, 0], sizes = [1, 256], strides = [1, 1]} : vector<16x256xf32> to vector<1x256xf32>
    %cst_162 = arith.constant dense<0.000000e+00> : vector<1x256xf32>
    %997 = tpu.matmul %995, %798, %cst_162 {dimension_numbers = #tpu.dot_dimension_numbers<[1], [0], [0], [1], [0, 0, 1, 1], [], []>} : vector<1x64xf32>, vector<64x256xf32>, vector<1x256xf32> -> vector<1x256xf32>
    %998 = arith.addf %996, %997 : vector<1x256xf32>
    %999 = vector.extract_strided_slice %998 {offsets = [0, 0], sizes = [1, 192], strides = [1, 1]} : vector<1x256xf32> to vector<1x192xf32>
    %1000 = arith.negf %999 : vector<1x192xf32>
    %1001 = math.exp %1000 : vector<1x192xf32>
    %cst_163 = arith.constant 1.000000e+00 : f32
    %1002 = vector.broadcast %cst_163 : f32 to vector<1x192xf32>
    %1003 = arith.addf %1002, %1001 : vector<1x192xf32>
    %1004 = arith.divf %1002, %1003 : vector<1x192xf32>
    %1005 = vector.extract_strided_slice %998 {offsets = [0, 192], sizes = [1, 64], strides = [1, 1]} : vector<1x256xf32> to vector<1x64xf32>
    %1006 = math.tanh %1005 : vector<1x64xf32>
    %1007 = vector.extract_strided_slice %1004 {offsets = [0, 0], sizes = [1, 64], strides = [1, 1]} : vector<1x192xf32> to vector<1x64xf32>
    %1008 = vector.extract_strided_slice %1004 {offsets = [0, 64], sizes = [1, 64], strides = [1, 1]} : vector<1x192xf32> to vector<1x64xf32>
    %1009 = vector.extract_strided_slice %1004 {offsets = [0, 128], sizes = [1, 64], strides = [1, 1]} : vector<1x192xf32> to vector<1x64xf32>
    %1010 = arith.mulf %1008, %993 : vector<1x64xf32>
    %1011 = arith.mulf %1007, %1006 : vector<1x64xf32>
    %1012 = arith.addf %1010, %1011 : vector<1x64xf32>
    %1013 = math.tanh %1012 : vector<1x64xf32>
    %1014 = arith.mulf %1009, %1013 : vector<1x64xf32>
    %1015 = vector.extract_strided_slice %803 {offsets = [11, 0], sizes = [1, 256], strides = [1, 1]} : vector<16x256xf32> to vector<1x256xf32>
    %cst_164 = arith.constant dense<0.000000e+00> : vector<1x256xf32>
    %1016 = tpu.matmul %1014, %798, %cst_164 {dimension_numbers = #tpu.dot_dimension_numbers<[1], [0], [0], [1], [0, 0, 1, 1], [], []>} : vector<1x64xf32>, vector<64x256xf32>, vector<1x256xf32> -> vector<1x256xf32>
    %1017 = arith.addf %1015, %1016 : vector<1x256xf32>
    %1018 = vector.extract_strided_slice %1017 {offsets = [0, 0], sizes = [1, 192], strides = [1, 1]} : vector<1x256xf32> to vector<1x192xf32>
    %1019 = arith.negf %1018 : vector<1x192xf32>
    %1020 = math.exp %1019 : vector<1x192xf32>
    %cst_165 = arith.constant 1.000000e+00 : f32
    %1021 = vector.broadcast %cst_165 : f32 to vector<1x192xf32>
    %1022 = arith.addf %1021, %1020 : vector<1x192xf32>
    %1023 = arith.divf %1021, %1022 : vector<1x192xf32>
    %1024 = vector.extract_strided_slice %1017 {offsets = [0, 192], sizes = [1, 64], strides = [1, 1]} : vector<1x256xf32> to vector<1x64xf32>
    %1025 = math.tanh %1024 : vector<1x64xf32>
    %1026 = vector.extract_strided_slice %1023 {offsets = [0, 0], sizes = [1, 64], strides = [1, 1]} : vector<1x192xf32> to vector<1x64xf32>
    %1027 = vector.extract_strided_slice %1023 {offsets = [0, 64], sizes = [1, 64], strides = [1, 1]} : vector<1x192xf32> to vector<1x64xf32>
    %1028 = vector.extract_strided_slice %1023 {offsets = [0, 128], sizes = [1, 64], strides = [1, 1]} : vector<1x192xf32> to vector<1x64xf32>
    %1029 = arith.mulf %1027, %1012 : vector<1x64xf32>
    %1030 = arith.mulf %1026, %1025 : vector<1x64xf32>
    %1031 = arith.addf %1029, %1030 : vector<1x64xf32>
    %1032 = math.tanh %1031 : vector<1x64xf32>
    %1033 = arith.mulf %1028, %1032 : vector<1x64xf32>
    %1034 = vector.extract_strided_slice %803 {offsets = [12, 0], sizes = [1, 256], strides = [1, 1]} : vector<16x256xf32> to vector<1x256xf32>
    %cst_166 = arith.constant dense<0.000000e+00> : vector<1x256xf32>
    %1035 = tpu.matmul %1033, %798, %cst_166 {dimension_numbers = #tpu.dot_dimension_numbers<[1], [0], [0], [1], [0, 0, 1, 1], [], []>} : vector<1x64xf32>, vector<64x256xf32>, vector<1x256xf32> -> vector<1x256xf32>
    %1036 = arith.addf %1034, %1035 : vector<1x256xf32>
    %1037 = vector.extract_strided_slice %1036 {offsets = [0, 0], sizes = [1, 192], strides = [1, 1]} : vector<1x256xf32> to vector<1x192xf32>
    %1038 = arith.negf %1037 : vector<1x192xf32>
    %1039 = math.exp %1038 : vector<1x192xf32>
    %cst_167 = arith.constant 1.000000e+00 : f32
    %1040 = vector.broadcast %cst_167 : f32 to vector<1x192xf32>
    %1041 = arith.addf %1040, %1039 : vector<1x192xf32>
    %1042 = arith.divf %1040, %1041 : vector<1x192xf32>
    %1043 = vector.extract_strided_slice %1036 {offsets = [0, 192], sizes = [1, 64], strides = [1, 1]} : vector<1x256xf32> to vector<1x64xf32>
    %1044 = math.tanh %1043 : vector<1x64xf32>
    %1045 = vector.extract_strided_slice %1042 {offsets = [0, 0], sizes = [1, 64], strides = [1, 1]} : vector<1x192xf32> to vector<1x64xf32>
    %1046 = vector.extract_strided_slice %1042 {offsets = [0, 64], sizes = [1, 64], strides = [1, 1]} : vector<1x192xf32> to vector<1x64xf32>
    %1047 = vector.extract_strided_slice %1042 {offsets = [0, 128], sizes = [1, 64], strides = [1, 1]} : vector<1x192xf32> to vector<1x64xf32>
    %1048 = arith.mulf %1046, %1031 : vector<1x64xf32>
    %1049 = arith.mulf %1045, %1044 : vector<1x64xf32>
    %1050 = arith.addf %1048, %1049 : vector<1x64xf32>
    %1051 = math.tanh %1050 : vector<1x64xf32>
    %1052 = arith.mulf %1047, %1051 : vector<1x64xf32>
    %1053 = vector.extract_strided_slice %803 {offsets = [13, 0], sizes = [1, 256], strides = [1, 1]} : vector<16x256xf32> to vector<1x256xf32>
    %cst_168 = arith.constant dense<0.000000e+00> : vector<1x256xf32>
    %1054 = tpu.matmul %1052, %798, %cst_168 {dimension_numbers = #tpu.dot_dimension_numbers<[1], [0], [0], [1], [0, 0, 1, 1], [], []>} : vector<1x64xf32>, vector<64x256xf32>, vector<1x256xf32> -> vector<1x256xf32>
    %1055 = arith.addf %1053, %1054 : vector<1x256xf32>
    %1056 = vector.extract_strided_slice %1055 {offsets = [0, 0], sizes = [1, 192], strides = [1, 1]} : vector<1x256xf32> to vector<1x192xf32>
    %1057 = arith.negf %1056 : vector<1x192xf32>
    %1058 = math.exp %1057 : vector<1x192xf32>
    %cst_169 = arith.constant 1.000000e+00 : f32
    %1059 = vector.broadcast %cst_169 : f32 to vector<1x192xf32>
    %1060 = arith.addf %1059, %1058 : vector<1x192xf32>
    %1061 = arith.divf %1059, %1060 : vector<1x192xf32>
    %1062 = vector.extract_strided_slice %1055 {offsets = [0, 192], sizes = [1, 64], strides = [1, 1]} : vector<1x256xf32> to vector<1x64xf32>
    %1063 = math.tanh %1062 : vector<1x64xf32>
    %1064 = vector.extract_strided_slice %1061 {offsets = [0, 0], sizes = [1, 64], strides = [1, 1]} : vector<1x192xf32> to vector<1x64xf32>
    %1065 = vector.extract_strided_slice %1061 {offsets = [0, 64], sizes = [1, 64], strides = [1, 1]} : vector<1x192xf32> to vector<1x64xf32>
    %1066 = vector.extract_strided_slice %1061 {offsets = [0, 128], sizes = [1, 64], strides = [1, 1]} : vector<1x192xf32> to vector<1x64xf32>
    %1067 = arith.mulf %1065, %1050 : vector<1x64xf32>
    %1068 = arith.mulf %1064, %1063 : vector<1x64xf32>
    %1069 = arith.addf %1067, %1068 : vector<1x64xf32>
    %1070 = math.tanh %1069 : vector<1x64xf32>
    %1071 = arith.mulf %1066, %1070 : vector<1x64xf32>
    %1072 = vector.extract_strided_slice %803 {offsets = [14, 0], sizes = [1, 256], strides = [1, 1]} : vector<16x256xf32> to vector<1x256xf32>
    %cst_170 = arith.constant dense<0.000000e+00> : vector<1x256xf32>
    %1073 = tpu.matmul %1071, %798, %cst_170 {dimension_numbers = #tpu.dot_dimension_numbers<[1], [0], [0], [1], [0, 0, 1, 1], [], []>} : vector<1x64xf32>, vector<64x256xf32>, vector<1x256xf32> -> vector<1x256xf32>
    %1074 = arith.addf %1072, %1073 : vector<1x256xf32>
    %1075 = vector.extract_strided_slice %1074 {offsets = [0, 0], sizes = [1, 192], strides = [1, 1]} : vector<1x256xf32> to vector<1x192xf32>
    %1076 = arith.negf %1075 : vector<1x192xf32>
    %1077 = math.exp %1076 : vector<1x192xf32>
    %cst_171 = arith.constant 1.000000e+00 : f32
    %1078 = vector.broadcast %cst_171 : f32 to vector<1x192xf32>
    %1079 = arith.addf %1078, %1077 : vector<1x192xf32>
    %1080 = arith.divf %1078, %1079 : vector<1x192xf32>
    %1081 = vector.extract_strided_slice %1074 {offsets = [0, 192], sizes = [1, 64], strides = [1, 1]} : vector<1x256xf32> to vector<1x64xf32>
    %1082 = math.tanh %1081 : vector<1x64xf32>
    %1083 = vector.extract_strided_slice %1080 {offsets = [0, 0], sizes = [1, 64], strides = [1, 1]} : vector<1x192xf32> to vector<1x64xf32>
    %1084 = vector.extract_strided_slice %1080 {offsets = [0, 64], sizes = [1, 64], strides = [1, 1]} : vector<1x192xf32> to vector<1x64xf32>
    %1085 = vector.extract_strided_slice %1080 {offsets = [0, 128], sizes = [1, 64], strides = [1, 1]} : vector<1x192xf32> to vector<1x64xf32>
    %1086 = arith.mulf %1084, %1069 : vector<1x64xf32>
    %1087 = arith.mulf %1083, %1082 : vector<1x64xf32>
    %1088 = arith.addf %1086, %1087 : vector<1x64xf32>
    %1089 = math.tanh %1088 : vector<1x64xf32>
    %1090 = arith.mulf %1085, %1089 : vector<1x64xf32>
    %1091 = vector.extract_strided_slice %803 {offsets = [15, 0], sizes = [1, 256], strides = [1, 1]} : vector<16x256xf32> to vector<1x256xf32>
    %cst_172 = arith.constant dense<0.000000e+00> : vector<1x256xf32>
    %1092 = tpu.matmul %1090, %798, %cst_172 {dimension_numbers = #tpu.dot_dimension_numbers<[1], [0], [0], [1], [0, 0, 1, 1], [], []>} : vector<1x64xf32>, vector<64x256xf32>, vector<1x256xf32> -> vector<1x256xf32>
    %1093 = arith.addf %1091, %1092 : vector<1x256xf32>
    %1094 = vector.extract_strided_slice %1093 {offsets = [0, 0], sizes = [1, 192], strides = [1, 1]} : vector<1x256xf32> to vector<1x192xf32>
    %1095 = arith.negf %1094 : vector<1x192xf32>
    %1096 = math.exp %1095 : vector<1x192xf32>
    %cst_173 = arith.constant 1.000000e+00 : f32
    %1097 = vector.broadcast %cst_173 : f32 to vector<1x192xf32>
    %1098 = arith.addf %1097, %1096 : vector<1x192xf32>
    %1099 = arith.divf %1097, %1098 : vector<1x192xf32>
    %1100 = vector.extract_strided_slice %1093 {offsets = [0, 192], sizes = [1, 64], strides = [1, 1]} : vector<1x256xf32> to vector<1x64xf32>
    %1101 = math.tanh %1100 : vector<1x64xf32>
    %1102 = vector.extract_strided_slice %1099 {offsets = [0, 0], sizes = [1, 64], strides = [1, 1]} : vector<1x192xf32> to vector<1x64xf32>
    %1103 = vector.extract_strided_slice %1099 {offsets = [0, 64], sizes = [1, 64], strides = [1, 1]} : vector<1x192xf32> to vector<1x64xf32>
    %1104 = vector.extract_strided_slice %1099 {offsets = [0, 128], sizes = [1, 64], strides = [1, 1]} : vector<1x192xf32> to vector<1x64xf32>
    %1105 = arith.mulf %1103, %1088 : vector<1x64xf32>
    %1106 = arith.mulf %1102, %1101 : vector<1x64xf32>
    %1107 = arith.addf %1105, %1106 : vector<1x64xf32>
    %1108 = math.tanh %1107 : vector<1x64xf32>
    %1109 = arith.mulf %1104, %1108 : vector<1x64xf32>
    %1110 = vector.extract_strided_slice %1109 {offsets = [0, 0], sizes = [1, 32], strides = [1, 1]} : vector<1x64xf32> to vector<1x32xf32>
    %1111 = vector.extract_strided_slice %1109 {offsets = [0, 32], sizes = [1, 32], strides = [1, 1]} : vector<1x64xf32> to vector<1x32xf32>
    %1112 = tpu.concatenate %1110, %1111 in 0 : vector<1x32xf32>, vector<1x32xf32> -> vector<2x32xf32>
    %c0_174 = arith.constant 0 : index
    %c0_175 = arith.constant 0 : index
    %1113 = vector.load %arg21[%c0_174, %c0_175] : memref<32x32xf32, #tpu.memory_space<vmem>>, vector<32x32xf32>
    %cst_176 = arith.constant dense<0.000000e+00> : vector<2x32xf32>
    %1114 = tpu.matmul %1112, %1113, %cst_176 {dimension_numbers = #tpu.dot_dimension_numbers<[1], [0], [0], [1], [0, 0, 1, 1], [], []>} : vector<2x32xf32>, vector<32x32xf32>, vector<2x32xf32> -> vector<2x32xf32>
    %c0_177 = arith.constant 0 : index
    %c0_178 = arith.constant 0 : index
    %1115 = vector.load %arg22[%c0_177, %c0_178] : memref<1x32xf32, #tpu.memory_space<vmem>>, vector<1x32xf32>
    %1116 = vector.broadcast %1115 : vector<1x32xf32> to vector<2x32xf32>
    %1117 = arith.addf %1114, %1116 : vector<2x32xf32>
    %cst_179 = arith.constant 0.000000e+00 : f32
    %1118 = vector.broadcast %cst_179 : f32 to vector<2x32xf32>
    %1119 = arith.maximumf %1117, %1118 : vector<2x32xf32>
    %c0_180 = arith.constant 0 : index
    %c0_181 = arith.constant 0 : index
    %1120 = vector.load %arg23[%c0_180, %c0_181] : memref<32x6xf32, #tpu.memory_space<vmem>>, vector<32x6xf32>
    %cst_182 = arith.constant dense<0.000000e+00> : vector<2x6xf32>
    %1121 = tpu.matmul %1119, %1120, %cst_182 {dimension_numbers = #tpu.dot_dimension_numbers<[1], [0], [0], [1], [0, 0, 1, 1], [], []>} : vector<2x32xf32>, vector<32x6xf32>, vector<2x6xf32> -> vector<2x6xf32>
    %c0_183 = arith.constant 0 : index
    %c0_184 = arith.constant 0 : index
    %1122 = vector.load %arg24[%c0_183, %c0_184] : memref<1x6xf32, #tpu.memory_space<vmem>>, vector<1x6xf32>
    %1123 = vector.broadcast %1122 : vector<1x6xf32> to vector<2x6xf32>
    %1124 = arith.addf %1121, %1123 : vector<2x6xf32>
    %c0_185 = arith.constant 0 : index
    %c0_186 = arith.constant 0 : index
    %1125 = vector.load %arg25[%c0_185, %c0_186] : memref<2x6xf32, #tpu.memory_space<vmem>>, vector<2x6xf32>
    tpu.vector_store %arg25[%c0_185, %c0_186], %1124 {strides = array<i32>} : memref<2x6xf32, #tpu.memory_space<vmem>>, vector<2x6xf32>,
    return
  }
}

</mosaic_0001>

<bundles_post_ra>
// kernel: attention_lstm_forward.1
= control target key start
LH: loop header
LB: loop body
LE: loop exit
PB: predicated region body
PF: predicated region fallthrough
CT: control target
= control target key end

     0   :  { %s10118_s0 = inlined_call_operand.vmem [shape: f32[5,32], index: 0, kind: input, shape index: {}]   ;;  %s10119_s1 = inlined_call_operand.vmem [shape: f32[8,5], index: 1, kind: input, shape index: {}]   ;;  %s10120_s2 = inlined_call_operand.vmem [shape: f32[8,1], index: 2, kind: input, shape index: {}]   ;;  %s10121_s3 = inlined_call_operand.vmem [shape: f32[16,48], index: 3, kind: input, shape index: {}]   ;;  %s10122_s4 = inlined_call_operand.vmem [shape: f32[1,48], index: 4, kind: input, shape index: {}]   ;;  %s10123_s5 = inlined_call_operand.vmem [shape: f32[16,16], index: 5, kind: input, shape index: {}]   ;;  %s10124_s6 = inlined_call_operand.vmem [shape: f32[1,16], index: 6, kind: input, shape index: {}]   ;;  %s10125_s7 = inlined_call_operand.vmem [shape: f32[1,16], index: 7, kind: input, shape index: {}]   ;;  %s10126_s8 = inlined_call_operand.vmem [shape: f32[1,16], index: 8, kind: input, shape index: {}]   ;;  %s10127_s9 = inlined_call_operand.vmem [shape: f32[16,512], index: 9, kind: input, shape index: {}]   ;;  %s10128_s10 = inlined_call_operand.vmem [shape: f32[1,512], index: 10, kind: input, shape index: {}]   ;;  %s10129_s11 = inlined_call_operand.vmem [shape: f32[512,16], index: 11, kind: input, shape index: {}]   ;;  %s10130_s12 = inlined_call_operand.vmem [shape: f32[1,16], index: 12, kind: input, shape index: {}]   ;;  %s10131_s13 = inlined_call_operand.vmem [shape: f32[1,16], index: 13, kind: input, shape index: {}]   ;;  %s10132_s14 = inlined_call_operand.vmem [shape: f32[1,16], index: 14, kind: input, shape index: {}]   ;;  %s10133_s15 = inlined_call_operand.vmem [shape: f32[16,256], index: 15, kind: input, shape index: {}]   ;;  %s10134_s16 = inlined_call_operand.vmem [shape: f32[64,256], index: 16, kind: input, shape index: {}]   ;;  %s10135_s17 = inlined_call_operand.vmem [shape: f32[1,256], index: 17, kind: input, shape index: {}]   ;;  %s10136_s18 = inlined_call_operand.vmem [shape: f32[64,256], index: 18, kind: input, shape index: {}]   ;;  %s10137_s19 = inlined_call_operand.vmem [shape: f32[64,256], index: 19, kind: input, shape index: {}]   ;;  %s10138_s20 = inlined_call_operand.vmem [shape: f32[1,256], index: 20, kind: input, shape index: {}]   ;;  %s10139_s21 = inlined_call_operand.vmem [shape: f32[32,32], index: 21, kind: input, shape index: {}]   ;;  %s10140_s22 = inlined_call_operand.vmem [shape: f32[1,32], index: 22, kind: input, shape index: {}]   ;;  %s10141_s23 = inlined_call_operand.vmem [shape: f32[32,6], index: 23, kind: input, shape index: {}]   ;;  %s10142_s24 = inlined_call_operand.vmem [shape: f32[1,6], index: 24, kind: input, shape index: {}]   ;;  %s10143_s25 = inlined_call_operand.hbm [shape: f32[2,6], index: 25, kind: output, shape index: {}]  }
   0x1   :  { %10149 = sst [smem:[#allocation5_spill]] %s10118_s0 }
   0x2   :  { %10150 = sst [smem:[#allocation6_spill]] %s10119_s1 }
   0x3   :  { %10151 = sst [smem:[#allocation7_spill]] %s10120_s2 }
   0x4   :  { %10152 = sst [smem:[#allocation8_spill]] %s10121_s3 }
   0x5   :  { %10153 = sst [smem:[#allocation9_spill]] %s10122_s4 }
   0x6   :  { %10154 = sst [smem:[#allocation10_spill]] %s10123_s5 }
   0x7   :  { %10155 = sst [smem:[#allocation11_spill]] %s10124_s6 }
   0x8   :  { %10156 = sst [smem:[#allocation12_spill]] %s10125_s7 }
   0x9   :  { %10157 = sst [smem:[#allocation13_spill]] %s10126_s8 }
   0xa   :  { %10158 = sst [smem:[#allocation14_spill]] %s10127_s9 }
   0xb   :  { %s10159_s6 = sld [smem:[#allocation5_spill]]  ;;  %vm93_vm0 = vcmask 1044480   ;;  %s10160_s3 = sld [smem:[#allocation6_spill]]  ;;  %v10147_v2 = vmov 0.0   ;;  %vm8381_vm1 = vmmov 0   ;;  %vm89_vm2 = vcmask 39936  }
   0xc   :  { %7085 = vmatprep.subr.mxu0 %v10147_v2  ;;  %7087 = vmatprep.mubr.msk.f32.mxu0 %vm8381_vm1, %v10147_v2  ;;  %s10161_s8 = sld [smem:[#allocation7_spill]] }
  0x11   :  { %v82_v0 = vld [vmem:[%s10159_s6] sm:$0x1f] }
  0x12   :  { %v81_v1 = vld [vmem:[%s10160_s3] sm:$0xff] }
  0x13   :  { %v83_v3 = vld [vmem:[%s10161_s8] sm:$0xff] }
  0x14   :  { %30 = vsyncpa [#allocation3], 0  ;;  %7086 = vmatpush3.msk.msra.mxu0 %vm93_vm0, %v82_v0  ;;  %v8382_v4 = vmov 0   ;;  %7102 = vmatprep.subr.mxu1 %v10147_v2  ;;  %s10162_s28 = sld [smem:[#allocation8_spill]]  ;;  %vm180_vm3 = vcmask 130048   ;;  %s8383_s0 = smov 112   ;;  %v304_v58 = vlaneseq }
  0x15   :  { %7868 = vset.pattern.permute.xlu0 %v8382_v4  ;;  %7088 = vmatmul.mubr.msk.f32.vlgmr.msra.gmra.mrb[0].mxu0 %vm89_vm2, %v81_v1  ;;  %v8384_v13 = vmov 1   ;;  %s10163_s6 = sld [smem:[#allocation9_spill]]  ;;  %v8385_v18 = vmov 2   ;;  %v8386_v19 = vmov 3   ;;  %v8387_v20 = vmov 5   ;;  %s8399_s30 = smov 120  }
  0x16   :  { %86 = vperm.xlu0 %7868, %v83_v3   ;;  %7104 = vmatprep.mubr.msk.f32.mxu1 %vm8381_vm1, %v10147_v2  ;;  %v8388_v21 = vmov 4   ;;  %v8389_v22 = vmov 8   ;;  %v8390_v23 = vmov 6   ;;  %v8391_v24 = vmov 11   ;;  %s8400_s7 = smov 96   ;;  %s8401_s3 = smov 92  }
  0x17   :  { %7869 = vset.pattern.permute.xlu1 %v8384_v13  ;;  %v8392_v25 = vmov 7   ;;  %v8393_v26 = vmov 14   ;;  %v8394_v28 = vmov 9   ;;  %v8395_v29 = vmov 10   ;;  %s8402_s26 = smov 94   ;;  %s8403_s1 = smov 90  }
  0x18   :  { %v8396_v30 = vmov 12   ;;  %v8397_v31 = vmov 13   ;;  %v8398_v32 = vmov 15   ;;  %v8658_v61 = vshrl.u32 %v304_v58, 7  ;;  %s8404_s8 = smov 88   ;;  %s8405_s27 = smov 86  }
  0x19   :  { %vm1201_vm4 = vcmask 130112   ;;  %vm319_vm5 = vcmask 64512   ;;  %s8406_s4 = smov 84   ;;  %s8408_s9 = smov 2   ;;  %vm1177_vm6 = vcmask 15360   ;;  %vm1179_vm7 = vcmask 31744  }
  0x1a   :  { %v171_v5 = vld [vmem:[%s10162_s28] sm:$0xff]  ;;  %v172_v6 = vld [vmem:[%s10162_s28 + $0x8] sm:$0xff]  ;;  %v8663_v63 = vsub.s32 0, %v8658_v61  ;;  %v8666_v0 = vsub.s32 1, %v8658_v61  ;;  %v8669_v1 = vsub.s32 2, %v8658_v61  ;;  %v8672_v3 = vsub.s32 3, %v8658_v61 }
  0x1b   :  { %v7206_v7 = vpack.c.bf16 %v172_v6, %v171_v5  ;;  %v6824_v14 = vld [vmem:[%s10163_s6] ss:$0 sm:$0xff]  ;;  %v519_v5 = vsub.s32 4, %v8658_v61  ;;  %v528_v6 = vsub.s32 5, %v8658_v61  ;;  %s8407_s28 = smov 82   ;;  %s8409_s5 = smov 4  }
  0x1c   :  { %s8411_s29 = smov 8   ;;  %s8412_s2 = smov 10   ;;  %vm1181_vm8 = vcmask 48128   ;;  %vm1184_vm9 = vcmask 80896   ;;  %vm1186_vm10 = vcmask 97280   ;;  %vm1188_vm11 = vcmask 113664  }
  0x1d   :  { %7207 = vmatprep.subr.bf16.mxu0 %v7206_v7  ;;  %s8413_s6 = smov 12   ;;  %vm2807_vm12 = vcmask 523264   ;;  %vm4646_vm13 = vcmask 1040384   ;;  %vm4648_vm14 = vcmask 1041408   ;;  %vm4650_vm15 = vcmask 1042432  }
  0x1e   :  { %7209 = vmatpush3.bf16.msra.mxu0 %v7206_v7  ;;  %vm4652_vm2 = vcmask 1043456  }
  0x1f   :  { %7097 = vmatprep.subr.mxu0 %v10147_v2 }
  0x95   :  { %v87_v8 = vpop.permute.xlu0 %86 }
  0xe8   :  { %v163_v9 = vpop.f32.mrb[0].mxu0 }
  0xe9   :  { %v8571_v10 = vadd.f32 %v163_v9, %v87_v8  ;;  %v7089_v11 = vpop.f32.mrb[1].mxu0  ;;  %v625_v8 = vsub.s32 6, %v8658_v61  ;;  %v634_v9 = vsub.s32 7, %v8658_v61 }
  0xeb   :  { %168 = vrot.lane.b32.xlu0 %v8571_v10, %s8383_s0  ;;  %7094 = vmatprep.mubr.msk.f32.mxu0 %vm180_vm3, %v8571_v10 }
 0x15d   :  { %v8577_v12 = vpop.permute.xlu0 %168 }
 0x15e   :  { %7095 = vmatmul.mubr.msk.f32.vlgmr.msra.gmra.mrb[2].mxu0 %vm180_vm3, %v8577_v12 }
 0x15f   :  { %7099 = vmatprep.mubr.msk.f32.mxu0 %vm8381_vm1, %v10147_v2 }
 0x231   :  { %v7096_v15 = vpop.f32.mrb[2].mxu0 }
 0x232   :  { %v8586_v16 = vadd.f32 %v7096_v15, %v6824_v14  ;;  %v251_v17 = vpop.f32.mrb[3].mxu0 }
 0x233   :  { %v8602_v27 = vadd.f32 %v6824_v14, %v251_v17 }
 0x234   :  { %1191 = vperm.xlu0 %7868, %v8586_v16   ;;  %264 = vrot.lane.b32.xlu1 %v8586_v16, %s8383_s0 }
 0x238   :  { %7870 = vset.pattern.permute.xlu0 %v8385_v18  ;;  %1196 = vperm.xlu1 %7869, %v8586_v16  }
 0x239   :  { %1296 = vperm.xlu0 %7870, %v8586_v16  }
 0x23c   :  { %7871 = vset.pattern.permute.xlu1 %v8386_v19 }
 0x23d   :  { %7873 = vset.pattern.permute.xlu0 %v8387_v20  ;;  %1301 = vperm.xlu1 %7871, %v8586_v16  }
 0x23e   :  { %1405 = vperm.xlu0 %7873, %v8586_v16  }
 0x241   :  { %7872 = vset.pattern.permute.xlu1 %v8388_v21 }
 0x242   :  { %7876 = vset.pattern.permute.xlu0 %v8389_v22  ;;  %1400 = vperm.xlu1 %7872, %v8586_v16  }
 0x243   :  { %1608 = vperm.xlu0 %7876, %v8586_v16  }
 0x246   :  { %7874 = vset.pattern.permute.xlu1 %v8390_v23 }
 0x247   :  { %7879 = vset.pattern.permute.xlu0 %v8391_v24  ;;  %1504 = vperm.xlu1 %7874, %v8586_v16  }
 0x248   :  { %1717 = vperm.xlu0 %7879, %v8586_v16  }
 0x24b   :  { %7875 = vset.pattern.permute.xlu1 %v8392_v25 }
 0x24c   :  { %7882 = vset.pattern.permute.xlu0 %v8393_v26  ;;  %1509 = vperm.xlu1 %7875, %v8586_v16  }
 0x24d   :  { %1920 = vperm.xlu0 %7882, %v8586_v16  }
 0x250   :  { %7877 = vset.pattern.permute.xlu1 %v8394_v28 }
 0x251   :  { %7884 = vset.pattern.permute.xlu0 %v8382_v4  ;;  %1613 = vperm.xlu1 %7877, %v8586_v16  }
 0x252   :  { %301 = vperm.xlu0 %7884, %v8602_v27  }
 0x255   :  { %7878 = vset.pattern.permute.xlu1 %v8395_v29 }
 0x256   :  { %1712 = vperm.xlu1 %7878, %v8586_v16   ;;  %7887 = vset.pattern.permute.xlu0 %v8386_v19 }
 0x257   :  { %417 = vperm.xlu0 %7887, %v8602_v27  }
 0x25a   :  { %7880 = vset.pattern.permute.xlu1 %v8396_v30 }
 0x25b   :  { %1816 = vperm.xlu1 %7880, %v8586_v16   ;;  %7890 = vset.pattern.permute.xlu0 %v8390_v23 }
 0x25c   :  { %620 = vperm.xlu0 %7890, %v8602_v27  }
 0x25f   :  { %7881 = vset.pattern.permute.xlu1 %v8397_v31 }
 0x260   :  { %1821 = vperm.xlu1 %7881, %v8586_v16   ;;  %7893 = vset.pattern.permute.xlu0 %v8394_v28 }
 0x261   :  { %735 = vperm.xlu0 %7893, %v8602_v27  }
 0x264   :  { %7883 = vset.pattern.permute.xlu1 %v8398_v32 }
 0x265   :  { %1925 = vperm.xlu1 %7883, %v8586_v16   ;;  %7896 = vset.pattern.permute.xlu0 %v8396_v30 }
 0x266   :  { %938 = vperm.xlu0 %7896, %v8602_v27  }
 0x269   :  { %262 = vrot.lane.b32.xlu1 %v8602_v27, %s8383_s0  ;;  %s8410_s0 = smov 6  }
 0x26a   :  { %7885 = vset.pattern.permute.xlu1 %v8384_v13  ;;  %7899 = vset.pattern.permute.xlu0 %v8398_v32 }
 0x26d   :  { %310 = vperm.xlu1 %7885, %v8602_v27  }
 0x271   :  { %7886 = vset.pattern.permute.xlu1 %v8385_v18 }
 0x272   :  { %408 = vperm.xlu1 %7886, %v8602_v27  }
 0x276   :  { %7888 = vset.pattern.permute.xlu1 %v8388_v21 }
 0x277   :  { %514 = vperm.xlu1 %7888, %v8602_v27  }
 0x27b   :  { %7889 = vset.pattern.permute.xlu1 %v8387_v20 }
 0x27c   :  { %523 = vperm.xlu1 %7889, %v8602_v27  }
 0x280   :  { %7891 = vset.pattern.permute.xlu1 %v8392_v25 }
 0x281   :  { %629 = vperm.xlu1 %7891, %v8602_v27  }
 0x285   :  { %7892 = vset.pattern.permute.xlu1 %v8389_v22 }
 0x286   :  { %726 = vperm.xlu1 %7892, %v8602_v27  }
 0x28a   :  { %7894 = vset.pattern.permute.xlu1 %v8395_v29 }
 0x28b   :  { %832 = vperm.xlu1 %7894, %v8602_v27  }
 0x28f   :  { %7895 = vset.pattern.permute.xlu1 %v8391_v24 }
 0x290   :  { %841 = vperm.xlu1 %7895, %v8602_v27  }
 0x294   :  { %7897 = vset.pattern.permute.xlu1 %v8397_v31 }
 0x295   :  { %947 = vperm.xlu1 %7897, %v8602_v27  }
 0x2a6   :  { %v265_v33 = vpop.permute.xlu1 %264 }
 0x2b3   :  { %v1192_v47 = vpop.permute.xlu0 %1191 }
 0x2b7   :  { %v1197_v34 = vpop.permute.xlu1 %1196 }
 0x2b8   :  { %v1297_v49 = vpop.permute.xlu0 %1296 }
 0x2bc   :  { %v1302_v35 = vpop.permute.xlu1 %1301 }
 0x2bd   :  { %v1406_v51 = vpop.permute.xlu0 %1405 }
 0x2c1   :  { %v1401_v36 = vpop.permute.xlu1 %1400 }
 0x2c2   :  { %v1609_v53 = vpop.permute.xlu0 %1608 }
 0x2c6   :  { %v8625_v37 = vpop.permute.xlu1 %1504 }
 0x2c7   :  { %v1718_v55 = vpop.permute.xlu0 %1717 }
 0x2cb   :  { %v8627_v38 = vpop.permute.xlu1 %1509 }
 0x2cc   :  { %v8652_v57 = vpop.permute.xlu0 %1920 }
 0x2d0   :  { %v1614_v39 = vpop.permute.xlu1 %1613 }
 0x2d1   :  { %v8656_v60 = vpop.permute.xlu0 %301 }
 0x2d5   :  { %v8629_v40 = vpop.permute.xlu1 %1712 }
 0x2d6   :  { %v418_v4 = vpop.permute.xlu0 %417 }
 0x2da   :  { %v8631_v41 = vpop.permute.xlu1 %1816 }
 0x2db   :  { %v621_v23 = vpop.permute.xlu0 %620 }
 0x2df   :  { %v8633_v42 = vpop.permute.xlu1 %1821 }
 0x2e0   :  { %v736_v61 = vpop.permute.xlu0 %735 }
 0x2e4   :  { %v8635_v43 = vpop.permute.xlu1 %1925 }
 0x2e5   :  { %v939_v2 = vpop.permute.xlu0 %938 }
 0x2e8   :  { %v263_v44 = vpop.permute.xlu1 %262 }
 0x2e9   :  { %268 = vxpose.xlu1.b32.start [1/2] (short) (narrow) %v263_v44, 16 }
 0x2ec   :  { %v8638_v45 = vpop.permute.xlu1 %310 }
 0x2ed   :  { %269 = vxpose.xlu1.b32.end [2/2] (short) (narrow) %v265_v33, 16 }
 0x2f1   :  { %v8640_v46 = vpop.permute.xlu1 %408 }
 0x2f6   :  { %v8642_v48 = vpop.permute.xlu1 %514 }
 0x2fb   :  { %v8644_v50 = vpop.permute.xlu1 %523 }
 0x300   :  { %v8646_v52 = vpop.permute.xlu1 %629 }
 0x305   :  { %v8648_v54 = vpop.permute.xlu1 %726 }
 0x30a   :  { %v8650_v56 = vpop.permute.xlu1 %832 }
 0x30b   :  { %7898 = vset.pattern.permute.xlu1 %v8393_v26 }
 0x30f   :  { %v8654_v59 = vpop.permute.xlu1 %841 }
 0x314   :  { %v8660_v62 = vpop.permute.xlu1 %947 }
 0x369   :  { %v284_v7 = vpop.trf.xlu1 }
 0x36a   :  { %v8679_v11 = vrot.slane %v284_v7, %v8663_v63  ;;  %v8682_v13 = vrot.slane %v284_v7, %v8666_v0  ;;  %v414_v14 = vrot.slane %v284_v7, %v8669_v1  ;;  %v423_v15 = vrot.slane %v284_v7, %v8672_v3 }
 0x36b   :  { %v8686_v17 = vrot.slane %v284_v7, %v519_v5  ;;  %v8688_v18 = vrot.slane %v284_v7, %v528_v6  ;;  %v626_v25 = vrot.slane %v284_v7, %v625_v8  ;;  %v635_v30 = vrot.slane %v284_v7, %v634_v9 }
 0x36c   :  { %v1194_v19 = vmul.f32 %v1192_v47, %v8679_v11  ;;  %v1199_v20 = vmul.f32 %v1197_v34, %v8682_v13  ;;  %v1299_v21 = vmul.f32 %v1297_v49, %v414_v14  ;;  %v1304_v22 = vmul.f32 %v1302_v35, %v423_v15 }
 0x36d   :  { %v285_v24 = vpop.trf.xlu1  ;;  %v1403_v31 = vmul.f32 %v1401_v36, %v8686_v17  ;;  %v1408_v32 = vmul.f32 %v1406_v51, %v8688_v18  ;;  %v1507_v49 = vmul.f32 %v8625_v37, %v626_v25  ;;  %v1512_v58 = vmul.f32 %v8627_v38, %v635_v30 }
 0x36e   :  { %v8692_v26 = vadd.f32 %v1199_v20, %v1194_v19  ;;  %v8695_v28 = vrot.slane %v285_v24, %v8663_v63  ;;  %v8698_v29 = vrot.slane %v285_v24, %v8666_v0  ;;  %v8704_v34 = vadd.f32 %v1304_v22, %v1299_v21 }
 0x36f   :  { %v838_v36 = vrot.slane %v285_v24, %v8669_v1  ;;  %v847_v51 = vrot.slane %v285_v24, %v8672_v3  ;;  %v8718_v19 = vadd.f32 %v1408_v32, %v1403_v31  ;;  %v944_v38 = vrot.slane %v285_v24, %v519_v5 }
 0x370   :  { %v1202_v33 = vsel %vm1201_vm4, %v8692_v26, -inf  ;;  %v1611_v35 = vmul.f32 %v1609_v53, %v8695_v28  ;;  %v1616_v44 = vmul.f32 %v1614_v39, %v8698_v29  ;;  %v1306_v7 = vsel %vm1201_vm4, %v8704_v34, -inf }
 0x371   :  { %1203 = vmax.xlane.f32.xlu0 %v1202_v33  ;;  %v8720_v39 = vadd.f32 %v1512_v58, %v1507_v49  ;;  %v1715_v37 = vmul.f32 %v8629_v40, %v838_v36  ;;  %v1720_v20 = vmul.f32 %v1718_v55, %v847_v51  ;;  %v953_v21 = vrot.slane %v285_v24, %v528_v6 }
 0x372   :  { %v8708_v47 = vadd.f32 %v1616_v44, %v1611_v35  ;;  %v415_v22 = vmul.f32 %v414_v14, %v8640_v46  ;;  %v424_v33 = vmul.f32 %v423_v15, %v418_v4  ;;  %v1410_v35 = vsel %vm1201_vm4, %v8718_v19, -inf }
 0x373   :  { %v627_v44 = vmul.f32 %v626_v25, %v621_v23  ;;  %v636_v32 = vmul.f32 %v635_v30, %v8646_v52  ;;  %v839_v49 = vmul.f32 %v838_v36, %v8650_v56  ;;  %v1514_v40 = vsel %vm1201_vm4, %v8720_v39, -inf }
 0x374   :  { %v1618_v53 = vsel %vm1201_vm4, %v8708_v47, -inf  ;;  %v8726_v31 = vadd.f32 %v424_v33, %v415_v22  ;;  %v848_v55 = vmul.f32 %v847_v51, %v8654_v59  ;;  %v945_v5 = vmul.f32 %v944_v38, %v939_v2 }
 0x375   :  { %1307 = vmax.xlane.f32.xlu0 %v1306_v7  ;;  %1619 = vmax.xlane.f32.xlu1 %v1618_v53  ;;  %v8733_v46 = vadd.f32 %v1720_v20, %v1715_v37  ;;  %v8735_v4 = vrot.slane %v285_v24, %v625_v8  ;;  %v8737_v6 = vadd.f32 %v636_v32, %v627_v44 }
 0x376   :  { %v954_v14 = vmul.f32 %v953_v21, %v8660_v62  ;;  %v1819_v15 = vmul.f32 %v8631_v41, %v944_v38  ;;  %v1824_v52 = vmul.f32 %v8633_v42, %v953_v21  ;;  %v8742_v23 = vrot.slane %v285_v24, %v634_v9 }
 0x377   :  { %v8744_v56 = vadd.f32 %v848_v55, %v839_v49  ;;  %v1722_v2 = vsel %vm1201_vm4, %v8733_v46, -inf  ;;  %v1923_v8 = vmul.f32 %v8652_v57, %v8735_v4  ;;  %v308_v57 = vmul.f32 %v8679_v11, %v8656_v60 }
 0x378   :  { %v8746_v25 = vadd.f32 %v954_v14, %v945_v5  ;;  %v8750_v59 = vadd.f32 %v1824_v52, %v1819_v15  ;;  %v1928_v41 = vmul.f32 %v8635_v43, %v8742_v23  ;;  %v317_v43 = vmul.f32 %v8682_v13, %v8638_v45 }
 0x379   :  { %1411 = vmax.xlane.f32.xlu0 %v1410_v35  ;;  %v521_v30 = vmul.f32 %v8686_v17, %v8642_v48  ;;  %v530_v58 = vmul.f32 %v8688_v18, %v8644_v50  ;;  %v733_v60 = vmul.f32 %v8695_v28, %v8648_v54  ;;  %v742_v11 = vmul.f32 %v8698_v29, %v736_v61 }
 0x37a   :  { %v1826_v42 = vsel %vm1201_vm4, %v8750_v59, -inf  ;;  %v8758_v62 = vadd.f32 %v1928_v41, %v1923_v8  ;;  %v8768_v24 = vadd.f32 %v317_v43, %v308_v57  ;;  %v426_v50 = vsel %vm319_vm5, %v8726_v31, -inf }
 0x37b   :  { %v8776_v51 = vadd.f32 %v530_v58, %v521_v30  ;;  %v8783_v13 = vadd.f32 %v742_v11, %v733_v60  ;;  %v638_v54 = vsel %vm319_vm5, %v8737_v6, -inf  ;;  %v850_v17 = vsel %vm319_vm5, %v8744_v56, -inf }
 0x37c   :  { %v1930_v9 = vsel %vm1201_vm4, %v8758_v62, -inf  ;;  %v320_v36 = vsel %vm319_vm5, %v8768_v24, -inf  ;;  %v956_v60 = vsel %vm319_vm5, %v8746_v25, -inf  ;;  %vm4657_vm4 = vcmask 1046528  }
 0x37d   :  { %1515 = vmax.xlane.f32.xlu0 %v1514_v40  ;;  %v532_v45 = vsel %vm319_vm5, %v8776_v51, -inf  ;;  %v744_v48 = vsel %vm319_vm5, %v8783_v13, -inf }
 0x381   :  { %1723 = vmax.xlane.f32.xlu0 %v1722_v2 }
 0x385   :  { %1827 = vmax.xlane.f32.xlu0 %v1826_v42 }
 0x386   :  { %1044 = vperm.xlu1 %7898, %v8602_v27  }
 0x389   :  { %1931 = vmax.xlane.f32.xlu0 %v1930_v9 }
 0x39f   :  { %1053 = vperm.xlu0 %7899, %v8602_v27  }
 0x3aa   :  { %321 = vmax.xlane.f32.xlu1 %v320_v36 }
 0x3ae   :  { %533 = vmax.xlane.f32.xlu1 %v532_v45 }
 0x3b2   :  { %745 = vmax.xlane.f32.xlu1 %v744_v48 }
 0x3be   :  { %427 = vmax.xlane.f32.xlu0 %v426_v50 }
 0x3c2   :  { %639 = vmax.xlane.f32.xlu0 %v638_v54 }
 0x3c6   :  { %851 = vmax.xlane.f32.xlu0 %v850_v17 }
 0x3fe   :  { %v1204_v18 = vpop.xlane.xlu0 %1203 }
 0x3ff   :  { %v1205_v28 = vsub.f32 %v8692_v26, %v1204_v18 }
 0x401   :  { %v1206_v29 = vmul.f32 1.442695, %v1205_v28 }
 0x402   :  { %v1308_v61 = vpop.xlane.xlu0 %1307  ;;  %v1620_v53 = vpop.xlane.xlu1 %1619 }
 0x403   :  { %7900 = vpow2.f32 %v1206_v29  ;;  %v1309_v7 = vsub.f32 %v8704_v34, %v1308_v61  ;;  %v1621_v38 = vsub.f32 %v8708_v47, %v1620_v53 }
 0x405   :  { %v1310_v37 = vmul.f32 1.442695, %v1309_v7  ;;  %v1622_v33 = vmul.f32 1.442695, %v1621_v38 }
 0x406   :  { %v1412_v20 = vpop.xlane.xlu0 %1411  ;;  %v1045_v42 = vpop.permute.xlu1 %1044 }
 0x407   :  { %7902 = vpow2.f32 %v1310_v37  ;;  %v1413_v21 = vsub.f32 %v8718_v19, %v1412_v20  ;;  %v1051_v58 = vmul.f32 %v8735_v4, %v1045_v42 }
 0x409   :  { %v1414_v22 = vmul.f32 1.442695, %v1413_v21 }
 0x40a   :  { %v1516_v35 = vpop.xlane.xlu0 %1515 }
 0x40b   :  { %7904 = vpow2.f32 %v1414_v22  ;;  %v1517_v44 = vsub.f32 %v8720_v39, %v1516_v35 }
 0x40c   :  { %7906 = vpow2.f32 %v1622_v33 }
 0x40d   :  { %v8798_v26 = vpop.eup %7900  ;;  %v1518_v32 = vmul.f32 1.442695, %v1517_v44 }
 0x40e   :  { %v1724_v49 = vpop.xlane.xlu0 %1723  ;;  %1209 = vrot.lane.b32.xlu1 %v8798_v26, %s8399_s30 }
 0x40f   :  { %7908 = vpow2.f32 %v1518_v32  ;;  %v1725_v34 = vsub.f32 %v8733_v46, %v1724_v49 }
 0x411   :  { %v8803_v47 = vpop.eup %7902  ;;  %v1726_v19 = vmul.f32 1.442695, %v1725_v34 }
 0x412   :  { %v1828_v40 = vpop.xlane.xlu0 %1827  ;;  %1313 = vrot.lane.b32.xlu1 %v8803_v47, %s8399_s30 }
 0x413   :  { %7910 = vpow2.f32 %v1726_v19  ;;  %v1829_v39 = vsub.f32 %v8750_v59, %v1828_v40 }
 0x415   :  { %v8808_v55 = vpop.eup %7904  ;;  %v1830_v5 = vmul.f32 1.442695, %v1829_v39 }
 0x416   :  { %v1932_v14 = vpop.xlane.xlu0 %1931  ;;  %1417 = vrot.lane.b32.xlu0 %v8808_v55, %s8399_s30  ;;  %v8813_v15 = vpop.eup %7906 }
 0x417   :  { %7912 = vpow2.f32 %v1830_v5  ;;  %v1933_v46 = vsub.f32 %v8758_v62, %v1932_v14 }
 0x419   :  { %v8815_v52 = vpop.eup %7908  ;;  %v1934_v2 = vmul.f32 1.442695, %v1933_v46 }
 0x41a   :  { %1625 = vrot.lane.b32.xlu0 %v8813_v15, %s8399_s30  ;;  %1521 = vrot.lane.b32.xlu1 %v8815_v52, %s8399_s30 }
 0x41b   :  { %7914 = vpow2.f32 %v1934_v2 }
 0x41d   :  { %v8821_v59 = vpop.eup %7910 }
 0x41e   :  { %1729 = vrot.lane.b32.xlu1 %v8821_v59, %s8399_s30  ;;  %v1054_v57 = vpop.permute.xlu0 %1053 }
 0x41f   :  { %v1060_v30 = vmul.f32 %v8742_v23, %v1054_v57 }
 0x421   :  { %v8825_v8 = vpop.eup %7912  ;;  %v8836_v36 = vadd.f32 %v1060_v30, %v1051_v58 }
 0x422   :  { %1833 = vrot.lane.b32.xlu0 %v8825_v8, %s8399_s30 }
 0x423   :  { %v1062_v11 = vsel %vm319_vm5, %v8836_v36, -inf }
 0x425   :  { %v8829_v41 = vpop.eup %7914 }
 0x426   :  { %1937 = vrot.lane.b32.xlu0 %v8829_v41, %s8399_s30 }
 0x437   :  { %v322_v62 = vpop.xlane.xlu1 %321 }
 0x438   :  { %v323_v9 = vsub.f32 %v8768_v24, %v322_v62 }
 0x43a   :  { %v324_v43 = vmul.f32 1.442695, %v323_v9 }
 0x43b   :  { %v534_v23 = vpop.xlane.xlu1 %533 }
 0x43c   :  { %7916 = vpow2.f32 %v324_v43  ;;  %v535_v18 = vsub.f32 %v8776_v51, %v534_v23 }
 0x43e   :  { %v536_v53 = vmul.f32 1.442695, %v535_v18 }
 0x43f   :  { %v746_v50 = vpop.xlane.xlu1 %745 }
 0x440   :  { %v747_v7 = vsub.f32 %v8783_v13, %v746_v50  ;;  %7918 = vpow2.f32 %v536_v53 }
 0x442   :  { %957 = vmax.xlane.f32.xlu1 %v956_v60  ;;  %v748_v21 = vmul.f32 1.442695, %v747_v7 }
 0x444   :  { %7920 = vpow2.f32 %v748_v21 }
 0x445   :  { %1063 = vmax.xlane.f32.xlu0 %v1062_v11 }
 0x446   :  { %v8842_v45 = vpop.eup %7916 }
 0x447   :  { %v326_v24 = vsel %vm319_vm5, %v8842_v45, 0.0 }
 0x448   :  { %327 = vadd.xlane.f32.xlu1 %v326_v24 }
 0x44a   :  { %v8858_v39 = vpop.eup %7918 }
 0x44b   :  { %v428_v48 = vpop.xlane.xlu0 %427  ;;  %v538_v46 = vsel %vm319_vm5, %v8858_v39, 0.0 }
 0x44c   :  { %v429_v37 = vsub.f32 %v8726_v31, %v428_v48 }
 0x44e   :  { %v430_v22 = vmul.f32 1.442695, %v429_v37  ;;  %v8860_v14 = vpop.eup %7920 }
 0x44f   :  { %v640_v4 = vpop.xlane.xlu0 %639  ;;  %v750_v42 = vsel %vm319_vm5, %v8860_v14, 0.0 }
 0x450   :  { %v641_v33 = vsub.f32 %v8737_v6, %v640_v4  ;;  %7922 = vpow2.f32 %v430_v22 }
 0x452   :  { %v642_v31 = vmul.f32 1.442695, %v641_v33 }
 0x453   :  { %v852_v28 = vpop.xlane.xlu0 %851 }
 0x454   :  { %v853_v13 = vsub.f32 %v8744_v56, %v852_v28  ;;  %7924 = vpow2.f32 %v642_v31 }
 0x456   :  { %v854_v19 = vmul.f32 1.442695, %v853_v13 }
 0x458   :  { %7926 = vpow2.f32 %v854_v19 }
 0x45a   :  { %v8865_v2 = vpop.eup %7922 }
 0x45b   :  { %v432_v62 = vsel %vm319_vm5, %v8865_v2, 0.0 }
 0x45e   :  { %v8871_v9 = vpop.eup %7924 }
 0x45f   :  { %v644_v57 = vsel %vm319_vm5, %v8871_v9, 0.0 }
 0x462   :  { %v8875_v43 = vpop.eup %7926 }
 0x463   :  { %v856_v30 = vsel %vm319_vm5, %v8875_v43, 0.0 }
 0x480   :  { %v1210_v54 = vpop.permute.xlu1 %1209 }
 0x481   :  { %v1212_v17 = vsel %vm319_vm5, %v1210_v54, 0.0 }
 0x482   :  { %1213 = vadd.xlane.f32.xlu1 %v1212_v17 }
 0x484   :  { %v1314_v29 = vpop.permute.xlu1 %1313 }
 0x485   :  { %v1316_v61 = vsel %vm319_vm5, %v1314_v29, 0.0 }
 0x486   :  { %1317 = vadd.xlane.f32.xlu0 %v1316_v61 }
 0x488   :  { %v1418_v38 = vpop.permute.xlu0 %1417 }
 0x489   :  { %v1420_v20 = vsel %vm319_vm5, %v1418_v38, 0.0 }
 0x48a   :  { %1421 = vadd.xlane.f32.xlu1 %v1420_v20 }
 0x48c   :  { %v1626_v51 = vpop.permute.xlu0 %1625  ;;  %v1522_v35 = vpop.permute.xlu1 %1521 }
 0x48d   :  { %v1628_v44 = vsel %vm319_vm5, %v1626_v51, 0.0  ;;  %v1524_v32 = vsel %vm319_vm5, %v1522_v35, 0.0 }
 0x48e   :  { %1629 = vadd.xlane.f32.xlu1 %v1628_v44  ;;  %1525 = vadd.xlane.f32.xlu0 %v1524_v32 }
 0x490   :  { %v1730_v49 = vpop.permute.xlu1 %1729 }
 0x491   :  { %v1732_v34 = vsel %vm319_vm5, %v1730_v49, 0.0 }
 0x492   :  { %1733 = vadd.xlane.f32.xlu0 %v1732_v34 }
 0x494   :  { %v1834_v6 = vpop.permute.xlu0 %1833 }
 0x495   :  { %v1836_v40 = vsel %vm319_vm5, %v1834_v6, 0.0 }
 0x496   :  { %1837 = vadd.xlane.f32.xlu1 %v1836_v40 }
 0x498   :  { %v1938_v5 = vpop.permute.xlu0 %1937 }
 0x499   :  { %v1940_v56 = vsel %vm319_vm5, %v1938_v5, 0.0 }
 0x49a   :  { %539 = vadd.xlane.f32.xlu1 %v538_v46  ;;  %1941 = vadd.xlane.f32.xlu0 %v1940_v56  ;;  %v10164_v56 = vmov 0.0  }
 0x49e   :  { %751 = vadd.xlane.f32.xlu1 %v750_v42  ;;  %433 = vadd.xlane.f32.xlu0 %v432_v62 }
 0x4a2   :  { %645 = vadd.xlane.f32.xlu0 %v644_v57 }
 0x4a6   :  { %857 = vadd.xlane.f32.xlu0 %v856_v30 }
 0x4cf   :  { %v958_v58 = vpop.xlane.xlu1 %957 }
 0x4d0   :  { %v959_v60 = vsub.f32 %v8746_v25, %v958_v58 }
 0x4d2   :  { %v960_v11 = vmul.f32 1.442695, %v959_v60  ;;  %v1064_v24 = vpop.xlane.xlu0 %1063 }
 0x4d3   :  { %v1065_v23 = vsub.f32 %v8836_v36, %v1064_v24 }
 0x4d4   :  { %7928 = vpow2.f32 %v960_v11 }
 0x4d5   :  { %v1066_v48 = vmul.f32 1.442695, %v1065_v23  ;;  %v328_v25 = vpop.xlane.xlu1 %327 }
 0x4d7   :  { %7930 = vpow2.f32 %v1066_v48 }
 0x4de   :  { %v8881_v50 = vpop.eup %7928 }
 0x4df   :  { %v962_v4 = vsel %vm319_vm5, %v8881_v50, 0.0 }
 0x4e0   :  { %963 = vadd.xlane.f32.xlu1 %v962_v4 }
 0x4e1   :  { %v8885_v54 = vpop.eup %7930 }
 0x4e2   :  { %v1068_v17 = vsel %vm319_vm5, %v8885_v54, 0.0 }
 0x4e3   :  { %1069 = vadd.xlane.f32.xlu0 %v1068_v17 }
 0x4f1   :  { %331 = vrot.lane.b32.xlu1 %v8602_v27, %s8400_s7 }
 0x4f5   :  { %543 = vrot.lane.b32.xlu1 %v8602_v27, %s8401_s3 }
 0x4f9   :  { %437 = vrot.lane.b32.xlu0 %v8602_v27, %s8402_s26  ;;  %649 = vrot.lane.b32.xlu1 %v8602_v27, %s8403_s1 }
 0x4fd   :  { %755 = vrot.lane.b32.xlu0 %v8602_v27, %s8404_s8  ;;  %861 = vrot.lane.b32.xlu1 %v8602_v27, %s8405_s27 }
 0x501   :  { %967 = vrot.lane.b32.xlu0 %v8602_v27, %s8406_s4  ;;  %1073 = vrot.lane.b32.xlu1 %v8602_v27, %s8407_s28 }
 0x505   :  { %1220 = vrot.lane.b32.xlu0 %v8586_v16, %s8400_s7 }
 0x509   :  { %1324 = vrot.lane.b32.xlu0 %v8586_v16, %s8402_s26  ;;  %s8415_s26 = smov 64  }
 0x50d   :  { %1428 = vrot.lane.b32.xlu0 %v8586_v16, %s8401_s3 }
 0x50f   :  { %v1214_v36 = vpop.xlane.xlu1 %1213 }
 0x510   :  { %7932 = vrcp.f32 %v1214_v36 }
 0x511   :  { %1532 = vrot.lane.b32.xlu0 %v8586_v16, %s8403_s1  ;;  %s10165_s1 = sld [smem:[#allocation10_spill]] }
 0x513   :  { %v1318_v18 = vpop.xlane.xlu0 %1317 }
 0x514   :  { %7934 = vrcp.f32 %v1318_v18 }
 0x515   :  { %1636 = vrot.lane.b32.xlu0 %v8586_v16, %s8404_s8 }
 0x517   :  { %v1422_v28 = vpop.xlane.xlu1 %1421 }
 0x518   :  { %7936 = vrcp.f32 %v1422_v28 }
 0x519   :  { %1740 = vrot.lane.b32.xlu0 %v8586_v16, %s8405_s27 }
 0x51a   :  { %v7933_v27 = vpop.eup %7932 }
 0x51b   :  { %v1526_v29 = vpop.xlane.xlu0 %1525  ;;  %v1630_v61 = vpop.xlane.xlu1 %1629  ;;  %v1216_v7 = vmul.f32 %v7933_v27, %v8798_v26 }
 0x51c   :  { %7938 = vrcp.f32 %v1526_v29 }
 0x51d   :  { %1844 = vrot.lane.b32.xlu0 %v8586_v16, %s8406_s4  ;;  %1218 = vrot.lane.b32.xlu1 %v1216_v7, %s8399_s30  ;;  %7940 = vrcp.f32 %v1630_v61 }
 0x51e   :  { %v7935_v53 = vpop.eup %7934 }
 0x51f   :  { %v1734_v37 = vpop.xlane.xlu0 %1733  ;;  %v1320_v38 = vmul.f32 %v7935_v53, %v8803_v47 }
 0x520   :  { %7942 = vrcp.f32 %v1734_v37 }
 0x521   :  { %1948 = vrot.lane.b32.xlu0 %v8586_v16, %s8407_s28  ;;  %1322 = vrot.lane.b32.xlu1 %v1320_v38, %s8399_s30 }
 0x522   :  { %v7937_v20 = vpop.eup %7936 }
 0x523   :  { %v1838_v21 = vpop.xlane.xlu1 %1837  ;;  %v1424_v22 = vmul.f32 %v7937_v20, %v8808_v55 }
 0x524   :  { %7944 = vrcp.f32 %v1838_v21 }
 0x525   :  { %1426 = vrot.lane.b32.xlu1 %v1424_v22, %s8399_s30 }
 0x526   :  { %v7939_v26 = vpop.eup %7938 }
 0x527   :  { %v1942_v33 = vpop.xlane.xlu0 %1941  ;;  %v1528_v51 = vmul.f32 %v7939_v26, %v8815_v52  ;;  %v7941_v35 = vpop.eup %7940 }
 0x528   :  { %7946 = vrcp.f32 %v1942_v33  ;;  %v1632_v16 = vmul.f32 %v7941_v35, %v8813_v15  ;;  %v540_v49 = vpop.xlane.xlu1 %539 }
 0x529   :  { %1530 = vrot.lane.b32.xlu1 %v1528_v51, %s8399_s30  ;;  %7948 = vrcp.f32 %v328_v25 }
 0x52a   :  { %v7943_v47 = vpop.eup %7942 }
 0x52b   :  { %v1736_v44 = vmul.f32 %v7943_v47, %v8821_v59  ;;  %v434_v13 = vpop.xlane.xlu0 %433 }
 0x52c   :  { %7950 = vrcp.f32 %v434_v13  ;;  %v752_v34 = vpop.xlane.xlu1 %751 }
 0x52d   :  { %1634 = vrot.lane.b32.xlu1 %v1632_v16, %s8399_s30  ;;  %7952 = vrcp.f32 %v540_v49 }
 0x52e   :  { %v7945_v32 = vpop.eup %7944  ;;  %7954 = vrcp.f32 %v752_v34 }
 0x52f   :  { %v1840_v55 = vmul.f32 %v7945_v32, %v8825_v8  ;;  %v646_v15 = vpop.xlane.xlu0 %645 }
 0x530   :  { %7956 = vrcp.f32 %v646_v15 }
 0x531   :  { %1738 = vrot.lane.b32.xlu1 %v1736_v44, %s8399_s30 }
 0x532   :  { %v7947_v31 = vpop.eup %7946 }
 0x533   :  { %v1944_v52 = vmul.f32 %v7947_v31, %v8829_v41  ;;  %v858_v59 = vpop.xlane.xlu0 %857  ;;  %v7949_v6 = vpop.eup %7948 }
 0x534   :  { %7958 = vrcp.f32 %v858_v59  ;;  %v330_v41 = vmul.f32 %v7949_v6, %v8842_v45 }
 0x535   :  { %1842 = vrot.lane.b32.xlu1 %v1840_v55, %s8399_s30 }
 0x536   :  { %v7951_v40 = vpop.eup %7950 }
 0x537   :  { %v7953_v46 = vpop.eup %7952  ;;  %v436_v62 = vmul.f32 %v7951_v40, %v8865_v2 }
 0x538   :  { %v7955_v57 = vpop.eup %7954  ;;  %v542_v58 = vmul.f32 %v7953_v46, %v8858_v39 }
 0x539   :  { %1946 = vrot.lane.b32.xlu1 %v1944_v52, %s8399_s30  ;;  %v754_v24 = vmul.f32 %v7955_v57, %v8860_v14  ;;  %s8414_s30 = smov 14   ;;  %v2059_v57 = vld [vmem:[%s10165_s1 + $0x8] sm:$0xff] }
 0x53a   :  { %v7957_v60 = vpop.eup %7956 }
 0x53b   :  { %v648_v39 = vmul.f32 %v7957_v60, %v8871_v9 }
 0x53e   :  { %v7959_v2 = vpop.eup %7958 }
 0x53f   :  { %v860_v14 = vmul.f32 %v7959_v2, %v8875_v43 }
 0x56d   :  { %v964_v19 = vpop.xlane.xlu1 %963 }
 0x56e   :  { %7960 = vrcp.f32 %v964_v19 }
 0x570   :  { %v1070_v8 = vpop.xlane.xlu0 %1069 }
 0x571   :  { %v332_v5 = vpop.permute.xlu1 %331  ;;  %7962 = vrcp.f32 %v1070_v8 }
 0x572   :  { %7098 = vmatpush3.msra.mxu0 %v332_v5 }
 0x573   :  { %7100 = vmatmul.mubr.msk.f32.vlgmr.msra.gmra.mrb[4].mxu0 %vm319_vm5, %v330_v41  ;;  %7107 = vmatprep.subr.mxu0 %v10164_v56 }
 0x574   :  { %v438_v42 = vpop.permute.xlu0 %437  ;;  %7109 = vmatprep.mubr.msk.f32.mxu0 %vm8381_vm1, %v10164_v56 }
 0x575   :  { %7103 = vmatpush3.msra.mxu1 %v438_v42  ;;  %v544_v30 = vpop.permute.xlu1 %543 }
 0x576   :  { %7105 = vmatmul.mubr.msk.f32.vlgmr.msra.gmra.mrb[0].mxu1 %vm319_vm5, %v436_v62  ;;  %7108 = vmatpush3.msra.mxu0 %v544_v30  ;;  %v2058_v62 = vld [vmem:[%s10165_s1] sm:$0xff] }
 0x577   :  { %7110 = vmatmul.mubr.msk.f32.vlgmr.msra.gmra.mrb[6].mxu0 %vm319_vm5, %v542_v58  ;;  %7117 = vmatprep.subr.mxu0 %v10164_v56  ;;  %v7210_v58 = vpack.c.bf16 %v2059_v57, %v2058_v62 }
 0x578   :  { %v756_v45 = vpop.permute.xlu0 %755  ;;  %7112 = vmatprep.subr.mxu1 %v10164_v56  ;;  %7114 = vmatprep.mubr.msk.f32.mxu1 %vm8381_vm1, %v10164_v56  ;;  %v7961_v23 = vpop.eup %7960 }
 0x579   :  { %7118 = vmatpush3.msra.mxu0 %v756_v45  ;;  %v650_v11 = vpop.permute.xlu1 %649  ;;  %7119 = vmatprep.mubr.msk.f32.mxu0 %vm8381_vm1, %v10164_v56  ;;  %v966_v9 = vmul.f32 %v7961_v23, %v8881_v50 }
 0x57a   :  { %7113 = vmatpush3.msra.mxu1 %v650_v11  ;;  %7127 = vmatprep.subr.mxu0 %v10164_v56 }
 0x57b   :  { %7115 = vmatmul.mubr.msk.f32.vlgmr.msra.gmra.mrb[2].mxu1 %vm319_vm5, %v648_v39  ;;  %7120 = vmatmul.mubr.msk.f32.vlgmr.msra.gmra.mrb[8].mxu0 %vm319_vm5, %v754_v24  ;;  %v7963_v17 = vpop.eup %7962 }
 0x57c   :  { %v968_v48 = vpop.permute.xlu0 %967  ;;  %7122 = vmatprep.subr.mxu1 %v10164_v56  ;;  %7124 = vmatprep.mubr.msk.f32.mxu1 %vm8381_vm1, %v10164_v56  ;;  %v1072_v43 = vmul.f32 %v7963_v17, %v8885_v54 }
 0x57d   :  { %7128 = vmatpush3.msra.mxu0 %v968_v48  ;;  %v862_v4 = vpop.permute.xlu1 %861  ;;  %7129 = vmatprep.mubr.msk.f32.mxu0 %vm8381_vm1, %v10164_v56 }
 0x57e   :  { %7123 = vmatpush3.msra.mxu1 %v862_v4  ;;  %7137 = vmatprep.subr.mxu0 %v10164_v56 }
 0x57f   :  { %7125 = vmatmul.mubr.msk.f32.vlgmr.msra.gmra.mrb[4].mxu1 %vm319_vm5, %v860_v14  ;;  %7130 = vmatmul.mubr.msk.f32.vlgmr.msra.gmra.mrb[10].mxu0 %vm319_vm5, %v966_v9 }
 0x580   :  { %v1221_v25 = vpop.permute.xlu0 %1220  ;;  %7132 = vmatprep.subr.mxu1 %v10164_v56  ;;  %7134 = vmatprep.mubr.msk.f32.mxu1 %vm8381_vm1, %v10164_v56 }
 0x581   :  { %7138 = vmatpush3.msra.mxu0 %v1221_v25  ;;  %v1074_v36 = vpop.permute.xlu1 %1073  ;;  %7139 = vmatprep.mubr.msk.f32.mxu0 %vm8381_vm1, %v10164_v56 }
 0x582   :  { %7133 = vmatpush3.msra.mxu1 %v1074_v36  ;;  %7147 = vmatprep.subr.mxu0 %v10164_v56 }
 0x583   :  { %7135 = vmatmul.mubr.msk.f32.vlgmr.msra.gmra.mrb[6].mxu1 %vm319_vm5, %v1072_v43  ;;  %7142 = vmatprep.subr.mxu1 %v10164_v56 }
 0x584   :  { %v1325_v50 = vpop.permute.xlu0 %1324  ;;  %7144 = vmatprep.mubr.msk.f32.mxu1 %vm8381_vm1, %v10164_v56 }
 0x585   :  { %7143 = vmatpush3.msra.mxu1 %v1325_v50 }
 0x586   :  { %7152 = vmatprep.subr.mxu1 %v10164_v56 }
 0x588   :  { %v1429_v18 = vpop.permute.xlu0 %1428 }
 0x58c   :  { %v1533_v28 = vpop.permute.xlu0 %1532 }
 0x58f   :  { %v1219_v54 = vpop.permute.xlu1 %1218 }
 0x590   :  { %7140 = vmatmul.mubr.msk.f32.vlgmr.msra.gmra.mrb[12].mxu0 %vm319_vm5, %v1219_v54  ;;  %v1637_v27 = vpop.permute.xlu0 %1636 }
 0x591   :  { %7148 = vmatpush3.msra.mxu0 %v1429_v18  ;;  %7149 = vmatprep.mubr.msk.f32.mxu0 %vm8381_vm1, %v10164_v56 }
 0x592   :  { %7157 = vmatprep.subr.mxu0 %v10164_v56 }
 0x593   :  { %v1323_v29 = vpop.permute.xlu1 %1322 }
 0x594   :  { %7145 = vmatmul.mubr.msk.f32.vlgmr.msra.gmra.mrb[8].mxu1 %vm319_vm5, %v1323_v29  ;;  %v1741_v7 = vpop.permute.xlu0 %1740 }
 0x595   :  { %7153 = vmatpush3.msra.mxu1 %v1533_v28  ;;  %7154 = vmatprep.mubr.msk.f32.mxu1 %vm8381_vm1, %v10164_v56 }
 0x596   :  { %7162 = vmatprep.subr.mxu1 %v10164_v56 }
 0x597   :  { %v1427_v61 = vpop.permute.xlu1 %1426 }
 0x598   :  { %7150 = vmatmul.mubr.msk.f32.vlgmr.msra.gmra.mrb[14].mxu0 %vm319_vm5, %v1427_v61  ;;  %v1845_v37 = vpop.permute.xlu0 %1844 }
 0x599   :  { %7158 = vmatpush3.msra.mxu0 %v1637_v27  ;;  %7159 = vmatprep.mubr.msk.f32.mxu0 %vm8381_vm1, %v10164_v56 }
 0x59a   :  { %7167 = vmatprep.subr.mxu0 %v10164_v56 }
 0x59b   :  { %v1531_v53 = vpop.permute.xlu1 %1530 }
 0x59c   :  { %7155 = vmatmul.mubr.msk.f32.vlgmr.msra.gmra.mrb[10].mxu1 %vm319_vm5, %v1531_v53  ;;  %v1949_v21 = vpop.permute.xlu0 %1948 }
 0x59d   :  { %7163 = vmatpush3.msra.mxu1 %v1741_v7  ;;  %7164 = vmatprep.mubr.msk.f32.mxu1 %vm8381_vm1, %v10164_v56 }
 0x59e   :  { %7172 = vmatprep.subr.mxu1 %v10164_v56 }
 0x59f   :  { %v1635_v38 = vpop.permute.xlu1 %1634 }
 0x5a0   :  { %7160 = vmatmul.mubr.msk.f32.vlgmr.msra.gmra.mrb[16].mxu0 %vm319_vm5, %v1635_v38 }
 0x5a1   :  { %7168 = vmatpush3.msra.mxu0 %v1845_v37  ;;  %7169 = vmatprep.mubr.msk.f32.mxu0 %vm8381_vm1, %v10164_v56 }
 0x5a2   :  { %7211 = vmatprep.subr.bf16.mxu0 %v7210_v58 }
 0x5a3   :  { %v1739_v20 = vpop.permute.xlu1 %1738 }
 0x5a4   :  { %7165 = vmatmul.mubr.msk.f32.vlgmr.msra.gmra.mrb[12].mxu1 %vm319_vm5, %v1739_v20 }
 0x5a5   :  { %7173 = vmatpush3.msra.mxu1 %v1949_v21  ;;  %7174 = vmatprep.mubr.msk.f32.mxu1 %vm8381_vm1, %v10164_v56 }
 0x5a7   :  { %v1843_v22 = vpop.permute.xlu1 %1842 }
 0x5a8   :  { %7170 = vmatmul.mubr.msk.f32.vlgmr.msra.gmra.mrb[18].mxu0 %vm319_vm5, %v1843_v22 }
 0x5a9   :  { %7213 = vmatpush3.bf16.msra.mxu0 %v7210_v58 }
 0x5ab   :  { %v1947_v26 = vpop.permute.xlu1 %1946 }
 0x5ac   :  { %7175 = vmatmul.mubr.msk.f32.vlgmr.msra.gmra.mrb[14].mxu1 %vm319_vm5, %v1947_v26 }
 0x5ad   :  { %2295 = vmatprep.mubr.f32.mxu1 %v10164_v56 }
 0x646   :  { %v8990_v33 = vpop.f32.mrb[4].mxu0 }
 0x647   :  { %v7101_v51 = vpop.f32.mrb[5].mxu0 }
 0x649   :  { %v509_v35 = vpop.f32.mrb[0].mxu1 }
 0x64a   :  { %1150 = vrot.lane.b32.xlu0 %v509_v35, %s8408_s9  ;;  %v7106_v16 = vpop.f32.mrb[1].mxu1  ;;  %v615_v47 = vpop.f32.mrb[6].mxu0 }
 0x64b   :  { %1154 = vrot.lane.b32.xlu1 %v615_v47, %s8409_s5  ;;  %v7111_v44 = vpop.f32.mrb[7].mxu0 }
 0x64e   :  { %v721_v32 = vpop.f32.mrb[2].mxu1  ;;  %v827_v55 = vpop.f32.mrb[8].mxu0 }
 0x64f   :  { %v7121_v31 = vpop.f32.mrb[9].mxu0  ;;  %1158 = vrot.lane.b32.xlu1 %v721_v32, %s8410_s0  ;;  %v7116_v52 = vpop.f32.mrb[3].mxu1 }
 0x652   :  { %v933_v13 = vpop.f32.mrb[4].mxu1  ;;  %v1039_v49 = vpop.f32.mrb[10].mxu0 }
 0x653   :  { %v7131_v15 = vpop.f32.mrb[11].mxu0  ;;  %1162 = vrot.lane.b32.xlu1 %v827_v55, %s8411_s29  ;;  %v7126_v34 = vpop.f32.mrb[5].mxu1 }
 0x656   :  { %v1145_v59 = vpop.f32.mrb[6].mxu1 }
 0x657   :  { %1166 = vrot.lane.b32.xlu1 %v933_v13, %s8412_s2  ;;  %v7136_v19 = vpop.f32.mrb[7].mxu1 }
 0x65b   :  { %1170 = vrot.lane.b32.xlu1 %v1039_v49, %s8413_s6 }
 0x65f   :  { %1174 = vrot.lane.b32.xlu1 %v1145_v59, %s8414_s30 }
 0x663   :  { %v1291_v6 = vpop.f32.mrb[12].mxu0 }
 0x664   :  { %v7141_v8 = vpop.f32.mrb[13].mxu0 }
 0x667   :  { %v1395_v40 = vpop.f32.mrb[8].mxu1 }
 0x668   :  { %2024 = vrot.lane.b32.xlu0 %v1395_v40, %s8408_s9  ;;  %v7146_v5 = vpop.f32.mrb[9].mxu1  ;;  %s10166_s9 = sld [smem:[#allocation11_spill]] }
 0x66b   :  { %v1499_v41 = vpop.f32.mrb[14].mxu0 }
 0x66c   :  { %2028 = vrot.lane.b32.xlu0 %v1499_v41, %s8409_s5  ;;  %v7151_v46 = vpop.f32.mrb[15].mxu0 }
 0x66e   :  { %v6843_v32 = vld [vmem:[%s10166_s9] ss:$0 sm:$0xff]  ;;  %s10168_s9 = sld [smem:[#allocation12_spill]] }
 0x66f   :  { %v1603_v42 = vpop.f32.mrb[10].mxu1 }
 0x670   :  { %2032 = vrot.lane.b32.xlu0 %v1603_v42, %s8410_s0  ;;  %v7156_v30 = vpop.f32.mrb[11].mxu1 }
 0x673   :  { %v1707_v60 = vpop.f32.mrb[16].mxu0 }
 0x674   :  { %2036 = vrot.lane.b32.xlu0 %v1707_v60, %s8411_s29  ;;  %v7161_v45 = vpop.f32.mrb[17].mxu0  ;;  %s10167_s29 = sld [smem:[#allocation14_spill]] }
 0x677   :  { %v1811_v2 = vpop.f32.mrb[12].mxu1 }
 0x678   :  { %2040 = vrot.lane.b32.xlu0 %v1811_v2, %s8412_s2  ;;  %v7166_v11 = vpop.f32.mrb[13].mxu1  ;;  %s10169_s2 = sld [smem:[#allocation13_spill]] }
 0x67a   :  { %v2200_v57 = vld [vmem:[%s10167_s29 + $0x28] sm:$0xff]  ;;  %v2195_v30 = vld [vmem:[%s10167_s29] sm:$0xff]  ;;  %v2198_v45 = vld [vmem:[%s10167_s29 + $0x18] sm:$0xff] }
 0x67b   :  { %v1915_v39 = vpop.f32.mrb[18].mxu0  ;;  %v2199_v60 = vld [vmem:[%s10167_s29 + $0x20] sm:$0xff]  ;;  %v2202_v2 = vld [vmem:[%s10167_s29 + $0x38] sm:$0xff] }
 0x67c   :  { %2044 = vrot.lane.b32.xlu0 %v1915_v39, %s8413_s6  ;;  %v7171_v24 = vpop.f32.mrb[19].mxu0  ;;  %v7216_v11 = vpack.c.bf16 %v2199_v60, %v2195_v30  ;;  %v7218_v39 = vpack.c.bf16 %v2202_v2, %v2198_v45  ;;  %v2430_v30 = vld [vmem:[%s10129_s11 + $0x128] sm:$0xff]  ;;  %v2416_v60 = vld [vmem:[%s10129_s11 + $0xb8] sm:$0xff]  ;;  %v2447_v45 = vld [vmem:[%s10129_s11 + $0x1b0] sm:$0xff] }
 0x67d   :  { %v2197_v24 = vld [vmem:[%s10167_s29 + $0x10] sm:$0xff]  ;;  %v2448_v2 = vld [vmem:[%s10129_s11 + $0x1b8] sm:$0xff] }
 0x67e   :  { %7219 = vmatprep.subr.bf16.mxu0 %v7218_v39 }
 0x67f   :  { %v2019_v23 = vpop.f32.mrb[14].mxu1 }
 0x680   :  { %2048 = vrot.lane.b32.xlu1 %v2019_v23, %s8414_s30  ;;  %v7176_v48 = vpop.f32.mrb[15].mxu1  ;;  %v2201_v23 = vld [vmem:[%s10167_s29 + $0x30] sm:$0xff] }
 0x681   :  { %v7220_v48 = vpack.c.bf16 %v2201_v23, %v2197_v24  ;;  %v2399_v24 = vld [vmem:[%s10129_s11 + $0x30] sm:$0xff]  ;;  %v2400_v23 = vld [vmem:[%s10129_s11 + $0x38] sm:$0xff] }
 0x6bc   :  { %v1151_v17 = vpop.permute.xlu0 %1150 }
 0x6bd   :  { %v1155_v4 = vpop.permute.xlu1 %1154  ;;  %v1178_v36 = vsel %vm1177_vm6, %v8990_v33, %v1151_v17 }
 0x6be   :  { %v1180_v43 = vsel %vm1179_vm7, %v1178_v36, %v1155_v4  ;;  %v2409_v4 = vld [vmem:[%s10129_s11 + $0x80] sm:$0xff] }
 0x6c1   :  { %v1159_v14 = vpop.permute.xlu1 %1158 }
 0x6c2   :  { %v1182_v18 = vsel %vm1181_vm8, %v1180_v43, %v1159_v14  ;;  %v2410_v14 = vld [vmem:[%s10129_s11 + $0x88] sm:$0xff] }
 0x6c3   :  { %v7222_v17 = vpack.c.bf16 %v2410_v14, %v2409_v4  ;;  %v7266_v4 = vpack.c.bf16 %v2448_v2, %v2447_v45  ;;  %v2431_v14 = vld [vmem:[%s10129_s11 + $0x130] sm:$0xff]  ;;  %v2440_v2 = vld [vmem:[%s10129_s11 + $0x178] sm:$0xff] }
 0x6c5   :  { %v1163_v9 = vpop.permute.xlu1 %1162 }
 0x6c6   :  { %v1183_v28 = vsel %vm319_vm5, %v1182_v18, %v1163_v9  ;;  %v2441_v9 = vld [vmem:[%s10129_s11 + $0x180] sm:$0xff] }
 0x6c9   :  { %v1167_v25 = vpop.permute.xlu1 %1166 }
 0x6ca   :  { %v1185_v54 = vsel %vm1184_vm9, %v1183_v28, %v1167_v25  ;;  %v2442_v25 = vld [vmem:[%s10129_s11 + $0x188] sm:$0xff] }
 0x6cb   :  { %v7254_v36 = vpack.c.bf16 %v2442_v25, %v2441_v9  ;;  %v2432_v9 = vld [vmem:[%s10129_s11 + $0x138] sm:$0xff]  ;;  %v2418_v25 = vld [vmem:[%s10129_s11 + $0xc8] sm:$0xff] }
 0x6cd   :  { %v1171_v50 = vpop.permute.xlu1 %1170 }
 0x6ce   :  { %v1187_v27 = vsel %vm1186_vm10, %v1185_v54, %v1171_v50 }
 0x6d1   :  { %v1175_v29 = vpop.permute.xlu1 %1174 }
 0x6d2   :  { %v1189_v61 = vsel %vm1188_vm11, %v1187_v27, %v1175_v29 }
 0x6d3   :  { %7181 = vmatprep.mubr.msk.f32.mxu0 %vm180_vm3, %v1189_v61  ;;  %v6846_v61 = vld [vmem:[%s10168_s9] ss:$0 sm:$0xff] }
 0x6da   :  { %v2025_v7 = vpop.permute.xlu0 %2024 }
 0x6db   :  { %v2051_v21 = vsel %vm1177_vm6, %v1291_v6, %v2025_v7 }
 0x6de   :  { %v2029_v53 = vpop.permute.xlu0 %2028 }
 0x6df   :  { %v2052_v22 = vsel %vm1179_vm7, %v2051_v21, %v2029_v53  ;;  %v6847_v53 = vld [vmem:[%s10169_s2] ss:$0 sm:$0xff]  ;;  %v2426_v21 = vld [vmem:[%s10129_s11 + $0x108] sm:$0xff] }
 0x6e2   :  { %v2033_v37 = vpop.permute.xlu0 %2032 }
 0x6e3   :  { %v2053_v26 = vsel %vm1181_vm8, %v2052_v22, %v2033_v37  ;;  %v2393_v37 = vld [vmem:[%s10129_s11] sm:$0xff]  ;;  %v2411_v22 = vld [vmem:[%s10129_s11 + $0x90] sm:$0xff] }
 0x6e6   :  { %v2037_v38 = vpop.permute.xlu0 %2036 }
 0x6e7   :  { %v2054_v51 = vsel %vm319_vm5, %v2053_v26, %v2037_v38  ;;  %v2394_v38 = vld [vmem:[%s10129_s11 + $0x8] sm:$0xff] }
 0x6ea   :  { %v2041_v20 = vpop.permute.xlu0 %2040 }
 0x6eb   :  { %v2055_v35 = vsel %vm1184_vm9, %v2054_v51, %v2041_v20  ;;  %v2425_v20 = vld [vmem:[%s10129_s11 + $0x100] sm:$0xff]  ;;  %v2443_v51 = vld [vmem:[%s10129_s11 + $0x190] sm:$0xff] }
 0x6ee   :  { %v2045_v33 = vpop.permute.xlu0 %2044 }
 0x6ef   :  { %v2056_v16 = vsel %vm1186_vm10, %v2055_v35, %v2045_v33  ;;  %v2412_v33 = vld [vmem:[%s10129_s11 + $0x98] sm:$0xff] }
 0x6f0   :  { %v2444_v35 = vld [vmem:[%s10129_s11 + $0x198] sm:$0xff] }
 0x6f2   :  { %v2049_v47 = vpop.permute.xlu1 %2048 }
 0x6f3   :  { %v2057_v44 = vsel %vm1188_vm11, %v2056_v16, %v2049_v47 }
 0x6f4   :  { %7182 = vmatmul.mubr.msk.f32.vlgmr.msra.gmra.mrb[20].mxu0 %vm180_vm3, %v2057_v44 }
 0x6f5   :  { %2372 = vmatprep.mubr.f32.mxu0 %v10164_v56  ;;  %7221 = vmatpush1.bf16.msra.mxu0 %v7220_v48 }
 0x6f6   :  { %7255 = vmatprep.subr.bf16.mxu0 %v7254_v36  ;;  %v2449_v36 = vld [vmem:[%s10129_s11 + $0x1c0] sm:$0xff] }
 0x7c7   :  { %v7183_v55 = vpop.f32.mrb[20].mxu0 }
 0x7c8   :  { %v2145_v31 = vadd.f32 %v7183_v55, %v6843_v32  ;;  %v2139_v52 = vpop.f32.mrb[21].mxu0  ;;  %v7256_v55 = vpack.c.bf16 %v2426_v21, %v2425_v20  ;;  %v2452_v20 = vld [vmem:[%s10129_s11 + $0x1d8] sm:$0xff] }
 0x7c9   :  { %v2140_v13 = vadd.f32 %v6843_v32, %v2139_v52  ;;  %v7224_v32 = vpack.c.bf16 %v2394_v38, %v2393_v37  ;;  %v2396_v52 = vld [vmem:[%s10129_s11 + $0x18] sm:$0xff]  ;;  %v2451_v38 = vld [vmem:[%s10129_s11 + $0x1d0] sm:$0xff] }
 0x7ca   :  { %v2149_v49 = vadd.f32 %v2145_v31, %v8577_v12  ;;  %v2395_v31 = vld [vmem:[%s10129_s11 + $0x10] sm:$0xff]  ;;  %v2420_v37 = vld [vmem:[%s10129_s11 + $0xd8] sm:$0xff] }
 0x7cb   :  { %v2148_v15 = vadd.f32 %v2140_v13, %v8571_v10  ;;  %v2196_v10 = vld [vmem:[%s10167_s29 + $0x8] sm:$0xff]  ;;  %v7226_v13 = vpack.c.bf16 %v2412_v33, %v2411_v22  ;;  %v2404_v33 = vld [vmem:[%s10129_s11 + $0x58] sm:$0xff] }
 0x7cc   :  { %v2155_v34 = vsel %vm180_vm3, %v2149_v49, 0.0  ;;  %v7214_v58 = vpack.c.bf16 %v2200_v57, %v2196_v10  ;;  %v2429_v57 = vld [vmem:[%s10129_s11 + $0x120] sm:$0xff] }
 0x7cd   :  { %2156 = vadd.xlane.f32.xlu1 %v2155_v34  ;;  %v2152_v59 = vsel %vm180_vm3, %v2148_v15, 0.0  ;;  %v2428_v34 = vld [vmem:[%s10129_s11 + $0x118] sm:$0xff]  ;;  %v7264_v39 = vpack.c.bf16 %v2430_v30, %v2429_v57  ;;  %v2407_v30 = vld [vmem:[%s10129_s11 + $0x70] sm:$0xff] }
 0x7ce   :  { %2153 = vadd.xlane.f32.xlu0 %v2152_v59  ;;  %7215 = vmatprep.subr.bf16.mxu1 %v7214_v58  ;;  %v2413_v59 = vld [vmem:[%s10129_s11 + $0xa0] sm:$0xff]  ;;  %v2415_v58 = vld [vmem:[%s10129_s11 + $0xb0] sm:$0xff] }
 0x7cf   :  { %7217 = vmatpush1.bf16.msra.mxu1 %v7216_v11  ;;  %v7234_v48 = vpack.c.bf16 %v2416_v60, %v2415_v58  ;;  %v2408_v58 = vld [vmem:[%s10129_s11 + $0x78] sm:$0xff]  ;;  %v2439_v60 = vld [vmem:[%s10129_s11 + $0x170] sm:$0xff] }
 0x7d0   :  { %7223 = vmatprep.subr.bf16.mxu1 %v7222_v17  ;;  %v2417_v17 = vld [vmem:[%s10129_s11 + $0xc0] sm:$0xff]  ;;  %v7252_v45 = vpack.c.bf16 %v2408_v58, %v2407_v30 }
 0x85a   :  { %v2157_v19 = vpop.xlane.xlu1 %2156 }
 0x85b   :  { %v2160_v6 = vmul.f32 0.0625, %v2157_v19  ;;  %v2154_v8 = vpop.xlane.xlu0 %2153 }
 0x85c   :  { %v2159_v40 = vmul.f32 0.0625, %v2154_v8  ;;  %v2445_v8 = vld [vmem:[%s10129_s11 + $0x1a0] sm:$0xff] }
 0x85d   :  { %v2162_v5 = vsub.f32 %v2149_v49, %v2160_v6  ;;  %v7258_v49 = vpack.c.bf16 %v2444_v35, %v2443_v51  ;;  %v2414_v6 = vld [vmem:[%s10129_s11 + $0xa8] sm:$0xff]  ;;  %v7274_v35 = vpack.c.bf16 %v2452_v20, %v2451_v38 }
 0x85e   :  { %v2161_v41 = vsub.f32 %v2148_v15, %v2159_v40  ;;  %v2427_v15 = vld [vmem:[%s10129_s11 + $0x110] sm:$0xff]  ;;  %v2446_v40 = vld [vmem:[%s10129_s11 + $0x1a8] sm:$0xff] }
 0x85f   :  { %v2164_v62 = vmul.f32 %v2162_v5, %v2162_v5  ;;  %v7262_v10 = vpack.c.bf16 %v2446_v40, %v2445_v8  ;;  %v2438_v40 = vld [vmem:[%s10129_s11 + $0x168] sm:$0xff] }
 0x860   :  { %v2163_v46 = vmul.f32 %v2161_v41, %v2161_v41 }
 0x861   :  { %v2168_v12 = vsel %vm180_vm3, %v2164_v62, 0.0  ;;  %v2398_v62 = vld [vmem:[%s10129_s11 + $0x28] sm:$0xff] }
 0x862   :  { %v2165_v42 = vsel %vm180_vm3, %v2163_v46, 0.0  ;;  %v7260_v46 = vpack.c.bf16 %v2428_v34, %v2427_v15 }
 0x863   :  { %2166 = vadd.xlane.f32.xlu0 %v2165_v42  ;;  %v2397_v42 = vld [vmem:[%s10129_s11 + $0x20] sm:$0xff] }
 0x864   :  { %v7232_v11 = vpack.c.bf16 %v2398_v62, %v2397_v42 }
 0x867   :  { %2169 = vadd.xlane.f32.xlu0 %v2168_v12  ;;  %v7230_v12 = vpack.c.bf16 %v2414_v6, %v2413_v59  ;;  %v2405_v59 = vld [vmem:[%s10129_s11 + $0x60] sm:$0xff] }
 0x868   :  { %v2437_v6 = vld [vmem:[%s10129_s11 + $0x160] sm:$0xff] }
 0x869   :  { %v7280_v42 = vpack.c.bf16 %v2438_v40, %v2437_v6 }
 0x8f0   :  { %v2167_v43 = vpop.xlane.xlu0 %2166 }
 0x8f1   :  { %v2171_v50 = vmul.f32 0.0625, %v2167_v43  ;;  %v2450_v43 = vld [vmem:[%s10129_s11 + $0x1c8] sm:$0xff] }
 0x8f3   :  { %v2173_v18 = vadd.f32 1e-05, %v2171_v50  ;;  %v7236_v50 = vpack.c.bf16 %v2400_v23, %v2399_v24 }
 0x8f4   :  { %v2170_v28 = vpop.xlane.xlu0 %2169 }
 0x8f5   :  { %7964 = vrsqrt.f32 %v2173_v18  ;;  %v2172_v54 = vmul.f32 0.0625, %v2170_v28  ;;  %v7268_v18 = vpack.c.bf16 %v2432_v9, %v2431_v14  ;;  %v2401_v28 = vld [vmem:[%s10129_s11 + $0x40] sm:$0xff] }
 0x8f7   :  { %v2174_v27 = vadd.f32 1e-05, %v2172_v54  ;;  %v2402_v54 = vld [vmem:[%s10129_s11 + $0x48] sm:$0xff] }
 0x8f8   :  { %v7240_v21 = vpack.c.bf16 %v2402_v54, %v2401_v28 }
 0x8f9   :  { %7966 = vrsqrt.f32 %v2174_v27  ;;  %v7238_v27 = vpack.c.bf16 %v2418_v25, %v2417_v17 }
 0x8ff   :  { %v7965_v29 = vpop.eup %7964 }
 0x900   :  { %v2177_v7 = vmul.f32 %v7965_v29, %v2161_v41  ;;  %v7228_v41 = vpack.c.bf16 %v2396_v52, %v2395_v31  ;;  %v7270_v29 = vpack.c.bf16 %v2450_v43, %v2449_v36  ;;  %v2453_v31 = vld [vmem:[%s10129_s11 + $0x1e0] sm:$0xff]  ;;  %v2454_v52 = vld [vmem:[%s10129_s11 + $0x1e8] sm:$0xff] }
 0x901   :  { %v7278_v34 = vpack.c.bf16 %v2454_v52, %v2453_v31 }
 0x902   :  { %v2185_v26 = vmul.f32 %v6846_v61, %v2177_v7  ;;  %v2434_v7 = vld [vmem:[%s10129_s11 + $0x148] sm:$0xff] }
 0x903   :  { %v7967_v16 = vpop.eup %7966 }
 0x904   :  { %v9091_v47 = vadd.f32 %v6847_v53, %v2185_v26  ;;  %v2178_v44 = vmul.f32 %v7967_v16, %v2162_v5  ;;  %v2403_v26 = vld [vmem:[%s10129_s11 + $0x50] sm:$0xff] }
 0x905   :  { %v2435_v16 = vld [vmem:[%s10129_s11 + $0x150] sm:$0xff] }
 0x906   :  { %6848 = vmatmul.mubr.msk.f32.vlgmr.msra.gmra.mrb[16].mxu1 %vm180_vm3, %v9091_v47  ;;  %6850 = vmatmul.mubr.msk.f32.vlgmr.msra.gmra.mrb[22].mxu0 %vm180_vm3, %v9091_v47  ;;  %v2186_v19 = vmul.f32 %v6846_v61, %v2178_v44  ;;  %v2433_v61 = vld [vmem:[%s10129_s11 + $0x140] sm:$0xff]  ;;  %v2436_v44 = vld [vmem:[%s10129_s11 + $0x158] sm:$0xff] }
 0x907   :  { %2301 = vmatprep.mubr.f32.mxu1 %v10164_v56  ;;  %2378 = vmatprep.mubr.f32.mxu0 %v10164_v56  ;;  %v7272_v22 = vpack.c.bf16 %v2434_v7, %v2433_v61 }
 0x908   :  { %v9123_v5 = vadd.f32 %v6847_v53, %v2186_v19  ;;  %7225 = vmatpush3.bf16.msra.mxu1 %v7224_v32  ;;  %7257 = vmatpush3.bf16.msra.mxu0 %v7256_v55  ;;  %v2419_v53 = vld [vmem:[%s10129_s11 + $0xd0] sm:$0xff]  ;;  %v2421_v32 = vld [vmem:[%s10129_s11 + $0xe0] sm:$0xff]  ;;  %v2422_v55 = vld [vmem:[%s10129_s11 + $0xe8] sm:$0xff] }
 0x909   :  { %7227 = vmatprep.subr.bf16.mxu1 %v7226_v13  ;;  %7259 = vmatprep.subr.bf16.mxu0 %v7258_v49  ;;  %v7242_v51 = vpack.c.bf16 %v2420_v37, %v2419_v53  ;;  %v7244_v13 = vpack.c.bf16 %v2404_v33, %v2403_v26  ;;  %v7276_v49 = vpack.c.bf16 %v2436_v44, %v2435_v16  ;;  %v2406_v19 = vld [vmem:[%s10129_s11 + $0x68] sm:$0xff]  ;;  %v6852_v16 = vld [vmem:[%s10130_s12] ss:$0 sm:$0xff] }
 0x90a   :  { %6849 = vmatmul.mubr.msk.f32.gmra.mrb[18].mxu1 %vm180_vm3, %v9123_v5  ;;  %6851 = vmatmul.mubr.msk.f32.gmra.mrb[24].mxu0 %vm180_vm3, %v9123_v5  ;;  %v7246_v15 = vpack.c.bf16 %v2422_v55, %v2421_v32  ;;  %v7248_v8 = vpack.c.bf16 %v2406_v19, %v2405_v59 }
 0x90c   :  { %7229 = vmatpush3.bf16.msra.mxu1 %v7228_v41  ;;  %7261 = vmatpush3.bf16.msra.mxu0 %v7260_v46  ;;  %v2423_v41 = vld [vmem:[%s10129_s11 + $0xf0] sm:$0xff]  ;;  %v2424_v46 = vld [vmem:[%s10129_s11 + $0xf8] sm:$0xff] }
 0x90d   :  { %7231 = vmatprep.subr.bf16.mxu1 %v7230_v12  ;;  %7263 = vmatprep.subr.bf16.mxu0 %v7262_v10  ;;  %v7250_v62 = vpack.c.bf16 %v2424_v46, %v2423_v41  ;;  %v2455_v12 = vld [vmem:[%s10129_s11 + $0x1f0] sm:$0xff]  ;;  %v2456_v10 = vld [vmem:[%s10129_s11 + $0x1f8] sm:$0xff] }
 0x90e   :  { %v7282_v57 = vpack.c.bf16 %v2456_v10, %v2455_v12 }
 0x910   :  { %7233 = vmatpush3.bf16.msra.mxu1 %v7232_v11  ;;  %7265 = vmatpush3.bf16.msra.mxu0 %v7264_v39  ;;  %v7284_v11 = vpack.c.bf16 %v2440_v2, %v2439_v60  ;;  %v2203_v39 = vld [vmem:[%s10128_s10] sm:$0xf] }
 0x911   :  { %7235 = vmatprep.subr.bf16.mxu1 %v7234_v48  ;;  %7267 = vmatprep.subr.bf16.mxu0 %v7266_v4  ;;  %v2208_v24 = vrot.slane %v2203_v39, %v8663_v63  ;;  %v2216_v23 = vrot.slane %v2203_v39, %v8669_v1  ;;  %v2212_v48 = vrot.slane %v2203_v39, %v8666_v0 }
 0x912   :  { %v2220_v4 = vrot.slane %v2203_v39, %v8672_v3  ;;  %v2695_v39 = vld [vmem:[%s10134_s16 + $0x18] sm:$0xff] }
 0x914   :  { %7237 = vmatpush3.bf16.msra.mxu1 %v7236_v50  ;;  %7269 = vmatpush3.bf16.msra.mxu0 %v7268_v18 }
 0x915   :  { %7239 = vmatprep.subr.bf16.mxu1 %v7238_v27  ;;  %7271 = vmatprep.subr.bf16.mxu0 %v7270_v29 }
 0x918   :  { %7241 = vmatpush3.bf16.msra.mxu1 %v7240_v21  ;;  %7273 = vmatpush3.bf16.msra.mxu0 %v7272_v22 }
 0x919   :  { %7243 = vmatprep.subr.bf16.mxu1 %v7242_v51  ;;  %7275 = vmatprep.subr.bf16.mxu0 %v7274_v35 }
 0x91c   :  { %7245 = vmatpush3.bf16.msra.mxu1 %v7244_v13  ;;  %7277 = vmatpush3.bf16.msra.mxu0 %v7276_v49 }
 0x91d   :  { %7247 = vmatprep.subr.bf16.mxu1 %v7246_v15  ;;  %7279 = vmatprep.subr.bf16.mxu0 %v7278_v34 }
 0x920   :  { %7249 = vmatpush3.bf16.msra.mxu1 %v7248_v8  ;;  %7281 = vmatpush3.bf16.msra.mxu0 %v7280_v42 }
 0x921   :  { %7251 = vmatprep.subr.bf16.mxu1 %v7250_v62  ;;  %7283 = vmatprep.subr.bf16.mxu0 %v7282_v57 }
 0x924   :  { %7253 = vmatpush3.bf16.msra.mxu1 %v7252_v45  ;;  %7285 = vmatpush3.bf16.msra.mxu0 %v7284_v11  ;;  %v2693_v11 = vld [vmem:[%s10134_s16 + $0x8] sm:$0xff] }
 0x9d9   :  { %v2297_v14 = vpop.f32.mrb[16].mxu1  ;;  %v2374_v9 = vpop.f32.mrb[22].mxu0 }
 0x9da   :  { %v2298_v17 = vadd.f32 %v2297_v14, %v2208_v24  ;;  %v2375_v25 = vadd.f32 %v2374_v9, %v2216_v23  ;;  %v2299_v36 = vpop.f32.mrb[17].mxu1  ;;  %v2376_v43 = vpop.f32.mrb[23].mxu0  ;;  %v2699_v14 = vld [vmem:[%s10134_s16 + $0x38] sm:$0xff] }
 0x9db   :  { %v2300_v50 = vadd.f32 %v2299_v36, %v2212_v48  ;;  %v2377_v18 = vadd.f32 %v2376_v43, %v2220_v4  ;;  %v2698_v36 = vld [vmem:[%s10134_s16 + $0x30] sm:$0xff]  ;;  %v2709_v43 = vld [vmem:[%s10133_s15 + $0x8] sm:$0xff] }
 0x9dc   :  { %v2385_v61 = vmax.f32 %v2298_v17, 0.0  ;;  %v2387_v7 = vmax.f32 %v2375_v25, 0.0  ;;  %v2696_v25 = vld [vmem:[%s10134_s16 + $0x20] sm:$0xff] }
 0x9dd   :  { %v2386_v28 = vmax.f32 %v2300_v50, 0.0  ;;  %v2388_v54 = vmax.f32 %v2377_v18, 0.0  ;;  %v2303_v27 = vpop.f32.mrb[18].mxu1  ;;  %v2380_v29 = vpop.f32.mrb[24].mxu0  ;;  %v2711_v50 = vld [vmem:[%s10133_s15 + $0x18] sm:$0xff]  ;;  %v2708_v18 = vld [vmem:[%s10133_s15] sm:$0xff] }
 0x9de   :  { %v2304_v53 = vadd.f32 %v2303_v27, %v2208_v24  ;;  %v2381_v1 = vadd.f32 %v2380_v29, %v2216_v23  ;;  %v2305_v37 = vpop.f32.mrb[19].mxu1  ;;  %v2382_v38 = vpop.f32.mrb[25].mxu0  ;;  %v2692_v24 = vld [vmem:[%s10134_s16] sm:$0xff]  ;;  %v9296_v23 = vpack.c.bf16 %v2695_v39, %v2693_v11  ;;  %v7286_v27 = vpack.c.bf16 %v2711_v50, %v2709_v43 }
 0x9df   :  { %v2306_v20 = vadd.f32 %v2305_v37, %v2212_v48  ;;  %v2383_v3 = vadd.f32 %v2382_v38, %v2220_v4  ;;  %2528 = vmatprep.mubr.f32.mxu1 %v2386_v28  ;;  %2603 = vmatprep.mubr.f32.mxu0 %v2388_v54  ;;  %v2694_v48 = vld [vmem:[%s10134_s16 + $0x10] sm:$0xff]  ;;  %v2697_v4 = vld [vmem:[%s10134_s16 + $0x28] sm:$0xff]  ;;  %v9331_v54 = vpack.c.bf16 %v2698_v36, %v2696_v25 }
 0x9e0   :  { %2529 = vmatmul.mubr.f32.vlgmr.msra.gmra.mrb[20].mxu1 %v2385_v61  ;;  %2604 = vmatmul.mubr.f32.vlgmr.msra.gmra.mrb[26].mxu0 %v2387_v7  ;;  %v2389_v26 = vmax.f32 %v2304_v53, 0.0  ;;  %v2391_v33 = vmax.f32 %v2381_v1, 0.0  ;;  %v9307_v9 = vpack.c.bf16 %v2694_v48, %v2692_v24  ;;  %v9309_v17 = vpack.c.bf16 %v2699_v14, %v2697_v4  ;;  %v2710_v28 = vld [vmem:[%s10133_s15 + $0x10] sm:$0xff]  ;;  %v2701_v61 = vld [vmem:[%s10134_s16 + $0x48] sm:$0xff]  ;;  %v2703_v7 = vld [vmem:[%s10134_s16 + $0x58] sm:$0xff] }
 0x9e1   :  { %v2390_v21 = vmax.f32 %v2306_v20, 0.0  ;;  %v2392_v22 = vmax.f32 %v2383_v3, 0.0  ;;  %7291 = vmatprep.subr.bf16.mxu0 %v9296_v23  ;;  %v7288_v29 = vpack.c.bf16 %v2710_v28, %v2708_v18  ;;  %v9340_v53 = vpack.c.bf16 %v2703_v7, %v2701_v61  ;;  %v2700_v1 = vld [vmem:[%s10134_s16 + $0x40] sm:$0xff]  ;;  %v2702_v37 = vld [vmem:[%s10134_s16 + $0x50] sm:$0xff]  ;;  %7287 = vmatprep.subr.bf16.mxu1 %v7286_v27  ;;  %v2705_v38 = vld [vmem:[%s10134_s16 + $0x68] sm:$0xff] }
 0x9e2   :  { %7293 = vmatpush1.bf16.msra.mxu0 %v9307_v9  ;;  %v2707_v20 = vld [vmem:[%s10134_s16 + $0x78] sm:$0xff]  ;;  %v9355_v3 = vpack.c.bf16 %v2702_v37, %v2700_v1 }
 0x9e3   :  { %2533 = vmatprep.mubr.f32.mxu1 %v2390_v21  ;;  %2608 = vmatprep.mubr.f32.mxu0 %v2392_v22  ;;  %v9359_v21 = vpack.c.bf16 %v2707_v20, %v2705_v38  ;;  %v2704_v22 = vld [vmem:[%s10134_s16 + $0x60] sm:$0xff] }
 0x9e4   :  { %2534 = vmatmul.mubr.f32.gmra.mrb[22].mxu1 %v2389_v26  ;;  %2609 = vmatmul.mubr.f32.gmra.mrb[28].mxu0 %v2391_v33  ;;  %v2706_v26 = vld [vmem:[%s10134_s16 + $0x70] sm:$0xff]  ;;  %s8417_s16 = smov [#allocation2]  }
 0x9e5   :  { %2794 = vmatprep.mubr.f32.mxu1 %v10164_v56  ;;  %2875 = vmatprep.mubr.f32.mxu0 %v10164_v56  ;;  %v9368_v33 = vpack.c.bf16 %v2706_v26, %v2704_v22  ;;  %s6814_s6 = sshll.u32 %s8417_s16, 4  ;;  %s6815_s6 = int_to_ptr.vmem [resolvable:$true] %s6814_s6 }
 0x9e6   :  { %7295 = vmatprep.subr.bf16.mxu0 %v9309_v17  ;;  %7289 = vmatpush1.bf16.msra.mxu1 %v7288_v29  ;;  %p8361_p1 = scmp.lt.s32.totalorder %s6815_s6, %s6815_s6 }
 0x9e7   :  { %7297 = vmatpush1.bf16.msra.mxu0 %v9331_v54  ;;  %7307 = vmatprep.subr.bf16.mxu1 %v9296_v23 }
 0x9e8   :  { %7299 = vmatprep.subr.bf16.mxu0 %v9340_v53 }
 0x9eb   :  { %7301 = vmatpush1.bf16.msra.mxu0 %v9355_v3 }
 0x9ec   :  { %7303 = vmatprep.subr.bf16.mxu0 %v9359_v21 }
 0x9ef   :  { %7305 = vmatpush1.bf16.msra.mxu0 %v9368_v33 }
 0x9f0   :  { %7323 = vmatprep.subr.bf16.mxu0 %v9296_v23 }
 0x9f2   :  { %2876 = vmatmul.mubr.f32.vlgmr.msra.gmra.mrb[30].mxu0 %v10164_v56 }
 0x9f3   :  { %7325 = vmatpush1.bf16.msra.mxu0 %v9307_v9  ;;  %3097 = vmatprep.mubr.f32.mxu0 %v10164_v56 }
 0x9f4   :  { %7327 = vmatprep.subr.bf16.mxu0 %v9309_v17 }
 0x9f7   :  { %7329 = vmatpush1.bf16.msra.mxu0 %v9331_v54 }
 0x9f8   :  { %7331 = vmatprep.subr.bf16.mxu0 %v9340_v53 }
 0x9fb   :  { %7333 = vmatpush1.bf16.msra.mxu0 %v9355_v3 }
 0x9fc   :  { %7335 = vmatprep.subr.bf16.mxu0 %v9359_v21 }
 0x9ff   :  { %7337 = vmatpush1.bf16.msra.mxu0 %v9368_v33 }
 0xa00   :  { %7355 = vmatprep.subr.bf16.mxu0 %v9296_v23 }
 0xab3   :  { %v7031_v51 = vpop.f32.mrb[20].mxu1  ;;  %v7069_v35 = vpop.f32.mrb[26].mxu0 }
 0xab4   :  { %v7032_v44 = vpop.f32.mrb[21].mxu1  ;;  %v7070_v32 = vpop.f32.mrb[27].mxu0 }
 0xab5   :  { %v7033_v55 = vadd.f32 %v7032_v44, %v7031_v51  ;;  %v7071_v31 = vadd.f32 %v7070_v32, %v7069_v35 }
 0xab7   :  { %v2531_v52 = vadd.f32 %v7033_v55, %v6852_v16  ;;  %v7034_v13 = vpop.f32.mrb[22].mxu1  ;;  %v7072_v49 = vpop.f32.mrb[28].mxu0 }
 0xab8   :  { %v7035_v15 = vpop.f32.mrb[23].mxu1  ;;  %v7073_v34 = vpop.f32.mrb[29].mxu0 }
 0xab9   :  { %v2606_v59 = vadd.f32 %v7071_v31, %v2531_v52  ;;  %v7036_v19 = vadd.f32 %v7035_v15, %v7034_v13  ;;  %v7074_v6 = vadd.f32 %v7073_v34, %v7072_v49  ;;  %v6853_v52 = vld [vmem:[%s10131_s13] ss:$0 sm:$0xff] }
 0xaba   :  { %v6854_v49 = vld [vmem:[%s10132_s14] ss:$0 sm:$0xff] }
 0xabb   :  { %v2536_v8 = vadd.f32 %v7036_v19, %v6852_v16  ;;  %v2614_v40 = vadd.f32 %v2606_v59, %v9091_v47 }
 0xabd   :  { %v2611_v41 = vadd.f32 %v7074_v6, %v2536_v8  ;;  %v2618_v46 = vsel %vm180_vm3, %v2614_v40, 0.0 }
 0xabe   :  { %2619 = vadd.xlane.f32.xlu1 %v2618_v46 }
 0xabf   :  { %v2615_v42 = vadd.f32 %v2611_v41, %v9123_v5 }
 0xac1   :  { %v2621_v62 = vsel %vm180_vm3, %v2615_v42, 0.0 }
 0xac2   :  { %2622 = vadd.xlane.f32.xlu0 %v2621_v62 }
 0xac5   :  { %v2877_v41 = vpop.f32.mrb[30].mxu0 }
 0xac6   :  { %v2879_v46 = vpop.f32.mrb[31].mxu0 }
 0xb4b   :  { %v2620_v12 = vpop.xlane.xlu1 %2619 }
 0xb4c   :  { %v2624_v10 = vmul.f32 0.0625, %v2620_v12 }
 0xb4e   :  { %v9277_v57 = vsub.f32 %v2614_v40, %v2624_v10 }
 0xb4f   :  { %v2623_v30 = vpop.xlane.xlu0 %2622 }
 0xb50   :  { %v2625_v58 = vmul.f32 0.0625, %v2623_v30  ;;  %v2628_v60 = vmul.f32 %v9277_v57, %v9277_v57 }
 0xb52   :  { %v9281_v45 = vsub.f32 %v2615_v42, %v2625_v58  ;;  %v2630_v47 = vsel %vm180_vm3, %v2628_v60, 0.0  ;;  %v2712_v42 = vld [vmem:[%s10135_s17] sm:$0x3] }
 0xb53   :  { %2631 = vadd.xlane.f32.xlu1 %v2630_v47  ;;  %v9405_v62 = vrot.slane %v2712_v42, %v8666_v0  ;;  %v9413_v60 = vrot.slane %v2712_v42, %v8663_v63 }
 0xb54   :  { %v2629_v5 = vmul.f32 %v9281_v45, %v9281_v45 }
 0xb56   :  { %v2633_v2 = vsel %vm180_vm3, %v2629_v5, 0.0 }
 0xb57   :  { %2634 = vadd.xlane.f32.xlu0 %v2633_v2 }
 0xbe0   :  { %v2632_v51 = vpop.xlane.xlu1 %2631 }
 0xbe1   :  { %v2636_v35 = vmul.f32 0.0625, %v2632_v51 }
 0xbe3   :  { %v2638_v16 = vadd.f32 1e-05, %v2636_v35 }
 0xbe4   :  { %v2635_v44 = vpop.xlane.xlu0 %2634 }
 0xbe5   :  { %7968 = vrsqrt.f32 %v2638_v16  ;;  %v2637_v32 = vmul.f32 0.0625, %v2635_v44 }
 0xbe7   :  { %v2639_v55 = vadd.f32 1e-05, %v2637_v32 }
 0xbe9   :  { %7970 = vrsqrt.f32 %v2639_v55 }
 0xbef   :  { %v7969_v31 = vpop.eup %7968 }
 0xbf0   :  { %v2642_v13 = vmul.f32 %v7969_v31, %v9277_v57 }
 0xbf2   :  { %v2650_v15 = vmul.f32 %v6853_v52, %v2642_v13 }
 0xbf3   :  { %v7971_v34 = vpop.eup %7970 }
 0xbf4   :  { %v2643_v59 = vmul.f32 %v7971_v34, %v9281_v45  ;;  %v2658_v19 = vadd.f32 %v6854_v49, %v2650_v15 }
 0xbf6   :  { %2660 = vxpose.xlu1.b32.start [1/2] (short) (narrow) %v2658_v19, 16  ;;  %v2651_v6 = vmul.f32 %v6853_v52, %v2643_v59 }
 0xbf8   :  { %v2659_v8 = vadd.f32 %v6854_v49, %v2651_v6 }
 0xbfa   :  { %2661 = vxpose.xlu1.b32.end [2/2] (short) (narrow) %v2659_v8, 16 }
 0xc76   :  { %v2676_v40 = vpop.trf.xlu1 }
 0xc77   :  { %6855 = vmatmul.mubr.msk.f32.vlgmr.msra.gmra.mrb[24].mxu1 %vm180_vm3, %v2676_v40 }
 0xc78   :  { %7309 = vmatpush1.bf16.msra.mxu1 %v9307_v9  ;;  %2800 = vmatprep.mubr.f32.mxu1 %v10164_v56 }
 0xc79   :  { %7311 = vmatprep.subr.bf16.mxu1 %v9309_v17 }
 0xc7a   :  { %v2677_v4 = vpop.trf.xlu1 }
 0xc7b   :  { %6856 = vmatmul.mubr.msk.f32.gmra.mrb[26].mxu1 %vm180_vm3, %v2677_v4  ;;  %vm4655_vm3 = vcmask 1045504  }
 0xc7c   :  { %7313 = vmatpush1.bf16.msra.mxu1 %v9331_v54  ;;  %2981 = vmatprep.mubr.f32.mxu1 %v10164_v56 }
 0xc7d   :  { %7315 = vmatprep.subr.bf16.mxu1 %v9340_v53 }
 0xc80   :  { %7317 = vmatpush1.bf16.msra.mxu1 %v9355_v3 }
 0xc81   :  { %7319 = vmatprep.subr.bf16.mxu1 %v9359_v21 }
 0xc84   :  { %7321 = vmatpush1.bf16.msra.mxu1 %v9368_v33 }
 0xc85   :  { %7339 = vmatprep.subr.bf16.mxu1 %v9296_v23 }
 0xd4a   :  { %v2796_v12 = vpop.f32.mrb[24].mxu1 }
 0xd4b   :  { %v2798_v10 = vpop.f32.mrb[25].mxu1  ;;  %v9416_v45 = vadd.f32 %v2796_v12, %v9413_v60 }
 0xd4c   :  { %v9408_v57 = vadd.f32 %v2798_v10, %v9405_v62 }
 0xd4d   :  { %v2882_v47 = vadd.f32 %v2877_v41, %v9416_v45 }
 0xd4e   :  { %v2883_v30 = vadd.f32 %v2879_v46, %v9408_v57  ;;  %v9423_v18 = vpop.f32.mrb[26].mxu1 }
 0xd4f   :  { %v6857_v5 = vmul.f32 -1.442695, %v2882_v47  ;;  %v9425_v28 = vpop.f32.mrb[27].mxu1 }
 0xd50   :  { %7972 = vtanh.f32 %v2883_v30  ;;  %v6858_v50 = vmul.f32 -1.442695, %v2883_v30 }
 0xd51   :  { %7974 = vpow2.f32 %v6857_v5 }
 0xd5a   :  { %v7973_v58 = vpop.eup %7972 }
 0xd5b   :  { %2899 = vrot.lane.b32.xlu0 %v7973_v58, %s8415_s26  ;;  %v7975_v2 = vpop.eup %7974 }
 0xd5c   :  { %v2890_v11 = vadd.f32 1.0, %v7975_v2 }
 0xd5e   :  { %7976 = vrcp.f32 %v2890_v11 }
 0xd68   :  { %v7977_v39 = vpop.eup %7976 }
 0xd69   :  { %v2897_v14 = vmul.f32 0.0, %v7977_v39 }
 0xdcd   :  { %v2900_v24 = vpop.permute.xlu0 %2899 }
 0xdce   :  { %v2902_v48 = vmul.f32 %v7977_v39, %v2900_v24 }
 0xdd0   :  { %2904 = vrot.lane.b32.xlu0 %v2902_v48, %s8415_s26 }
 0xe42   :  { %v2905_v25 = vpop.permute.xlu0 %2904 }
 0xe43   :  { %v2907_v36 = vadd.f32 %v2905_v25, %v2897_v14 }
 0xe45   :  { %7978 = vtanh.f32 %v2907_v36  ;;  %v3010_v13 = vrot.slane %v2907_v36, 7 }
 0xe46   :  { %7980 = vpow2.f32 %v6858_v50 }
 0xe4f   :  { %v7979_v43 = vpop.eup %7978 }
 0xe50   :  { %2910 = vrot.lane.b32.xlu0 %v7979_v43, %s8415_s26  ;;  %v7981_v27 = vpop.eup %7980 }
 0xe51   :  { %v2891_v29 = vadd.f32 1.0, %v7981_v27 }
 0xe53   :  { %7982 = vrcp.f32 %v2891_v29 }
 0xe5d   :  { %v7983_v61 = vpop.eup %7982 }
 0xec2   :  { %v2911_v7 = vpop.permute.xlu0 %2910 }
 0xec3   :  { %v9427_v1 = vmul.f32 %v7983_v61, %v2911_v7 }
 0xec5   :  { %6859 = vmatmul.mubr.msk.f32.vlgmr.msra.gmra.mrb[28].mxu1 %vm2807_vm12, %v9427_v1 }
 0xec6   :  { %7341 = vmatpush1.bf16.msra.mxu1 %v9307_v9  ;;  %3213 = vmatprep.mubr.f32.mxu1 %v10164_v56 }
 0xec7   :  { %7343 = vmatprep.subr.bf16.mxu1 %v9309_v17 }
 0xeca   :  { %7345 = vmatpush1.bf16.msra.mxu1 %v9331_v54 }
 0xecb   :  { %7347 = vmatprep.subr.bf16.mxu1 %v9340_v53 }
 0xece   :  { %7349 = vmatpush1.bf16.msra.mxu1 %v9355_v3 }
 0xecf   :  { %7351 = vmatprep.subr.bf16.mxu1 %v9359_v21 }
 0xed2   :  { %7353 = vmatpush1.bf16.msra.mxu1 %v9368_v33 }
 0xed3   :  { %7371 = vmatprep.subr.bf16.mxu1 %v9296_v23 }
 0xf98   :  { %v2983_v37 = vpop.f32.mrb[28].mxu1 }
 0xf99   :  { %v2985_v38 = vpop.f32.mrb[29].mxu1  ;;  %v2990_v51 = vrot.slane %v2983_v37, 7 }
 0xf9a   :  { %v2991_v20 = vrot.slane %v2985_v38, 7 }
 0xf9b   :  { %v2994_v35 = vadd.f32 %v2990_v51, %v9416_v45 }
 0xf9c   :  { %v2995_v22 = vadd.f32 %v2991_v20, %v9408_v57 }
 0xf9d   :  { %v6860_v16 = vmul.f32 -1.442695, %v2994_v35 }
 0xf9e   :  { %7984 = vtanh.f32 %v2995_v22  ;;  %v6861_v19 = vmul.f32 -1.442695, %v2995_v22 }
 0xf9f   :  { %7986 = vpow2.f32 %v6860_v16 }
 0xfa8   :  { %v7985_v26 = vpop.eup %7984 }
 0xfa9   :  { %3014 = vrot.lane.b32.xlu0 %v7985_v26, %s8415_s26  ;;  %v7987_v44 = vpop.eup %7986 }
 0xfaa   :  { %v3002_v32 = vadd.f32 1.0, %v7987_v44 }
 0xfac   :  { %7988 = vrcp.f32 %v3002_v32 }
 0xfb6   :  { %v7989_v55 = vpop.eup %7988 }
 0xfb7   :  { %v3012_v49 = vmul.f32 %v7989_v55, %v3010_v13 }
0x101b   :  { %v3015_v31 = vpop.permute.xlu0 %3014 }
0x101c   :  { %v3017_v52 = vmul.f32 %v7989_v55, %v3015_v31 }
0x101e   :  { %3019 = vrot.lane.b32.xlu0 %v3017_v52, %s8415_s26 }
0x1090   :  { %v3020_v15 = vpop.permute.xlu0 %3019 }
0x1091   :  { %v3022_v34 = vadd.f32 %v3020_v15, %v3012_v49 }
0x1093   :  { %7990 = vtanh.f32 %v3022_v34  ;;  %v3126_v25 = vrot.slane %v3022_v34, 7 }
0x1094   :  { %7992 = vpow2.f32 %v6861_v19 }
0x109d   :  { %v7991_v59 = vpop.eup %7990 }
0x109e   :  { %3025 = vrot.lane.b32.xlu0 %v7991_v59, %s8415_s26  ;;  %v7993_v6 = vpop.eup %7992 }
0x109f   :  { %v3003_v8 = vadd.f32 1.0, %v7993_v6 }
0x10a1   :  { %7994 = vrcp.f32 %v3003_v8 }
0x10ab   :  { %v7995_v40 = vpop.eup %7994 }
0x1110   :  { %v3026_v41 = vpop.permute.xlu0 %3025 }
0x1111   :  { %v3028_v46 = vmul.f32 %v7995_v40, %v3026_v41 }
0x1113   :  { %v3030_v42 = vrot.slane %v3028_v46, 1  ;;  %v4647_v22 = vsel %vm4646_vm13, %v9427_v1, %v3028_v46 }
0x1115   :  { %6862 = vmatmul.mubr.msk.f32.vlgmr.msra.gmra.mrb[32].mxu0 %vm2807_vm12, %v3030_v42 }
0x1116   :  { %7357 = vmatpush1.bf16.msra.mxu0 %v9307_v9  ;;  %3329 = vmatprep.mubr.f32.mxu0 %v10164_v56 }
0x1117   :  { %7359 = vmatprep.subr.bf16.mxu0 %v9309_v17 }
0x111a   :  { %7361 = vmatpush1.bf16.msra.mxu0 %v9331_v54 }
0x111b   :  { %7363 = vmatprep.subr.bf16.mxu0 %v9340_v53 }
0x111e   :  { %7365 = vmatpush1.bf16.msra.mxu0 %v9355_v3 }
0x111f   :  { %7367 = vmatprep.subr.bf16.mxu0 %v9359_v21 }
0x1122   :  { %7369 = vmatpush1.bf16.msra.mxu0 %v9368_v33 }
0x1123   :  { %7387 = vmatprep.subr.bf16.mxu0 %v9296_v23 }
0x11e8   :  { %v3099_v12 = vpop.f32.mrb[32].mxu0 }
0x11e9   :  { %v3101_v10 = vpop.f32.mrb[33].mxu0  ;;  %v3106_v5 = vrot.slane %v3099_v12, 6 }
0x11ea   :  { %v3107_v30 = vrot.slane %v3101_v10, 6 }
0x11eb   :  { %v3110_v2 = vadd.f32 %v3106_v5, %v9416_v45 }
0x11ec   :  { %v3111_v58 = vadd.f32 %v3107_v30, %v9408_v57 }
0x11ed   :  { %v6863_v11 = vmul.f32 -1.442695, %v3110_v2 }
0x11ee   :  { %7996 = vtanh.f32 %v3111_v58  ;;  %v6864_v29 = vmul.f32 -1.442695, %v3111_v58 }
0x11ef   :  { %7998 = vpow2.f32 %v6863_v11 }
0x11f8   :  { %v7997_v47 = vpop.eup %7996 }
0x11f9   :  { %3130 = vrot.lane.b32.xlu0 %v7997_v47, %s8415_s26  ;;  %v7999_v39 = vpop.eup %7998 }
0x11fa   :  { %v3118_v24 = vadd.f32 1.0, %v7999_v39 }
0x11fc   :  { %8000 = vrcp.f32 %v3118_v24 }
0x1206   :  { %v8001_v48 = vpop.eup %8000 }
0x1207   :  { %v3128_v36 = vmul.f32 %v8001_v48, %v3126_v25 }
0x126b   :  { %v3131_v4 = vpop.permute.xlu0 %3130 }
0x126c   :  { %v3133_v14 = vmul.f32 %v8001_v48, %v3131_v4 }
0x126e   :  { %3135 = vrot.lane.b32.xlu0 %v3133_v14, %s8415_s26 }
0x12e0   :  { %v3136_v43 = vpop.permute.xlu0 %3135 }
0x12e1   :  { %v3138_v50 = vadd.f32 %v3136_v43, %v3128_v36 }
0x12e3   :  { %8002 = vtanh.f32 %v3138_v50  ;;  %v3242_v19 = vrot.slane %v3138_v50, 7 }
0x12e4   :  { %8004 = vpow2.f32 %v6864_v29 }
0x12ed   :  { %v8003_v27 = vpop.eup %8002 }
0x12ee   :  { %3141 = vrot.lane.b32.xlu0 %v8003_v27, %s8415_s26  ;;  %v8005_v61 = vpop.eup %8004 }
0x12ef   :  { %v3119_v7 = vadd.f32 1.0, %v8005_v61 }
0x12f1   :  { %8006 = vrcp.f32 %v3119_v7 }
0x12fb   :  { %v8007_v37 = vpop.eup %8006 }
0x1360   :  { %v3142_v38 = vpop.permute.xlu0 %3141 }
0x1361   :  { %v3144_v20 = vmul.f32 %v8007_v37, %v3142_v38 }
0x1363   :  { %v3146_v26 = vrot.slane %v3144_v20, 2  ;;  %v4649_v51 = vsel %vm4648_vm14, %v4647_v22, %v3144_v20 }
0x1365   :  { %6865 = vmatmul.mubr.msk.f32.vlgmr.msra.gmra.mrb[30].mxu1 %vm2807_vm12, %v3146_v26 }
0x1366   :  { %7373 = vmatpush1.bf16.msra.mxu1 %v9307_v9  ;;  %3445 = vmatprep.mubr.f32.mxu1 %v10164_v56 }
0x1367   :  { %7375 = vmatprep.subr.bf16.mxu1 %v9309_v17 }
0x136a   :  { %7377 = vmatpush1.bf16.msra.mxu1 %v9331_v54 }
0x136b   :  { %7379 = vmatprep.subr.bf16.mxu1 %v9340_v53 }
0x136e   :  { %7381 = vmatpush1.bf16.msra.mxu1 %v9355_v3 }
0x136f   :  { %7383 = vmatprep.subr.bf16.mxu1 %v9359_v21 }
0x1372   :  { %7385 = vmatpush1.bf16.msra.mxu1 %v9368_v33 }
0x1373   :  { %7403 = vmatprep.subr.bf16.mxu1 %v9296_v23 }
0x1438   :  { %v3215_v1 = vpop.f32.mrb[30].mxu1 }
0x1439   :  { %v3217_v35 = vpop.f32.mrb[31].mxu1  ;;  %v3222_v55 = vrot.slane %v3215_v1, 5 }
0x143a   :  { %v3223_v16 = vrot.slane %v3217_v35, 5 }
0x143b   :  { %v3226_v31 = vadd.f32 %v3222_v55, %v9416_v45 }
0x143c   :  { %v3227_v44 = vadd.f32 %v3223_v16, %v9408_v57 }
0x143d   :  { %v6866_v52 = vmul.f32 -1.442695, %v3226_v31 }
0x143e   :  { %8008 = vtanh.f32 %v3227_v44  ;;  %v6867_v46 = vmul.f32 -1.442695, %v3227_v44 }
0x143f   :  { %8010 = vpow2.f32 %v6866_v52 }
0x1448   :  { %v8009_v32 = vpop.eup %8008 }
0x1449   :  { %3246 = vrot.lane.b32.xlu0 %v8009_v32, %s8415_s26  ;;  %v8011_v13 = vpop.eup %8010 }
0x144a   :  { %v3234_v49 = vadd.f32 1.0, %v8011_v13 }
0x144c   :  { %8012 = vrcp.f32 %v3234_v49 }
0x1456   :  { %v8013_v15 = vpop.eup %8012 }
0x1457   :  { %v3244_v6 = vmul.f32 %v8013_v15, %v3242_v19 }
0x14bb   :  { %v3247_v34 = vpop.permute.xlu0 %3246 }
0x14bc   :  { %v3249_v59 = vmul.f32 %v8013_v15, %v3247_v34 }
0x14be   :  { %3251 = vrot.lane.b32.xlu1 %v3249_v59, %s8415_s26 }
0x1530   :  { %v3252_v8 = vpop.permute.xlu1 %3251 }
0x1531   :  { %v3254_v40 = vadd.f32 %v3252_v8, %v3244_v6 }
0x1533   :  { %8014 = vtanh.f32 %v3254_v40  ;;  %v3358_v61 = vrot.slane %v3254_v40, 7 }
0x1534   :  { %8016 = vpow2.f32 %v6867_v46 }
0x153d   :  { %v8015_v41 = vpop.eup %8014 }
0x153e   :  { %3257 = vrot.lane.b32.xlu0 %v8015_v41, %s8415_s26  ;;  %v8017_v42 = vpop.eup %8016 }
0x153f   :  { %v3235_v12 = vadd.f32 1.0, %v8017_v42 }
0x1541   :  { %8018 = vrcp.f32 %v3235_v12 }
0x154b   :  { %v8019_v10 = vpop.eup %8018 }
0x15b0   :  { %v3258_v30 = vpop.permute.xlu0 %3257 }
0x15b1   :  { %v3260_v58 = vmul.f32 %v8019_v10, %v3258_v30 }
0x15b3   :  { %v3262_v47 = vrot.slane %v3260_v58, 3  ;;  %v4651_v5 = vsel %vm4650_vm15, %v4649_v51, %v3260_v58 }
0x15b5   :  { %6868 = vmatmul.mubr.msk.f32.vlgmr.msra.gmra.mrb[34].mxu0 %vm2807_vm12, %v3262_v47 }
0x15b6   :  { %7389 = vmatpush1.bf16.msra.mxu0 %v9307_v9  ;;  %3561 = vmatprep.mubr.f32.mxu0 %v10164_v56 }
0x15b7   :  { %7391 = vmatprep.subr.bf16.mxu0 %v9309_v17 }
0x15ba   :  { %7393 = vmatpush1.bf16.msra.mxu0 %v9331_v54 }
0x15bb   :  { %7395 = vmatprep.subr.bf16.mxu0 %v9340_v53 }
0x15be   :  { %7397 = vmatpush1.bf16.msra.mxu0 %v9355_v3 }
0x15bf   :  { %7399 = vmatprep.subr.bf16.mxu0 %v9359_v21 }
0x15c2   :  { %7401 = vmatpush1.bf16.msra.mxu0 %v9368_v33 }
0x15c3   :  { %7419 = vmatprep.subr.bf16.mxu0 %v9296_v23 }
0x1688   :  { %v3331_v2 = vpop.f32.mrb[34].mxu0 }
0x1689   :  { %v3333_v11 = vpop.f32.mrb[35].mxu0  ;;  %v3338_v4 = vrot.slane %v3331_v2, 4 }
0x168a   :  { %v3339_v39 = vrot.slane %v3333_v11, 4 }
0x168b   :  { %v3342_v14 = vadd.f32 %v3338_v4, %v9416_v45 }
0x168c   :  { %v3343_v24 = vadd.f32 %v3339_v39, %v9408_v57 }
0x168d   :  { %v6869_v25 = vmul.f32 -1.442695, %v3342_v14 }
0x168e   :  { %8020 = vtanh.f32 %v3343_v24  ;;  %v6870_v22 = vmul.f32 -1.442695, %v3343_v24 }
0x168f   :  { %8022 = vpow2.f32 %v6869_v25 }
0x1698   :  { %v8021_v48 = vpop.eup %8020 }
0x1699   :  { %3362 = vrot.lane.b32.xlu0 %v8021_v48, %s8415_s26  ;;  %v8023_v36 = vpop.eup %8022 }
0x169a   :  { %v3350_v43 = vadd.f32 1.0, %v8023_v36 }
0x169c   :  { %8024 = vrcp.f32 %v3350_v43 }
0x16a6   :  { %v8025_v50 = vpop.eup %8024 }
0x16a7   :  { %v3360_v7 = vmul.f32 %v8025_v50, %v3358_v61 }
0x170b   :  { %v3363_v27 = vpop.permute.xlu0 %3362 }
0x170c   :  { %v3365_v29 = vmul.f32 %v8025_v50, %v3363_v27 }
0x170e   :  { %3367 = vrot.lane.b32.xlu0 %v3365_v29, %s8415_s26 }
0x1780   :  { %v3368_v37 = vpop.permute.xlu0 %3367 }
0x1781   :  { %v3370_v38 = vadd.f32 %v3368_v37, %v3360_v7 }
0x1783   :  { %8026 = vtanh.f32 %v3370_v38  ;;  %v3474_v46 = vrot.slane %v3370_v38, 7 }
0x1784   :  { %8028 = vpow2.f32 %v6870_v22 }
0x178d   :  { %v8027_v20 = vpop.eup %8026 }
0x178e   :  { %3373 = vrot.lane.b32.xlu0 %v8027_v20, %s8415_s26  ;;  %v8029_v26 = vpop.eup %8028 }
0x178f   :  { %v3351_v51 = vadd.f32 1.0, %v8029_v26 }
0x1791   :  { %8030 = vrcp.f32 %v3351_v51 }
0x179b   :  { %v8031_v1 = vpop.eup %8030 }
0x1800   :  { %v3374_v35 = vpop.permute.xlu0 %3373 }
0x1801   :  { %v3376_v16 = vmul.f32 %v8031_v1, %v3374_v35 }
0x1803   :  { %v3378_v44 = vrot.slane %v3376_v16, 4  ;;  %v4653_v32 = vsel %vm4652_vm2, %v4651_v5, %v3376_v16 }
0x1805   :  { %6871 = vmatmul.mubr.msk.f32.vlgmr.msra.gmra.mrb[32].mxu1 %vm2807_vm12, %v3378_v44 }
0x1806   :  { %7405 = vmatpush1.bf16.msra.mxu1 %v9307_v9  ;;  %3677 = vmatprep.mubr.f32.mxu1 %v10164_v56 }
0x1807   :  { %7407 = vmatprep.subr.bf16.mxu1 %v9309_v17 }
0x180a   :  { %7409 = vmatpush1.bf16.msra.mxu1 %v9331_v54 }
0x180b   :  { %7411 = vmatprep.subr.bf16.mxu1 %v9340_v53 }
0x180e   :  { %7413 = vmatpush1.bf16.msra.mxu1 %v9355_v3 }
0x180f   :  { %7415 = vmatprep.subr.bf16.mxu1 %v9359_v21 }
0x1812   :  { %7417 = vmatpush1.bf16.msra.mxu1 %v9368_v33 }
0x1813   :  { %7435 = vmatprep.subr.bf16.mxu1 %v9296_v23 }
0x18d8   :  { %v3447_v55 = vpop.f32.mrb[32].mxu1 }
0x18d9   :  { %v3449_v31 = vpop.f32.mrb[33].mxu1  ;;  %v3454_v15 = vrot.slane %v3447_v55, 3 }
0x18da   :  { %v3455_v52 = vrot.slane %v3449_v31, 3 }
0x18db   :  { %v3458_v34 = vadd.f32 %v3454_v15, %v9416_v45 }
0x18dc   :  { %v3459_v13 = vadd.f32 %v3455_v52, %v9408_v57 }
0x18dd   :  { %v6872_v59 = vmul.f32 -1.442695, %v3458_v34 }
0x18de   :  { %8032 = vtanh.f32 %v3459_v13  ;;  %v6873_v58 = vmul.f32 -1.442695, %v3459_v13 }
0x18df   :  { %8034 = vpow2.f32 %v6872_v59 }
0x18e8   :  { %v8033_v49 = vpop.eup %8032 }
0x18e9   :  { %3478 = vrot.lane.b32.xlu0 %v8033_v49, %s8415_s26  ;;  %v8035_v19 = vpop.eup %8034 }
0x18ea   :  { %v3466_v6 = vadd.f32 1.0, %v8035_v19 }
0x18ec   :  { %8036 = vrcp.f32 %v3466_v6 }
0x18f6   :  { %v8037_v8 = vpop.eup %8036 }
0x18f7   :  { %v3476_v42 = vmul.f32 %v8037_v8, %v3474_v46 }
0x195b   :  { %v3479_v40 = vpop.permute.xlu0 %3478 }
0x195c   :  { %v3481_v41 = vmul.f32 %v8037_v8, %v3479_v40 }
0x195e   :  { %3483 = vrot.lane.b32.xlu0 %v3481_v41, %s8415_s26 }
0x19d0   :  { %v3484_v12 = vpop.permute.xlu0 %3483 }
0x19d1   :  { %v3486_v10 = vadd.f32 %v3484_v12, %v3476_v42 }
0x19d3   :  { %8038 = vtanh.f32 %v3486_v10  ;;  %v3590_v22 = vrot.slane %v3486_v10, 7 }
0x19d4   :  { %8040 = vpow2.f32 %v6873_v58 }
0x19dd   :  { %v8039_v30 = vpop.eup %8038 }
0x19de   :  { %3489 = vrot.lane.b32.xlu0 %v8039_v30, %s8415_s26  ;;  %v8041_v47 = vpop.eup %8040 }
0x19df   :  { %v3467_v5 = vadd.f32 1.0, %v8041_v47 }
0x19e1   :  { %8042 = vrcp.f32 %v3467_v5 }
0x19eb   :  { %v8043_v2 = vpop.eup %8042 }
0x1a50   :  { %v3490_v11 = vpop.permute.xlu0 %3489 }
0x1a51   :  { %v3492_v39 = vmul.f32 %v8043_v2, %v3490_v11 }
0x1a53   :  { %v3494_v24 = vrot.slane %v3492_v39, 5  ;;  %v4654_v48 = vsel %vm93_vm0, %v4653_v32, %v3492_v39 }
0x1a55   :  { %6874 = vmatmul.mubr.msk.f32.vlgmr.msra.gmra.mrb[36].mxu0 %vm2807_vm12, %v3494_v24 }
0x1a56   :  { %7421 = vmatpush1.bf16.msra.mxu0 %v9307_v9  ;;  %3793 = vmatprep.mubr.f32.mxu0 %v10164_v56 }
0x1a57   :  { %7423 = vmatprep.subr.bf16.mxu0 %v9309_v17 }
0x1a5a   :  { %7425 = vmatpush1.bf16.msra.mxu0 %v9331_v54 }
0x1a5b   :  { %7427 = vmatprep.subr.bf16.mxu0 %v9340_v53 }
0x1a5e   :  { %7429 = vmatpush1.bf16.msra.mxu0 %v9355_v3 }
0x1a5f   :  { %7431 = vmatprep.subr.bf16.mxu0 %v9359_v21 }
0x1a62   :  { %7433 = vmatpush1.bf16.msra.mxu0 %v9368_v33 }
0x1a63   :  { %7451 = vmatprep.subr.bf16.mxu0 %v9296_v23 }
0x1b28   :  { %v3563_v4 = vpop.f32.mrb[36].mxu0 }
0x1b29   :  { %v3565_v14 = vpop.f32.mrb[37].mxu0  ;;  %v3570_v50 = vrot.slane %v3563_v4, 2 }
0x1b2a   :  { %v3571_v25 = vrot.slane %v3565_v14, 2 }
0x1b2b   :  { %v3574_v27 = vadd.f32 %v3570_v50, %v9416_v45 }
0x1b2c   :  { %v3575_v36 = vadd.f32 %v3571_v25, %v9408_v57 }
0x1b2d   :  { %v6875_v29 = vmul.f32 -1.442695, %v3574_v27 }
0x1b2e   :  { %8044 = vtanh.f32 %v3575_v36  ;;  %v6876_v16 = vmul.f32 -1.442695, %v3575_v36  ;;  %v9557_v36 = vadd.f32 %v9425_v28, %v9405_v62 }
0x1b2f   :  { %8046 = vpow2.f32 %v6875_v29 }
0x1b38   :  { %v8045_v43 = vpop.eup %8044 }
0x1b39   :  { %3594 = vrot.lane.b32.xlu1 %v8045_v43, %s8415_s26  ;;  %v8047_v61 = vpop.eup %8046 }
0x1b3a   :  { %v3582_v7 = vadd.f32 1.0, %v8047_v61  ;;  %v9563_v61 = vadd.f32 %v9423_v18, %v9413_v60 }
0x1b3c   :  { %8048 = vrcp.f32 %v3582_v7 }
0x1b46   :  { %v8049_v37 = vpop.eup %8048 }
0x1b47   :  { %v3592_v26 = vmul.f32 %v8049_v37, %v3590_v22 }
0x1bab   :  { %v3595_v38 = vpop.permute.xlu1 %3594 }
0x1bac   :  { %v3597_v20 = vmul.f32 %v8049_v37, %v3595_v38 }
0x1bae   :  { %3599 = vrot.lane.b32.xlu0 %v3597_v20, %s8415_s26 }
0x1c20   :  { %v3600_v51 = vpop.permute.xlu0 %3599 }
0x1c21   :  { %v3602_v1 = vadd.f32 %v3600_v51, %v3592_v26 }
0x1c23   :  { %8050 = vtanh.f32 %v3602_v1  ;;  %v3706_v58 = vrot.slane %v3602_v1, 7 }
0x1c24   :  { %8052 = vpow2.f32 %v6876_v16 }
0x1c2d   :  { %v8051_v35 = vpop.eup %8050 }
0x1c2e   :  { %3605 = vrot.lane.b32.xlu1 %v8051_v35, %s8415_s26  ;;  %v8053_v44 = vpop.eup %8052 }
0x1c2f   :  { %v3583_v32 = vadd.f32 1.0, %v8053_v44 }
0x1c31   :  { %8054 = vrcp.f32 %v3583_v32 }
0x1c3b   :  { %v8055_v55 = vpop.eup %8054 }
0x1ca0   :  { %v3606_v31 = vpop.permute.xlu1 %3605 }
0x1ca1   :  { %v3608_v52 = vmul.f32 %v8055_v55, %v3606_v31 }
0x1ca3   :  { %v3610_v13 = vrot.slane %v3608_v52, 6  ;;  %v4656_v49 = vsel %vm4655_vm3, %v4654_v48, %v3608_v52 }
0x1ca5   :  { %6877 = vmatmul.mubr.msk.f32.vlgmr.msra.gmra.mrb[34].mxu1 %vm2807_vm12, %v3610_v13 }
0x1ca6   :  { %7437 = vmatpush1.bf16.msra.mxu1 %v9307_v9  ;;  %3902 = vmatprep.mubr.f32.mxu1 %v10164_v56 }
0x1ca7   :  { %7439 = vmatprep.subr.bf16.mxu1 %v9309_v17 }
0x1caa   :  { %7441 = vmatpush1.bf16.msra.mxu1 %v9331_v54 }
0x1cab   :  { %7443 = vmatprep.subr.bf16.mxu1 %v9340_v53 }
0x1cae   :  { %7445 = vmatpush1.bf16.msra.mxu1 %v9355_v3 }
0x1caf   :  { %7447 = vmatprep.subr.bf16.mxu1 %v9359_v21 }
0x1cb2   :  { %7449 = vmatpush1.bf16.msra.mxu1 %v9368_v33 }
0x1cb3   :  { %7467 = vmatprep.subr.bf16.mxu1 %v9296_v23 }
0x1d78   :  { %v3679_v15 = vpop.f32.mrb[34].mxu1 }
0x1d79   :  { %v3681_v34 = vpop.f32.mrb[35].mxu1  ;;  %v3686_v8 = vrot.slane %v3679_v15, 1 }
0x1d7a   :  { %v3687_v59 = vrot.slane %v3681_v34, 1 }
0x1d7b   :  { %v3690_v40 = vadd.f32 %v3686_v8, %v9416_v45 }
0x1d7c   :  { %v3691_v19 = vadd.f32 %v3687_v59, %v9408_v57 }
0x1d7d   :  { %v6878_v41 = vmul.f32 -1.442695, %v3690_v40 }
0x1d7e   :  { %8056 = vtanh.f32 %v3691_v19  ;;  %v6879_v11 = vmul.f32 -1.442695, %v3691_v19 }
0x1d7f   :  { %8058 = vpow2.f32 %v6878_v41 }
0x1d88   :  { %v8057_v6 = vpop.eup %8056 }
0x1d89   :  { %3710 = vrot.lane.b32.xlu0 %v8057_v6, %s8415_s26  ;;  %v8059_v46 = vpop.eup %8058 }
0x1d8a   :  { %v3698_v42 = vadd.f32 1.0, %v8059_v46 }
0x1d8c   :  { %8060 = vrcp.f32 %v3698_v42 }
0x1d96   :  { %v8061_v12 = vpop.eup %8060 }
0x1d97   :  { %v3708_v47 = vmul.f32 %v8061_v12, %v3706_v58 }
0x1dfb   :  { %v3711_v10 = vpop.permute.xlu0 %3710 }
0x1dfc   :  { %v3713_v30 = vmul.f32 %v8061_v12, %v3711_v10 }
0x1dfe   :  { %3715 = vrot.lane.b32.xlu1 %v3713_v30, %s8415_s26 }
0x1e70   :  { %v3716_v57 = vpop.permute.xlu1 %3715 }
0x1e71   :  { %v3718_v5 = vadd.f32 %v3716_v57, %v3708_v47 }
0x1e73   :  { %8062 = vtanh.f32 %v3718_v5  ;;  %v3816_v26 = vrot.slane %v3718_v5, 7 }
0x1e74   :  { %8064 = vpow2.f32 %v6879_v11 }
0x1e7d   :  { %v8063_v2 = vpop.eup %8062 }
0x1e7e   :  { %3721 = vrot.lane.b32.xlu0 %v8063_v2, %s8415_s26  ;;  %v8065_v45 = vpop.eup %8064 }
0x1e7f   :  { %v3699_v39 = vadd.f32 1.0, %v8065_v45 }
0x1e81   :  { %8066 = vrcp.f32 %v3699_v39 }
0x1e8b   :  { %v8067_v24 = vpop.eup %8066 }
0x1ef0   :  { %v3722_v48 = vpop.permute.xlu0 %3721 }
0x1ef1   :  { %v3724_v4 = vmul.f32 %v8067_v24, %v3722_v48 }
0x1ef3   :  { %v3726_v14 = vrot.slane %v3724_v4, 7  ;;  %v9543_v25 = vsel %vm4657_vm4, %v4656_v49, %v3724_v4 }
0x1ef5   :  { %6880 = vmatmul.mubr.msk.f32.vlgmr.msra.gmra.mrb[38].mxu0 %vm2807_vm12, %v3726_v14 }
0x1ef6   :  { %7453 = vmatpush1.bf16.msra.mxu0 %v9307_v9  ;;  %4018 = vmatprep.mubr.f32.mxu0 %v10164_v56 }
0x1ef7   :  { %7455 = vmatprep.subr.bf16.mxu0 %v9309_v17 }
0x1efa   :  { %7457 = vmatpush1.bf16.msra.mxu0 %v9331_v54 }
0x1efb   :  { %7459 = vmatprep.subr.bf16.mxu0 %v9340_v53 }
0x1efe   :  { %7461 = vmatpush1.bf16.msra.mxu0 %v9355_v3 }
0x1eff   :  { %7463 = vmatprep.subr.bf16.mxu0 %v9359_v21 }
0x1f02   :  { %7465 = vmatpush1.bf16.msra.mxu0 %v9368_v33 }
0x1f03   :  { %7483 = vmatprep.subr.bf16.mxu0 %v9296_v23 }
0x1fc8   :  { %v3795_v43 = vpop.f32.mrb[38].mxu0 }
0x1fc9   :  { %v3797_v50 = vpop.f32.mrb[39].mxu0  ;;  %v3800_v7 = vadd.f32 %v3795_v43, %v9563_v61 }
0x1fca   :  { %v3801_v27 = vadd.f32 %v3797_v50, %v9557_v36 }
0x1fcb   :  { %v6881_v37 = vmul.f32 -1.442695, %v3800_v7 }
0x1fcc   :  { %8068 = vtanh.f32 %v3801_v27  ;;  %v6882_v60 = vmul.f32 -1.442695, %v3801_v27 }
0x1fcd   :  { %8070 = vpow2.f32 %v6881_v37 }
0x1fd6   :  { %v8069_v29 = vpop.eup %8068 }
0x1fd7   :  { %3820 = vrot.lane.b32.xlu1 %v8069_v29, %s8415_s26  ;;  %v8071_v38 = vpop.eup %8070 }
0x1fd8   :  { %v3808_v20 = vadd.f32 1.0, %v8071_v38 }
0x1fda   :  { %8072 = vrcp.f32 %v3808_v20 }
0x1fe4   :  { %v8073_v62 = vpop.eup %8072 }
0x1fe5   :  { %v3818_v51 = vmul.f32 %v8073_v62, %v3816_v26 }
0x2049   :  { %v3821_v28 = vpop.permute.xlu1 %3820 }
0x204a   :  { %v3823_v22 = vmul.f32 %v8073_v62, %v3821_v28 }
0x204c   :  { %3825 = vrot.lane.b32.xlu0 %v3823_v22, %s8415_s26 }
0x20be   :  { %v3826_v1 = vpop.permute.xlu0 %3825 }
0x20bf   :  { %v3828_v35 = vadd.f32 %v3826_v1, %v3818_v51 }
0x20c1   :  { %8074 = vtanh.f32 %v3828_v35  ;;  %v3931_v12 = vrot.slane %v3828_v35, 7 }
0x20c2   :  { %8076 = vpow2.f32 %v6882_v60 }
0x20cb   :  { %v8075_v16 = vpop.eup %8074 }
0x20cc   :  { %3831 = vrot.lane.b32.xlu1 %v8075_v16, %s8415_s26  ;;  %v8077_v18 = vpop.eup %8076 }
0x20cd   :  { %v3809_v44 = vadd.f32 1.0, %v8077_v18 }
0x20cf   :  { %8078 = vrcp.f32 %v3809_v44 }
0x20d9   :  { %v8079_v32 = vpop.eup %8078 }
0x213e   :  { %v3832_v55 = vpop.permute.xlu1 %3831 }
0x213f   :  { %v9568_v31 = vmul.f32 %v8079_v32, %v3832_v55 }
0x2141   :  { %6883 = vmatmul.mubr.msk.f32.vlgmr.msra.gmra.mrb[36].mxu1 %vm2807_vm12, %v9568_v31 }
0x2142   :  { %7469 = vmatpush1.bf16.msra.mxu1 %v9307_v9  ;;  %4134 = vmatprep.mubr.f32.mxu1 %v10164_v56 }
0x2143   :  { %7471 = vmatprep.subr.bf16.mxu1 %v9309_v17 }
0x2146   :  { %7473 = vmatpush1.bf16.msra.mxu1 %v9331_v54 }
0x2147   :  { %7475 = vmatprep.subr.bf16.mxu1 %v9340_v53 }
0x214a   :  { %7477 = vmatpush1.bf16.msra.mxu1 %v9355_v3 }
0x214b   :  { %7479 = vmatprep.subr.bf16.mxu1 %v9359_v21 }
0x214e   :  { %7481 = vmatpush1.bf16.msra.mxu1 %v9368_v33 }
0x214f   :  { %7499 = vmatprep.subr.bf16.mxu1 %v9296_v23 }
0x2214   :  { %v3904_v52 = vpop.f32.mrb[36].mxu1 }
0x2215   :  { %v3906_v13 = vpop.f32.mrb[37].mxu1  ;;  %v3911_v59 = vrot.slane %v3904_v52, 7 }
0x2216   :  { %v3912_v49 = vrot.slane %v3906_v13, 7 }
0x2217   :  { %v3915_v19 = vadd.f32 %v3911_v59, %v9563_v61 }
0x2218   :  { %v3916_v15 = vadd.f32 %v3912_v49, %v9557_v36 }
0x2219   :  { %v6884_v6 = vmul.f32 -1.442695, %v3915_v19 }
0x221a   :  { %8080 = vtanh.f32 %v3916_v15  ;;  %v6885_v57 = vmul.f32 -1.442695, %v3916_v15 }
0x221b   :  { %8082 = vpow2.f32 %v6884_v6 }
0x2224   :  { %v8081_v34 = vpop.eup %8080 }
0x2225   :  { %3935 = vrot.lane.b32.xlu0 %v8081_v34, %s8415_s26  ;;  %v8083_v8 = vpop.eup %8082 }
0x2226   :  { %v3923_v40 = vadd.f32 1.0, %v8083_v8 }
0x2228   :  { %8084 = vrcp.f32 %v3923_v40 }
0x2232   :  { %v8085_v41 = vpop.eup %8084 }
0x2233   :  { %v3933_v10 = vmul.f32 %v8085_v41, %v3931_v12 }
0x2297   :  { %v3936_v46 = vpop.permute.xlu0 %3935 }
0x2298   :  { %v3938_v42 = vmul.f32 %v8085_v41, %v3936_v46 }
0x229a   :  { %3940 = vrot.lane.b32.xlu1 %v3938_v42, %s8415_s26 }
0x230c   :  { %v3941_v30 = vpop.permute.xlu1 %3940 }
0x230d   :  { %v3943_v58 = vadd.f32 %v3941_v30, %v3933_v10 }
0x230f   :  { %8086 = vtanh.f32 %v3943_v58  ;;  %v4047_v22 = vrot.slane %v3943_v58, 7 }
0x2310   :  { %8088 = vpow2.f32 %v6885_v57 }
0x2319   :  { %v8087_v47 = vpop.eup %8086 }
0x231a   :  { %3946 = vrot.lane.b32.xlu0 %v8087_v47, %s8415_s26  ;;  %v8089_v5 = vpop.eup %8088 }
0x231b   :  { %v3924_v2 = vadd.f32 1.0, %v8089_v5 }
0x231d   :  { %8090 = vrcp.f32 %v3924_v2 }
0x2327   :  { %v8091_v11 = vpop.eup %8090 }
0x238c   :  { %v3947_v45 = vpop.permute.xlu0 %3946 }
0x238d   :  { %v3949_v39 = vmul.f32 %v8091_v11, %v3947_v45 }
0x238f   :  { %v3951_v24 = vrot.slane %v3949_v39, 1  ;;  %v4659_v52 = vsel %vm4646_vm13, %v9568_v31, %v3949_v39 }
0x2391   :  { %6886 = vmatmul.mubr.msk.f32.vlgmr.msra.gmra.mrb[40].mxu0 %vm2807_vm12, %v3951_v24 }
0x2392   :  { %7485 = vmatpush1.bf16.msra.mxu0 %v9307_v9  ;;  %4250 = vmatprep.mubr.f32.mxu0 %v10164_v56 }
0x2393   :  { %7487 = vmatprep.subr.bf16.mxu0 %v9309_v17 }
0x2396   :  { %7489 = vmatpush1.bf16.msra.mxu0 %v9331_v54 }
0x2397   :  { %7491 = vmatprep.subr.bf16.mxu0 %v9340_v53 }
0x239a   :  { %7493 = vmatpush1.bf16.msra.mxu0 %v9355_v3 }
0x239b   :  { %7495 = vmatprep.subr.bf16.mxu0 %v9359_v21 }
0x239e   :  { %7497 = vmatpush1.bf16.msra.mxu0 %v9368_v33 }
0x239f   :  { %7515 = vmatprep.subr.bf16.mxu0 %v9296_v23 }
0x2464   :  { %v4020_v48 = vpop.f32.mrb[40].mxu0 }
0x2465   :  { %v4022_v4 = vpop.f32.mrb[41].mxu0  ;;  %v4027_v27 = vrot.slane %v4020_v48, 6 }
0x2466   :  { %v4028_v14 = vrot.slane %v4022_v4, 6 }
0x2467   :  { %v4031_v29 = vadd.f32 %v4027_v27, %v9563_v61 }
0x2468   :  { %v4032_v43 = vadd.f32 %v4028_v14, %v9557_v36 }
0x2469   :  { %v6887_v7 = vmul.f32 -1.442695, %v4031_v29 }
0x246a   :  { %8092 = vtanh.f32 %v4032_v43  ;;  %v6888_v16 = vmul.f32 -1.442695, %v4032_v43 }
0x246b   :  { %8094 = vpow2.f32 %v6887_v7 }
0x2474   :  { %v8093_v50 = vpop.eup %8092 }
0x2475   :  { %4051 = vrot.lane.b32.xlu1 %v8093_v50, %s8415_s26  ;;  %v8095_v37 = vpop.eup %8094 }
0x2476   :  { %v4039_v38 = vadd.f32 1.0, %v8095_v37 }
0x2478   :  { %8096 = vrcp.f32 %v4039_v38 }
0x2482   :  { %v8097_v20 = vpop.eup %8096 }
0x2483   :  { %v4049_v26 = vmul.f32 %v8097_v20, %v4047_v22 }
0x24e7   :  { %v4052_v62 = vpop.permute.xlu1 %4051 }
0x24e8   :  { %v4054_v28 = vmul.f32 %v8097_v20, %v4052_v62 }
0x24ea   :  { %4056 = vrot.lane.b32.xlu0 %v4054_v28, %s8415_s26 }
0x255c   :  { %v4057_v51 = vpop.permute.xlu0 %4056 }
0x255d   :  { %v4059_v1 = vadd.f32 %v4057_v51, %v4049_v26 }
0x255f   :  { %8098 = vtanh.f32 %v4059_v1  ;;  %v4163_v10 = vrot.slane %v4059_v1, 7 }
0x2560   :  { %8100 = vpow2.f32 %v6888_v16 }
0x2569   :  { %v8099_v35 = vpop.eup %8098 }
0x256a   :  { %4062 = vrot.lane.b32.xlu1 %v8099_v35, %s8415_s26  ;;  %v8101_v60 = vpop.eup %8100 }
0x256b   :  { %v4040_v18 = vadd.f32 1.0, %v8101_v60 }
0x256d   :  { %8102 = vrcp.f32 %v4040_v18 }
0x2577   :  { %v8103_v44 = vpop.eup %8102 }
0x25dc   :  { %v4063_v32 = vpop.permute.xlu1 %4062 }
0x25dd   :  { %v4065_v55 = vmul.f32 %v8103_v44, %v4063_v32 }
0x25df   :  { %v4067_v13 = vrot.slane %v4065_v55, 2  ;;  %v4660_v49 = vsel %vm4648_vm14, %v4659_v52, %v4065_v55 }
0x25e1   :  { %6889 = vmatmul.mubr.msk.f32.vlgmr.msra.gmra.mrb[38].mxu1 %vm2807_vm12, %v4067_v13 }
0x25e2   :  { %7501 = vmatpush1.bf16.msra.mxu1 %v9307_v9  ;;  %4366 = vmatprep.mubr.f32.mxu1 %v10164_v56 }
0x25e3   :  { %7503 = vmatprep.subr.bf16.mxu1 %v9309_v17 }
0x25e6   :  { %7505 = vmatpush1.bf16.msra.mxu1 %v9331_v54 }
0x25e7   :  { %7507 = vmatprep.subr.bf16.mxu1 %v9340_v53 }
0x25ea   :  { %7509 = vmatpush1.bf16.msra.mxu1 %v9355_v3 }
0x25eb   :  { %7511 = vmatprep.subr.bf16.mxu1 %v9359_v21 }
0x25ee   :  { %7513 = vmatpush1.bf16.msra.mxu1 %v9368_v33 }
0x25ef   :  { %7531 = vmatprep.subr.bf16.mxu1 %v9296_v23 }
0x26b4   :  { %v4136_v31 = vpop.f32.mrb[38].mxu1 }
0x26b5   :  { %v4138_v15 = vpop.f32.mrb[39].mxu1  ;;  %v4143_v6 = vrot.slane %v4136_v31, 5 }
0x26b6   :  { %v4144_v34 = vrot.slane %v4138_v15, 5 }
0x26b7   :  { %v4147_v8 = vadd.f32 %v4143_v6, %v9563_v61 }
0x26b8   :  { %v4148_v59 = vadd.f32 %v4144_v34, %v9557_v36 }
0x26b9   :  { %v6890_v40 = vmul.f32 -1.442695, %v4147_v8 }
0x26ba   :  { %8104 = vtanh.f32 %v4148_v59  ;;  %v6891_v5 = vmul.f32 -1.442695, %v4148_v59 }
0x26bb   :  { %8106 = vpow2.f32 %v6890_v40 }
0x26c4   :  { %v8105_v19 = vpop.eup %8104 }
0x26c5   :  { %4167 = vrot.lane.b32.xlu0 %v8105_v19, %s8415_s26  ;;  %v8107_v41 = vpop.eup %8106 }
0x26c6   :  { %v4155_v46 = vadd.f32 1.0, %v8107_v41 }
0x26c8   :  { %8108 = vrcp.f32 %v4155_v46 }
0x26d2   :  { %v8109_v42 = vpop.eup %8108 }
0x26d3   :  { %v4165_v30 = vmul.f32 %v8109_v42, %v4163_v10 }
0x2737   :  { %v4168_v12 = vpop.permute.xlu0 %4167 }
0x2738   :  { %v4170_v23 = vmul.f32 %v8109_v42, %v4168_v12  ;;  %v4683_v12 = vld [vmem:[%s10136_s18 + $0x8] sm:$0xff] }
0x273a   :  { %4172 = vrot.lane.b32.xlu1 %v4170_v23, %s8415_s26  ;;  %v4685_v23 = vld [vmem:[%s10136_s18 + $0x18] sm:$0xff] }
0x273b   :  { %v7546_v10 = vpack.c.bf16 %v4685_v23, %v4683_v12  ;;  %v4673_v12 = vld [vmem:[%s10137_s19 + $0x38] sm:$0xff] }
0x27ac   :  { %v4173_v58 = vpop.permute.xlu1 %4172 }
0x27ad   :  { %v4175_v47 = vadd.f32 %v4173_v58, %v4165_v30 }
0x27af   :  { %8110 = vtanh.f32 %v4175_v47  ;;  %v4279_v51 = vrot.slane %v4175_v47, 7 }
0x27b0   :  { %8112 = vpow2.f32 %v6891_v5  ;;  %v4682_v5 = vld [vmem:[%s10136_s18] sm:$0xff] }
0x27b9   :  { %v8111_v57 = vpop.eup %8110 }
0x27ba   :  { %4178 = vrot.lane.b32.xlu0 %v8111_v57, %s8415_s26  ;;  %v8113_v2 = vpop.eup %8112 }
0x27bb   :  { %v4156_v11 = vadd.f32 1.0, %v8113_v2  ;;  %v4684_v2 = vld [vmem:[%s10136_s18 + $0x10] sm:$0xff] }
0x27bd   :  { %8114 = vrcp.f32 %v4156_v11 }
0x27c7   :  { %v8115_v45 = vpop.eup %8114 }
0x282c   :  { %v4179_v39 = vpop.permute.xlu0 %4178 }
0x282d   :  { %v4181_v24 = vmul.f32 %v8115_v45, %v4179_v39  ;;  %v4687_v39 = vld [vmem:[%s10136_s18 + $0x28] sm:$0xff] }
0x282f   :  { %v4183_v48 = vrot.slane %v4181_v24, 3  ;;  %v4661_v4 = vsel %vm4650_vm15, %v4660_v49, %v4181_v24  ;;  %v4689_v24 = vld [vmem:[%s10136_s18 + $0x38] sm:$0xff] }
0x2831   :  { %6892 = vmatmul.mubr.msk.f32.vlgmr.msra.gmra.mrb[42].mxu0 %vm2807_vm12, %v4183_v48 }
0x2832   :  { %7517 = vmatpush1.bf16.msra.mxu0 %v9307_v9  ;;  %4482 = vmatprep.mubr.f32.mxu0 %v10164_v56 }
0x2833   :  { %7519 = vmatprep.subr.bf16.mxu0 %v9309_v17 }
0x2836   :  { %7521 = vmatpush1.bf16.msra.mxu0 %v9331_v54 }
0x2837   :  { %7523 = vmatprep.subr.bf16.mxu0 %v9340_v53 }
0x283a   :  { %7525 = vmatpush1.bf16.msra.mxu0 %v9355_v3 }
0x283b   :  { %7527 = vmatprep.subr.bf16.mxu0 %v9359_v21 }
0x283e   :  { %7529 = vmatpush1.bf16.msra.mxu0 %v9368_v33 }
0x283f   :  { %7547 = vmatprep.subr.bf16.mxu0 %v7546_v10  ;;  %v4670_v10 = vld [vmem:[%s10137_s19 + $0x20] sm:$0xff] }
0x2904   :  { %v4252_v14 = vpop.f32.mrb[42].mxu0 }
0x2905   :  { %v4254_v43 = vpop.f32.mrb[43].mxu0  ;;  %v4259_v7 = vrot.slane %v4252_v14, 4 }
0x2906   :  { %v4260_v50 = vrot.slane %v4254_v43, 4 }
0x2907   :  { %v4263_v37 = vadd.f32 %v4259_v7, %v9563_v61  ;;  %v4691_v7 = vld [vmem:[%s10136_s18 + $0x48] sm:$0xff] }
0x2908   :  { %v4264_v27 = vadd.f32 %v4260_v50, %v9557_v36  ;;  %v7550_v50 = vpack.c.bf16 %v4689_v24, %v4687_v39  ;;  %v4679_v24 = vld [vmem:[%s10137_s19 + $0x68] sm:$0xff] }
0x2909   :  { %v6893_v38 = vmul.f32 -1.442695, %v4263_v37  ;;  %v4693_v37 = vld [vmem:[%s10136_s18 + $0x58] sm:$0xff] }
0x290a   :  { %8116 = vtanh.f32 %v4264_v27  ;;  %v6894_v18 = vmul.f32 -1.442695, %v4264_v27  ;;  %v4686_v27 = vld [vmem:[%s10136_s18 + $0x20] sm:$0xff] }
0x290b   :  { %8118 = vpow2.f32 %v6893_v38 }
0x2914   :  { %v8117_v29 = vpop.eup %8116 }
0x2915   :  { %4283 = vrot.lane.b32.xlu1 %v8117_v29, %s8415_s26  ;;  %v8119_v20 = vpop.eup %8118  ;;  %v4688_v29 = vld [vmem:[%s10136_s18 + $0x30] sm:$0xff] }
0x2916   :  { %v4271_v62 = vadd.f32 1.0, %v8119_v20  ;;  %v7552_v38 = vpack.c.bf16 %v4688_v29, %v4686_v27  ;;  %v7554_v20 = vpack.c.bf16 %v4693_v37, %v4691_v7 }
0x2918   :  { %8120 = vrcp.f32 %v4271_v62  ;;  %v4690_v62 = vld [vmem:[%s10136_s18 + $0x40] sm:$0xff] }
0x2922   :  { %v8121_v28 = vpop.eup %8120 }
0x2923   :  { %v4281_v1 = vmul.f32 %v8121_v28, %v4279_v51 }
0x2987   :  { %v4284_v22 = vpop.permute.xlu1 %4283 }
0x2988   :  { %v4286_v26 = vmul.f32 %v8121_v28, %v4284_v22  ;;  %v4692_v28 = vld [vmem:[%s10136_s18 + $0x50] sm:$0xff]  ;;  %v4695_v22 = vld [vmem:[%s10136_s18 + $0x68] sm:$0xff] }
0x2989   :  { %v7556_v51 = vpack.c.bf16 %v4692_v28, %v4690_v62 }
0x298a   :  { %4288 = vrot.lane.b32.xlu0 %v4286_v26, %s8415_s26  ;;  %v4697_v26 = vld [vmem:[%s10136_s18 + $0x78] sm:$0xff] }
0x29fc   :  { %v4289_v35 = vpop.permute.xlu0 %4288 }
0x29fd   :  { %v4291_v16 = vadd.f32 %v4289_v35, %v4281_v1  ;;  %v7558_v1 = vpack.c.bf16 %v4697_v26, %v4695_v22  ;;  %v4694_v35 = vld [vmem:[%s10136_s18 + $0x60] sm:$0xff] }
0x29ff   :  { %8122 = vtanh.f32 %v4291_v16  ;;  %v4395_v40 = vrot.slane %v4291_v16, 7  ;;  %v4696_v16 = vld [vmem:[%s10136_s18 + $0x70] sm:$0xff] }
0x2a00   :  { %8124 = vpow2.f32 %v6894_v18 }
0x2a09   :  { %v8123_v60 = vpop.eup %8122 }
0x2a0a   :  { %4294 = vrot.lane.b32.xlu1 %v8123_v60, %s8415_s26  ;;  %v8125_v44 = vpop.eup %8124  ;;  %v7560_v60 = vpack.c.bf16 %v4696_v16, %v4694_v35  ;;  %v4698_v35 = vld [vmem:[%s10138_s20] sm:$0x3] }
0x2a0b   :  { %v4272_v32 = vadd.f32 1.0, %v8125_v44  ;;  %v9824_v16 = vrot.slane %v4698_v35, %v8666_v0 }
0x2a0d   :  { %8126 = vrcp.f32 %v4272_v32 }
0x2a17   :  { %v8127_v55 = vpop.eup %8126 }
0x2a7c   :  { %v4295_v52 = vpop.permute.xlu1 %4294 }
0x2a7d   :  { %v4297_v13 = vmul.f32 %v8127_v55, %v4295_v52 }
0x2a7f   :  { %v4299_v49 = vrot.slane %v4297_v13, 4  ;;  %v4662_v31 = vsel %vm4652_vm2, %v4661_v4, %v4297_v13  ;;  %v7548_v4 = vpack.c.bf16 %v4684_v2, %v4682_v5  ;;  %v4674_v2 = vld [vmem:[%s10137_s19 + $0x40] sm:$0xff] }
0x2a81   :  { %6895 = vmatmul.mubr.msk.f32.vlgmr.msra.gmra.mrb[40].mxu1 %vm2807_vm12, %v4299_v49 }
0x2a82   :  { %7533 = vmatpush1.bf16.msra.mxu1 %v9307_v9  ;;  %4598 = vmatprep.mubr.f32.mxu1 %v10164_v56 }
0x2a83   :  { %7535 = vmatprep.subr.bf16.mxu1 %v9309_v17 }
0x2a86   :  { %7537 = vmatpush1.bf16.msra.mxu1 %v9331_v54 }
0x2a87   :  { %7539 = vmatprep.subr.bf16.mxu1 %v9340_v53 }
0x2a8a   :  { %7541 = vmatpush1.bf16.msra.mxu1 %v9355_v3 }
0x2a8b   :  { %7543 = vmatprep.subr.bf16.mxu1 %v9359_v21 }
0x2a8e   :  { %7545 = vmatpush1.bf16.msra.mxu1 %v9368_v33 }
0x2b54   :  { %v4368_v15 = vpop.f32.mrb[40].mxu1 }
0x2b55   :  { %v4370_v34 = vpop.f32.mrb[41].mxu1  ;;  %v4375_v17 = vrot.slane %v4368_v15, 3 }
0x2b56   :  { %v4376_v59 = vrot.slane %v4370_v34, 3 }
0x2b57   :  { %v4379_v54 = vadd.f32 %v4375_v17, %v9563_v61 }
0x2b58   :  { %v4380_v19 = vadd.f32 %v4376_v59, %v9557_v36 }
0x2b59   :  { %v6896_v6 = vmul.f32 -1.442695, %v4379_v54 }
0x2b5a   :  { %8128 = vtanh.f32 %v4380_v19  ;;  %v6897_v58 = vmul.f32 -1.442695, %v4380_v19 }
0x2b5b   :  { %8130 = vpow2.f32 %v6896_v6 }
0x2b64   :  { %v8129_v9 = vpop.eup %8128 }
0x2b65   :  { %4399 = vrot.lane.b32.xlu0 %v8129_v9, %s8415_s26  ;;  %v8131_v53 = vpop.eup %8130 }
0x2b66   :  { %v4387_v3 = vadd.f32 1.0, %v8131_v53 }
0x2b68   :  { %8132 = vrcp.f32 %v4387_v3 }
0x2b72   :  { %v8133_v21 = vpop.eup %8132 }
0x2b73   :  { %v4397_v41 = vmul.f32 %v8133_v21, %v4395_v40  ;;  %v4666_v40 = vld [vmem:[%s10137_s19] sm:$0xff] }
0x2bd7   :  { %v4400_v8 = vpop.permute.xlu0 %4399 }
0x2bd8   :  { %v4402_v33 = vmul.f32 %v8133_v21, %v4400_v8  ;;  %v4667_v21 = vld [vmem:[%s10137_s19 + $0x8] sm:$0xff]  ;;  %v4669_v8 = vld [vmem:[%s10137_s19 + $0x18] sm:$0xff] }
0x2bda   :  { %4404 = vrot.lane.b32.xlu1 %v4402_v33, %s8415_s26  ;;  %v9726_v33 = vpack.c.bf16 %v4669_v8, %v4667_v21 }
0x2bdc   :  { %7563 = vmatprep.subr.bf16.mxu1 %v9726_v33 }
0x2c4c   :  { %v4405_v46 = vpop.permute.xlu1 %4404 }
0x2c4d   :  { %v9648_v42 = vadd.f32 %v4405_v46, %v4397_v41  ;;  %v4668_v41 = vld [vmem:[%s10137_s19 + $0x10] sm:$0xff] }
0x2c4e   :  { %v9735_v46 = vpack.c.bf16 %v4668_v41, %v4666_v40 }
0x2c4f   :  { %8134 = vtanh.f32 %v9648_v42  ;;  %v4511_v54 = vrot.slane %v9648_v42, 7  ;;  %v4671_v42 = vld [vmem:[%s10137_s19 + $0x28] sm:$0xff] }
0x2c50   :  { %8136 = vpow2.f32 %v6897_v58  ;;  %v9744_v23 = vpack.c.bf16 %v4673_v12, %v4671_v42 }
0x2c59   :  { %v8135_v30 = vpop.eup %8134 }
0x2c5a   :  { %4410 = vrot.lane.b32.xlu0 %v8135_v30, %s8415_s26  ;;  %v8137_v47 = vpop.eup %8136  ;;  %v4672_v30 = vld [vmem:[%s10137_s19 + $0x30] sm:$0xff] }
0x2c5b   :  { %v4388_v57 = vadd.f32 1.0, %v8137_v47  ;;  %v9754_v58 = vpack.c.bf16 %v4672_v30, %v4670_v10  ;;  %v4675_v47 = vld [vmem:[%s10137_s19 + $0x48] sm:$0xff] }
0x2c5d   :  { %8138 = vrcp.f32 %v4388_v57  ;;  %v4677_v57 = vld [vmem:[%s10137_s19 + $0x58] sm:$0xff] }
0x2c5e   :  { %v9762_v5 = vpack.c.bf16 %v4677_v57, %v4675_v47 }
0x2c67   :  { %v8139_v11 = vpop.eup %8138 }
0x2ccc   :  { %v4411_v45 = vpop.permute.xlu0 %4410 }
0x2ccd   :  { %v4413_v48 = vmul.f32 %v8139_v11, %v4411_v45  ;;  %v4676_v11 = vld [vmem:[%s10137_s19 + $0x50] sm:$0xff] }
0x2cce   :  { %v9773_v39 = vpack.c.bf16 %v4676_v11, %v4674_v2 }
0x2ccf   :  { %v4415_v14 = vrot.slane %v4413_v48, 5  ;;  %v9671_v43 = vsel %vm93_vm0, %v4662_v31, %v4413_v48  ;;  %v4681_v48 = vld [vmem:[%s10137_s19 + $0x78] sm:$0xff]  ;;  %vm6647_vm0 = vcmask 261120  }
0x2cd1   :  { %6898 = vmatmul.mubr.msk.f32.vlgmr.msra.gmra.mrb[44].mxu0 %vm2807_vm12, %v4415_v14  ;;  %v4678_v14 = vld [vmem:[%s10137_s19 + $0x60] sm:$0xff] }
0x2cd2   :  { %7549 = vmatpush1.bf16.msra.mxu0 %v7548_v4  ;;  %4780 = vmatprep.mubr.f32.mxu0 %v10164_v56  ;;  %v9781_v4 = vpack.c.bf16 %v4681_v48, %v4679_v24 }
0x2cd3   :  { %7551 = vmatprep.subr.bf16.mxu0 %v7550_v50  ;;  %v4680_v50 = vld [vmem:[%s10137_s19 + $0x70] sm:$0xff] }
0x2cd4   :  { %v9791_v27 = vpack.c.bf16 %v4680_v50, %v4678_v14 }
0x2cd6   :  { %7553 = vmatpush1.bf16.msra.mxu0 %v7552_v38 }
0x2cd7   :  { %7555 = vmatprep.subr.bf16.mxu0 %v7554_v20 }
0x2cda   :  { %7557 = vmatpush1.bf16.msra.mxu0 %v7556_v51 }
0x2cdb   :  { %7559 = vmatprep.subr.bf16.mxu0 %v7558_v1 }
0x2cde   :  { %7561 = vmatpush1.bf16.msra.mxu0 %v7560_v60 }
0x2cdf   :  { %7579 = vmatprep.subr.bf16.mxu0 %v9726_v33 }
0x2ce1   :  { %6904 = vmatmul.mubr.msk.f32.vlgmr.msra.gmra.mrb[46].mxu0 %vm2807_vm12, %v9543_v25 }
0x2ce2   :  { %4786 = vmatprep.mubr.f32.mxu0 %v10164_v56  ;;  %7581 = vmatpush1.bf16.msra.mxu0 %v9735_v46 }
0x2ce3   :  { %7583 = vmatprep.subr.bf16.mxu0 %v9744_v23 }
0x2ce6   :  { %7585 = vmatpush1.bf16.msra.mxu0 %v9754_v58 }
0x2ce7   :  { %7587 = vmatprep.subr.bf16.mxu0 %v9762_v5 }
0x2cea   :  { %7589 = vmatpush1.bf16.msra.mxu0 %v9773_v39 }
0x2ceb   :  { %7591 = vmatprep.subr.bf16.mxu0 %v9781_v4 }
0x2cee   :  { %7593 = vmatpush1.bf16.msra.mxu0 %v9791_v27 }
0x2cef   :  { %7611 = vmatprep.subr.bf16.mxu0 %v9726_v33 }
0x2da4   :  { %v4484_v18 = vpop.f32.mrb[44].mxu0 }
0x2da5   :  { %v4486_v44 = vpop.f32.mrb[45].mxu0  ;;  %v4491_v31 = vrot.slane %v4484_v18, 2 }
0x2da6   :  { %v4492_v32 = vrot.slane %v4486_v44, 2 }
0x2da7   :  { %v4495_v15 = vadd.f32 %v4491_v31, %v9563_v61 }
0x2da8   :  { %v4496_v55 = vadd.f32 %v4492_v32, %v9557_v36 }
0x2da9   :  { %v6899_v34 = vmul.f32 -1.442695, %v4495_v15  ;;  %v9835_v15 = vrot.slane %v4698_v35, %v8663_v63 }
0x2daa   :  { %8140 = vtanh.f32 %v4496_v55  ;;  %v6900_v29 = vmul.f32 -1.442695, %v4496_v55 }
0x2dab   :  { %8142 = vpow2.f32 %v6899_v34 }
0x2db4   :  { %v8141_v52 = vpop.eup %8140  ;;  %v9709_v13 = vpop.f32.mrb[46].mxu0 }
0x2db5   :  { %v9711_v49 = vpop.f32.mrb[47].mxu0  ;;  %4515 = vrot.lane.b32.xlu1 %v8141_v52, %s8415_s26  ;;  %v8143_v25 = vpop.eup %8142  ;;  %v9839_v34 = vadd.f32 %v9709_v13, %v9835_v15 }
0x2db6   :  { %v4503_v59 = vadd.f32 1.0, %v8143_v25  ;;  %v9829_v32 = vadd.f32 %v9711_v49, %v9824_v16 }
0x2db8   :  { %8144 = vrcp.f32 %v4503_v59 }
0x2dc2   :  { %v8145_v19 = vpop.eup %8144 }
0x2dc3   :  { %v4513_v6 = vmul.f32 %v8145_v19, %v4511_v54 }
0x2e27   :  { %v4516_v9 = vpop.permute.xlu1 %4515 }
0x2e28   :  { %v4518_v17 = vmul.f32 %v8145_v19, %v4516_v9 }
0x2e2a   :  { %4520 = vrot.lane.b32.xlu0 %v4518_v17, %s8415_s26 }
0x2e9c   :  { %v4521_v53 = vpop.permute.xlu0 %4520 }
0x2e9d   :  { %v9717_v3 = vadd.f32 %v4521_v53, %v4513_v6 }
0x2e9f   :  { %8146 = vtanh.f32 %v9717_v3  ;;  %v4627_v13 = vrot.slane %v9717_v3, 7 }
0x2ea0   :  { %8148 = vpow2.f32 %v6900_v29 }
0x2ea9   :  { %v8147_v45 = vpop.eup %8146 }
0x2eaa   :  { %4526 = vrot.lane.b32.xlu1 %v8147_v45, %s8415_s26  ;;  %v8149_v7 = vpop.eup %8148 }
0x2eab   :  { %v4504_v37 = vadd.f32 1.0, %v8149_v7 }
0x2ead   :  { %8150 = vrcp.f32 %v4504_v37 }
0x2eb7   :  { %v8151_v38 = vpop.eup %8150 }
0x2f1c   :  { %v4527_v20 = vpop.permute.xlu1 %4526 }
0x2f1d   :  { %v4529_v62 = vmul.f32 %v8151_v38, %v4527_v20 }
0x2f1f   :  { %v4531_v28 = vrot.slane %v4529_v62, 6  ;;  %v9797_v22 = vsel %vm4655_vm3, %v9671_v43, %v4529_v62 }
0x2f21   :  { %6901 = vmatmul.mubr.msk.f32.vlgmr.msra.gmra.mrb[42].mxu1 %vm2807_vm12, %v4531_v28 }
0x2f22   :  { %7565 = vmatpush1.bf16.msra.mxu1 %v9735_v46  ;;  %4857 = vmatprep.mubr.f32.mxu1 %v10164_v56 }
0x2f23   :  { %7567 = vmatprep.subr.bf16.mxu1 %v9744_v23 }
0x2f26   :  { %7569 = vmatpush1.bf16.msra.mxu1 %v9754_v58 }
0x2f27   :  { %7571 = vmatprep.subr.bf16.mxu1 %v9762_v5 }
0x2f2a   :  { %7573 = vmatpush1.bf16.msra.mxu1 %v9773_v39 }
0x2f2b   :  { %7575 = vmatprep.subr.bf16.mxu1 %v9781_v4 }
0x2f2e   :  { %7577 = vmatpush1.bf16.msra.mxu1 %v9791_v27 }
0x2f2f   :  { %7595 = vmatprep.subr.bf16.mxu1 %v9726_v33 }
0x2f31   :  { %4858 = vmatmul.mubr.f32.vlgmr.msra.gmra.mrb[44].mxu1 %v10164_v56 }
0x2f32   :  { %7597 = vmatpush1.bf16.msra.mxu1 %v9735_v46  ;;  %5079 = vmatprep.mubr.f32.mxu1 %v10164_v56 }
0x2f33   :  { %7599 = vmatprep.subr.bf16.mxu1 %v9744_v23 }
0x2f36   :  { %7601 = vmatpush1.bf16.msra.mxu1 %v9754_v58 }
0x2f37   :  { %7603 = vmatprep.subr.bf16.mxu1 %v9762_v5 }
0x2f3a   :  { %7605 = vmatpush1.bf16.msra.mxu1 %v9773_v39 }
0x2f3b   :  { %7607 = vmatprep.subr.bf16.mxu1 %v9781_v4 }
0x2f3e   :  { %7609 = vmatpush1.bf16.msra.mxu1 %v9791_v27 }
0x2f3f   :  { %7627 = vmatprep.subr.bf16.mxu1 %v9726_v33 }
0x2ff4   :  { %v4600_v43 = vpop.f32.mrb[42].mxu1 }
0x2ff5   :  { %v4602_v26 = vpop.f32.mrb[43].mxu1  ;;  %v4607_v52 = vrot.slane %v4600_v43, 1 }
0x2ff6   :  { %v4608_v51 = vrot.slane %v4602_v26, 1 }
0x2ff7   :  { %v4611_v31 = vadd.f32 %v4607_v52, %v9563_v61 }
0x2ff8   :  { %v4612_v1 = vadd.f32 %v4608_v51, %v9557_v36 }
0x2ff9   :  { %v6902_v0 = vmul.f32 -1.442695, %v4611_v31 }
0x2ffa   :  { %8152 = vtanh.f32 %v4612_v1  ;;  %v6903_v57 = vmul.f32 -1.442695, %v4612_v1 }
0x3004   :  { %v8153_v60 = vpop.eup %8152  ;;  %v4859_v18 = vpop.f32.mrb[44].mxu1 }
0x3005   :  { %v4861_v44 = vpop.f32.mrb[45].mxu1  ;;  %4631 = vrot.lane.b32.xlu0 %v8153_v60, %s8415_s26  ;;  %v4864_v25 = vadd.f32 %v4859_v18, %v9839_v34 }
0x3006   :  { %v4865_v55 = vadd.f32 %v4861_v44, %v9829_v32 }
0x3007   :  { %v6906_v19 = vmul.f32 -1.442695, %v4864_v25 }
0x3008   :  { %8154 = vtanh.f32 %v4865_v55  ;;  %v6907_v45 = vmul.f32 -1.442695, %v4865_v55 }
0x3009   :  { %8156 = vpow2.f32 %v6902_v0 }
0x3012   :  { %v8155_v36 = vpop.eup %8154 }
0x3013   :  { %4881 = vrot.lane.b32.xlu1 %v8155_v36, %s8415_s26  ;;  %v8157_v49 = vpop.eup %8156 }
0x3014   :  { %v4619_v59 = vadd.f32 1.0, %v8157_v49 }
0x3016   :  { %8158 = vrcp.f32 %v4619_v59 }
0x3017   :  { %8160 = vpow2.f32 %v6906_v19 }
0x3020   :  { %v8159_v9 = vpop.eup %8158 }
0x3021   :  { %v8161_v54 = vpop.eup %8160  ;;  %v4629_v8 = vmul.f32 %v8159_v9, %v4627_v13 }
0x3022   :  { %v4872_v6 = vadd.f32 1.0, %v8161_v54 }
0x3024   :  { %8162 = vrcp.f32 %v4872_v6 }
0x302e   :  { %v8163_v63 = vpop.eup %8162 }
0x302f   :  { %v4879_v12 = vmul.f32 0.0, %v8163_v63 }
0x3077   :  { %v4632_v17 = vpop.permute.xlu0 %4631 }
0x3078   :  { %v4634_v61 = vmul.f32 %v8159_v9, %v4632_v17 }
0x307a   :  { %4636 = vrot.lane.b32.xlu0 %v4634_v61, %s8415_s26 }
0x3085   :  { %v4882_v53 = vpop.permute.xlu1 %4881 }
0x3086   :  { %v4884_v21 = vmul.f32 %v8163_v63, %v4882_v53 }
0x3088   :  { %4886 = vrot.lane.b32.xlu1 %v4884_v21, %s8415_s26 }
0x30ec   :  { %v4637_v40 = vpop.permute.xlu0 %4636 }
0x30ed   :  { %v4639_v41 = vadd.f32 %v4637_v40, %v4629_v8 }
0x30ef   :  { %8164 = vtanh.f32 %v4639_v41 }
0x30f9   :  { %v8165_v42 = vpop.eup %8164 }
0x30fa   :  { %4642 = vrot.lane.b32.xlu0 %v8165_v42, %s8415_s26  ;;  %v4887_v10 = vpop.permute.xlu1 %4886 }
0x30fb   :  { %v4889_v30 = vadd.f32 %v4887_v10, %v4879_v12 }
0x30fd   :  { %8166 = vtanh.f32 %v4889_v30  ;;  %v4992_v31 = vrot.slane %v4889_v30, 7 }
0x30fe   :  { %8168 = vpow2.f32 %v6903_v57 }
0x3107   :  { %v8167_v47 = vpop.eup %8166 }
0x3108   :  { %4892 = vrot.lane.b32.xlu1 %v8167_v47, %s8415_s26  ;;  %v8169_v2 = vpop.eup %8168 }
0x3109   :  { %v4620_v11 = vadd.f32 1.0, %v8169_v2 }
0x310b   :  { %8170 = vrcp.f32 %v4620_v11 }
0x310c   :  { %8172 = vpow2.f32 %v6907_v45 }
0x3115   :  { %v8171_v3 = vpop.eup %8170 }
0x3116   :  { %v8173_v48 = vpop.eup %8172 }
0x3117   :  { %v4873_v29 = vadd.f32 1.0, %v8173_v48 }
0x3119   :  { %8174 = vrcp.f32 %v4873_v29 }
0x3123   :  { %v8175_v7 = vpop.eup %8174 }
0x316c   :  { %v4643_v24 = vpop.permute.xlu0 %4642 }
0x316d   :  { %v4645_v14 = vmul.f32 %v8171_v3, %v4643_v24 }
0x316f   :  { %v4665_v50 = vsel %vm4657_vm4, %v9797_v22, %v4645_v14 }
0x3170   :  { %6905 = vmatmul.mubr.msk.f32.gmra.mrb[48].mxu0 %vm2807_vm12, %v4665_v50 }
0x3171   :  { %4963 = vmatprep.mubr.f32.mxu0 %v10164_v56 }
0x317a   :  { %v4893_v37 = vpop.permute.xlu1 %4892 }
0x317b   :  { %v4895_v38 = vmul.f32 %v8175_v7, %v4893_v37 }
0x317d   :  { %6908 = vmatmul.mubr.msk.f32.vlgmr.msra.gmra.mrb[50].mxu0 %vm2807_vm12, %v4895_v38 }
0x317e   :  { %7613 = vmatpush1.bf16.msra.mxu0 %v9735_v46  ;;  %5195 = vmatprep.mubr.f32.mxu0 %v10164_v56 }
0x317f   :  { %7615 = vmatprep.subr.bf16.mxu0 %v9744_v23 }
0x3182   :  { %7617 = vmatpush1.bf16.msra.mxu0 %v9754_v58 }
0x3183   :  { %7619 = vmatprep.subr.bf16.mxu0 %v9762_v5 }
0x3186   :  { %7621 = vmatpush1.bf16.msra.mxu0 %v9773_v39 }
0x3187   :  { %7623 = vmatprep.subr.bf16.mxu0 %v9781_v4 }
0x318a   :  { %7625 = vmatpush1.bf16.msra.mxu0 %v9791_v27 }
0x318b   :  { %7643 = vmatprep.subr.bf16.mxu0 %v9726_v33 }
0x3243   :  { %v9861_v20 = vpop.f32.mrb[48].mxu0 }
0x3244   :  { %v9863_v62 = vpop.f32.mrb[49].mxu0 }
0x3250   :  { %v4965_v28 = vpop.f32.mrb[50].mxu0 }
0x3251   :  { %v4967_v22 = vpop.f32.mrb[51].mxu0  ;;  %v4972_v1 = vrot.slane %v4965_v28, 7 }
0x3252   :  { %v4973_v43 = vrot.slane %v4967_v22, 7 }
0x3253   :  { %v4976_v35 = vadd.f32 %v4972_v1, %v9839_v34 }
0x3254   :  { %v4977_v26 = vadd.f32 %v4973_v43, %v9829_v32 }
0x3255   :  { %v6909_v60 = vmul.f32 -1.442695, %v4976_v35 }
0x3256   :  { %8176 = vtanh.f32 %v4977_v26  ;;  %v6910_v19 = vmul.f32 -1.442695, %v4977_v26 }
0x3257   :  { %8178 = vpow2.f32 %v6909_v60 }
0x3260   :  { %v8177_v51 = vpop.eup %8176 }
0x3261   :  { %4996 = vrot.lane.b32.xlu0 %v8177_v51, %s8415_s26  ;;  %v8179_v18 = vpop.eup %8178 }
0x3262   :  { %v4984_v44 = vadd.f32 1.0, %v8179_v18 }
0x3264   :  { %8180 = vrcp.f32 %v4984_v44 }
0x326e   :  { %v8181_v55 = vpop.eup %8180 }
0x326f   :  { %v4994_v0 = vmul.f32 %v8181_v55, %v4992_v31 }
0x32d3   :  { %v4997_v36 = vpop.permute.xlu0 %4996 }
0x32d4   :  { %v4999_v52 = vmul.f32 %v8181_v55, %v4997_v36 }
0x32d6   :  { %5001 = vrot.lane.b32.xlu1 %v4999_v52, %s8415_s26 }
0x3348   :  { %v5002_v49 = vpop.permute.xlu1 %5001 }
0x3349   :  { %v5004_v25 = vadd.f32 %v5002_v49, %v4994_v0 }
0x334b   :  { %8182 = vtanh.f32 %v5004_v25  ;;  %v5108_v11 = vrot.slane %v5004_v25, 7 }
0x334c   :  { %8184 = vpow2.f32 %v6910_v19 }
0x3355   :  { %v8183_v59 = vpop.eup %8182 }
0x3356   :  { %5007 = vrot.lane.b32.xlu0 %v8183_v59, %s8415_s26  ;;  %v8185_v9 = vpop.eup %8184 }
0x3357   :  { %v4985_v17 = vadd.f32 1.0, %v8185_v9 }
0x3359   :  { %8186 = vrcp.f32 %v4985_v17 }
0x3363   :  { %v8187_v54 = vpop.eup %8186 }
0x33c8   :  { %v5008_v61 = vpop.permute.xlu0 %5007 }
0x33c9   :  { %v5010_v6 = vmul.f32 %v8187_v54, %v5008_v61 }
0x33cb   :  { %v5012_v63 = vrot.slane %v5010_v6, 1 }
0x33cd   :  { %6911 = vmatmul.mubr.msk.f32.vlgmr.msra.gmra.mrb[46].mxu1 %vm2807_vm12, %v5012_v63 }
0x33ce   :  { %7629 = vmatpush1.bf16.msra.mxu1 %v9735_v46  ;;  %5311 = vmatprep.mubr.f32.mxu1 %v10164_v56 }
0x33cf   :  { %7631 = vmatprep.subr.bf16.mxu1 %v9744_v23 }
0x33d2   :  { %7633 = vmatpush1.bf16.msra.mxu1 %v9754_v58 }
0x33d3   :  { %7635 = vmatprep.subr.bf16.mxu1 %v9762_v5 }
0x33d6   :  { %7637 = vmatpush1.bf16.msra.mxu1 %v9773_v39 }
0x33d7   :  { %7639 = vmatprep.subr.bf16.mxu1 %v9781_v4 }
0x33da   :  { %7641 = vmatpush1.bf16.msra.mxu1 %v9791_v27 }
0x33db   :  { %7659 = vmatprep.subr.bf16.mxu1 %v9726_v33 }
0x34a0   :  { %v5081_v53 = vpop.f32.mrb[46].mxu1 }
0x34a1   :  { %v5083_v21 = vpop.f32.mrb[47].mxu1  ;;  %v5088_v41 = vrot.slane %v5081_v53, 6 }
0x34a2   :  { %v5089_v13 = vrot.slane %v5083_v21, 6 }
0x34a3   :  { %v5092_v42 = vadd.f32 %v5088_v41, %v9839_v34 }
0x34a4   :  { %v5093_v8 = vadd.f32 %v5089_v13, %v9829_v32 }
0x34a5   :  { %v6912_v12 = vmul.f32 -1.442695, %v5092_v42 }
0x34a6   :  { %8188 = vtanh.f32 %v5093_v8  ;;  %v6913_v14 = vmul.f32 -1.442695, %v5093_v8 }
0x34a7   :  { %8190 = vpow2.f32 %v6912_v12 }
0x34b0   :  { %v8189_v40 = vpop.eup %8188 }
0x34b1   :  { %5112 = vrot.lane.b32.xlu1 %v8189_v40, %s8415_s26  ;;  %v8191_v10 = vpop.eup %8190 }
0x34b2   :  { %v5100_v30 = vadd.f32 1.0, %v8191_v10 }
0x34b4   :  { %8192 = vrcp.f32 %v5100_v30 }
0x34be   :  { %v8193_v47 = vpop.eup %8192 }
0x34bf   :  { %v5110_v45 = vmul.f32 %v8193_v47, %v5108_v11 }
0x3523   :  { %v5113_v57 = vpop.permute.xlu1 %5112 }
0x3524   :  { %v5115_v2 = vmul.f32 %v8193_v47, %v5113_v57 }
0x3526   :  { %5117 = vrot.lane.b32.xlu0 %v5115_v2, %s8415_s26 }
0x3598   :  { %v5118_v3 = vpop.permute.xlu0 %5117 }
0x3599   :  { %v5120_v24 = vadd.f32 %v5118_v3, %v5110_v45 }
0x359b   :  { %8194 = vtanh.f32 %v5120_v24  ;;  %v5224_v0 = vrot.slane %v5120_v24, 7 }
0x359c   :  { %8196 = vpow2.f32 %v6913_v14 }
0x35a5   :  { %v8195_v48 = vpop.eup %8194 }
0x35a6   :  { %5123 = vrot.lane.b32.xlu1 %v8195_v48, %s8415_s26  ;;  %v8197_v50 = vpop.eup %8196 }
0x35a7   :  { %v5101_v29 = vadd.f32 1.0, %v8197_v50 }
0x35a9   :  { %8198 = vrcp.f32 %v5101_v29 }
0x35b3   :  { %v8199_v7 = vpop.eup %8198 }
0x3618   :  { %v5124_v37 = vpop.permute.xlu1 %5123 }
0x3619   :  { %v5126_v38 = vmul.f32 %v8199_v7, %v5124_v37 }
0x361b   :  { %v5128_v28 = vrot.slane %v5126_v38, 2 }
0x361d   :  { %6914 = vmatmul.mubr.msk.f32.vlgmr.msra.gmra.mrb[52].mxu0 %vm2807_vm12, %v5128_v28 }
0x361e   :  { %7645 = vmatpush1.bf16.msra.mxu0 %v9735_v46  ;;  %5427 = vmatprep.mubr.f32.mxu0 %v10164_v56 }
0x361f   :  { %7647 = vmatprep.subr.bf16.mxu0 %v9744_v23 }
0x3622   :  { %7649 = vmatpush1.bf16.msra.mxu0 %v9754_v58 }
0x3623   :  { %7651 = vmatprep.subr.bf16.mxu0 %v9762_v5 }
0x3626   :  { %7653 = vmatpush1.bf16.msra.mxu0 %v9773_v39 }
0x3627   :  { %7655 = vmatprep.subr.bf16.mxu0 %v9781_v4 }
0x362a   :  { %7657 = vmatpush1.bf16.msra.mxu0 %v9791_v27 }
0x362b   :  { %7675 = vmatprep.subr.bf16.mxu0 %v9726_v33 }
0x36f0   :  { %v5197_v22 = vpop.f32.mrb[52].mxu0 }
0x36f1   :  { %v5199_v43 = vpop.f32.mrb[53].mxu0  ;;  %v5204_v35 = vrot.slane %v5197_v22, 5 }
0x36f2   :  { %v5205_v26 = vrot.slane %v5199_v43, 5 }
0x36f3   :  { %v5208_v60 = vadd.f32 %v5204_v35, %v9839_v34 }
0x36f4   :  { %v5209_v51 = vadd.f32 %v5205_v26, %v9829_v32 }
0x36f5   :  { %v6915_v18 = vmul.f32 -1.442695, %v5208_v60 }
0x36f6   :  { %8200 = vtanh.f32 %v5209_v51  ;;  %v6916_v9 = vmul.f32 -1.442695, %v5209_v51 }
0x36f7   :  { %8202 = vpow2.f32 %v6915_v18 }
0x3700   :  { %v8201_v1 = vpop.eup %8200 }
0x3701   :  { %5228 = vrot.lane.b32.xlu0 %v8201_v1, %s8415_s26  ;;  %v8203_v44 = vpop.eup %8202 }
0x3702   :  { %v5216_v55 = vadd.f32 1.0, %v8203_v44 }
0x3704   :  { %8204 = vrcp.f32 %v5216_v55 }
0x370e   :  { %v8205_v36 = vpop.eup %8204 }
0x370f   :  { %v5226_v49 = vmul.f32 %v8205_v36, %v5224_v0 }
0x3773   :  { %v5229_v52 = vpop.permute.xlu0 %5228 }
0x3774   :  { %v5231_v31 = vmul.f32 %v8205_v36, %v5229_v52 }
0x3776   :  { %5233 = vrot.lane.b32.xlu1 %v5231_v31, %s8415_s26 }
0x37e8   :  { %v5234_v25 = vpop.permute.xlu1 %5233 }
0x37e9   :  { %v5236_v59 = vadd.f32 %v5234_v25, %v5226_v49 }
0x37eb   :  { %8206 = vtanh.f32 %v5236_v59  ;;  %v5340_v45 = vrot.slane %v5236_v59, 7 }
0x37ec   :  { %8208 = vpow2.f32 %v6916_v9 }
0x37f5   :  { %v8207_v19 = vpop.eup %8206 }
0x37f6   :  { %5239 = vrot.lane.b32.xlu0 %v8207_v19, %s8415_s26  ;;  %v8209_v17 = vpop.eup %8208 }
0x37f7   :  { %v5217_v54 = vadd.f32 1.0, %v8209_v17 }
0x37f9   :  { %8210 = vrcp.f32 %v5217_v54 }
0x3803   :  { %v8211_v61 = vpop.eup %8210 }
0x3868   :  { %v5240_v6 = vpop.permute.xlu0 %5239 }
0x3869   :  { %v5242_v63 = vmul.f32 %v8211_v61, %v5240_v6 }
0x386b   :  { %v5244_v53 = vrot.slane %v5242_v63, 3 }
0x386d   :  { %6917 = vmatmul.mubr.msk.f32.vlgmr.msra.gmra.mrb[48].mxu1 %vm2807_vm12, %v5244_v53 }
0x386e   :  { %7661 = vmatpush1.bf16.msra.mxu1 %v9735_v46  ;;  %5543 = vmatprep.mubr.f32.mxu1 %v10164_v56 }
0x386f   :  { %7663 = vmatprep.subr.bf16.mxu1 %v9744_v23 }
0x3872   :  { %7665 = vmatpush1.bf16.msra.mxu1 %v9754_v58 }
0x3873   :  { %7667 = vmatprep.subr.bf16.mxu1 %v9762_v5 }
0x3876   :  { %7669 = vmatpush1.bf16.msra.mxu1 %v9773_v39 }
0x3877   :  { %7671 = vmatprep.subr.bf16.mxu1 %v9781_v4 }
0x387a   :  { %7673 = vmatpush1.bf16.msra.mxu1 %v9791_v27 }
0x387b   :  { %7691 = vmatprep.subr.bf16.mxu1 %v9726_v33 }
0x3940   :  { %v5313_v21 = vpop.f32.mrb[48].mxu1 }
0x3941   :  { %v5315_v13 = vpop.f32.mrb[49].mxu1  ;;  %v5320_v42 = vrot.slane %v5313_v21, 4 }
0x3942   :  { %v5321_v8 = vrot.slane %v5315_v13, 4 }
0x3943   :  { %v5324_v12 = vadd.f32 %v5320_v42, %v9839_v34 }
0x3944   :  { %v5325_v40 = vadd.f32 %v5321_v8, %v9829_v32 }
0x3945   :  { %v6918_v10 = vmul.f32 -1.442695, %v5324_v12 }
0x3946   :  { %8212 = vtanh.f32 %v5325_v40  ;;  %v6919_v50 = vmul.f32 -1.442695, %v5325_v40 }
0x3947   :  { %8214 = vpow2.f32 %v6918_v10 }
0x3950   :  { %v8213_v41 = vpop.eup %8212 }
0x3951   :  { %5344 = vrot.lane.b32.xlu1 %v8213_v41, %s8415_s26  ;;  %v8215_v30 = vpop.eup %8214 }
0x3952   :  { %v5332_v47 = vadd.f32 1.0, %v8215_v30 }
0x3954   :  { %8216 = vrcp.f32 %v5332_v47 }
0x395e   :  { %v8217_v57 = vpop.eup %8216 }
0x395f   :  { %v5342_v3 = vmul.f32 %v8217_v57, %v5340_v45 }
0x39c3   :  { %v5345_v2 = vpop.permute.xlu1 %5344 }
0x39c4   :  { %v5347_v11 = vmul.f32 %v8217_v57, %v5345_v2 }
0x39c6   :  { %5349 = vrot.lane.b32.xlu0 %v5347_v11, %s8415_s26 }
0x3a38   :  { %v5350_v24 = vpop.permute.xlu0 %5349 }
0x3a39   :  { %v5352_v48 = vadd.f32 %v5350_v24, %v5342_v3 }
0x3a3b   :  { %8218 = vtanh.f32 %v5352_v48  ;;  %v5456_v49 = vrot.slane %v5352_v48, 7 }
0x3a3c   :  { %8220 = vpow2.f32 %v6919_v50 }
0x3a45   :  { %v8219_v14 = vpop.eup %8218 }
0x3a46   :  { %5355 = vrot.lane.b32.xlu1 %v8219_v14, %s8415_s26  ;;  %v8221_v29 = vpop.eup %8220 }
0x3a47   :  { %v5333_v7 = vadd.f32 1.0, %v8221_v29 }
0x3a49   :  { %8222 = vrcp.f32 %v5333_v7 }
0x3a53   :  { %v8223_v37 = vpop.eup %8222 }
0x3ab8   :  { %v5356_v38 = vpop.permute.xlu1 %5355 }
0x3ab9   :  { %v5358_v28 = vmul.f32 %v8223_v37, %v5356_v38 }
0x3abb   :  { %v5360_v22 = vrot.slane %v5358_v28, 4 }
0x3abd   :  { %6920 = vmatmul.mubr.msk.f32.vlgmr.msra.gmra.mrb[54].mxu0 %vm2807_vm12, %v5360_v22 }
0x3abe   :  { %7677 = vmatpush1.bf16.msra.mxu0 %v9735_v46  ;;  %5659 = vmatprep.mubr.f32.mxu0 %v10164_v56 }
0x3abf   :  { %7679 = vmatprep.subr.bf16.mxu0 %v9744_v23 }
0x3ac2   :  { %7681 = vmatpush1.bf16.msra.mxu0 %v9754_v58 }
0x3ac3   :  { %7683 = vmatprep.subr.bf16.mxu0 %v9762_v5 }
0x3ac6   :  { %7685 = vmatpush1.bf16.msra.mxu0 %v9773_v39 }
0x3ac7   :  { %7687 = vmatprep.subr.bf16.mxu0 %v9781_v4 }
0x3aca   :  { %7689 = vmatpush1.bf16.msra.mxu0 %v9791_v27 }
0x3acb   :  { %7707 = vmatprep.subr.bf16.mxu0 %v9726_v33 }
0x3b90   :  { %v5429_v43 = vpop.f32.mrb[54].mxu0 }
0x3b91   :  { %v5431_v26 = vpop.f32.mrb[55].mxu0  ;;  %v5436_v60 = vrot.slane %v5429_v43, 3 }
0x3b92   :  { %v5437_v51 = vrot.slane %v5431_v26, 3 }
0x3b93   :  { %v5440_v18 = vadd.f32 %v5436_v60, %v9839_v34 }
0x3b94   :  { %v5441_v1 = vadd.f32 %v5437_v51, %v9829_v32 }
0x3b95   :  { %v6921_v44 = vmul.f32 -1.442695, %v5440_v18 }
0x3b96   :  { %8224 = vtanh.f32 %v5441_v1  ;;  %v6922_v17 = vmul.f32 -1.442695, %v5441_v1 }
0x3b97   :  { %8226 = vpow2.f32 %v6921_v44 }
0x3ba0   :  { %v8225_v35 = vpop.eup %8224 }
0x3ba1   :  { %5460 = vrot.lane.b32.xlu0 %v8225_v35, %s8415_s26  ;;  %v8227_v55 = vpop.eup %8226 }
0x3ba2   :  { %v5448_v36 = vadd.f32 1.0, %v8227_v55 }
0x3ba4   :  { %8228 = vrcp.f32 %v5448_v36 }
0x3bae   :  { %v8229_v52 = vpop.eup %8228 }
0x3baf   :  { %v5458_v25 = vmul.f32 %v8229_v52, %v5456_v49 }
0x3c13   :  { %v5461_v31 = vpop.permute.xlu0 %5460 }
0x3c14   :  { %v5463_v0 = vmul.f32 %v8229_v52, %v5461_v31 }
0x3c16   :  { %5465 = vrot.lane.b32.xlu1 %v5463_v0, %s8415_s26 }
0x3c88   :  { %v5466_v59 = vpop.permute.xlu1 %5465 }
0x3c89   :  { %v5468_v19 = vadd.f32 %v5466_v59, %v5458_v25 }
0x3c8b   :  { %8230 = vtanh.f32 %v5468_v19  ;;  %v5572_v3 = vrot.slane %v5468_v19, 7 }
0x3c8c   :  { %8232 = vpow2.f32 %v6922_v17 }
0x3c95   :  { %v8231_v9 = vpop.eup %8230 }
0x3c96   :  { %5471 = vrot.lane.b32.xlu0 %v8231_v9, %s8415_s26  ;;  %v8233_v54 = vpop.eup %8232 }
0x3c97   :  { %v5449_v61 = vadd.f32 1.0, %v8233_v54 }
0x3c99   :  { %8234 = vrcp.f32 %v5449_v61 }
0x3ca3   :  { %v8235_v6 = vpop.eup %8234 }
0x3d08   :  { %v5472_v63 = vpop.permute.xlu0 %5471 }
0x3d09   :  { %v5474_v53 = vmul.f32 %v8235_v6, %v5472_v63 }
0x3d0b   :  { %v5476_v21 = vrot.slane %v5474_v53, 5 }
0x3d0d   :  { %6923 = vmatmul.mubr.msk.f32.vlgmr.msra.gmra.mrb[50].mxu1 %vm2807_vm12, %v5476_v21  ;;  %v9972_v21 = vadd.f32 %v9863_v62, %v9824_v16 }
0x3d0e   :  { %7693 = vmatpush1.bf16.msra.mxu1 %v9735_v46  ;;  %5775 = vmatprep.mubr.f32.mxu1 %v10164_v56 }
0x3d0f   :  { %7695 = vmatprep.subr.bf16.mxu1 %v9744_v23 }
0x3d12   :  { %7697 = vmatpush1.bf16.msra.mxu1 %v9754_v58 }
0x3d13   :  { %7699 = vmatprep.subr.bf16.mxu1 %v9762_v5 }
0x3d16   :  { %7701 = vmatpush1.bf16.msra.mxu1 %v9773_v39 }
0x3d17   :  { %7703 = vmatprep.subr.bf16.mxu1 %v9781_v4 }
0x3d1a   :  { %7705 = vmatpush1.bf16.msra.mxu1 %v9791_v27 }
0x3d1b   :  { %7723 = vmatprep.subr.bf16.mxu1 %v9726_v33 }
0x3de0   :  { %v5545_v13 = vpop.f32.mrb[50].mxu1 }
0x3de1   :  { %v5547_v8 = vpop.f32.mrb[51].mxu1  ;;  %v5552_v12 = vrot.slane %v5545_v13, 2 }
0x3de2   :  { %v5553_v40 = vrot.slane %v5547_v8, 2 }
0x3de3   :  { %v5556_v10 = vadd.f32 %v5552_v12, %v9839_v34 }
0x3de4   :  { %v5557_v41 = vadd.f32 %v5553_v40, %v9829_v32 }
0x3de5   :  { %v6924_v30 = vmul.f32 -1.442695, %v5556_v10 }
0x3de6   :  { %8236 = vtanh.f32 %v5557_v41  ;;  %v6925_v29 = vmul.f32 -1.442695, %v5557_v41 }
0x3de7   :  { %8238 = vpow2.f32 %v6924_v30 }
0x3df0   :  { %v8237_v42 = vpop.eup %8236 }
0x3df1   :  { %5576 = vrot.lane.b32.xlu1 %v8237_v42, %s8415_s26  ;;  %v8239_v47 = vpop.eup %8238  ;;  %v9978_v42 = vadd.f32 %v9861_v20, %v9835_v15 }
0x3df2   :  { %v5564_v57 = vadd.f32 1.0, %v8239_v47 }
0x3df4   :  { %8240 = vrcp.f32 %v5564_v57 }
0x3dfe   :  { %v8241_v2 = vpop.eup %8240 }
0x3dff   :  { %v5574_v24 = vmul.f32 %v8241_v2, %v5572_v3 }
0x3e63   :  { %v5577_v11 = vpop.permute.xlu1 %5576 }
0x3e64   :  { %v5579_v45 = vmul.f32 %v8241_v2, %v5577_v11 }
0x3e66   :  { %5581 = vrot.lane.b32.xlu0 %v5579_v45, %s8415_s26 }
0x3ed8   :  { %v5582_v48 = vpop.permute.xlu0 %5581 }
0x3ed9   :  { %v5584_v14 = vadd.f32 %v5582_v48, %v5574_v24 }
0x3edb   :  { %8242 = vtanh.f32 %v5584_v14  ;;  %v5688_v25 = vrot.slane %v5584_v14, 7 }
0x3edc   :  { %8244 = vpow2.f32 %v6925_v29 }
0x3ee5   :  { %v8243_v50 = vpop.eup %8242 }
0x3ee6   :  { %5587 = vrot.lane.b32.xlu1 %v8243_v50, %s8415_s26  ;;  %v8245_v7 = vpop.eup %8244 }
0x3ee7   :  { %v5565_v37 = vadd.f32 1.0, %v8245_v7 }
0x3ee9   :  { %8246 = vrcp.f32 %v5565_v37 }
0x3ef3   :  { %v8247_v38 = vpop.eup %8246 }
0x3f58   :  { %v5588_v28 = vpop.permute.xlu1 %5587 }
0x3f59   :  { %v5590_v22 = vmul.f32 %v8247_v38, %v5588_v28 }
0x3f5b   :  { %v5592_v43 = vrot.slane %v5590_v22, 6 }
0x3f5d   :  { %6926 = vmatmul.mubr.msk.f32.vlgmr.msra.gmra.mrb[56].mxu0 %vm2807_vm12, %v5592_v43 }
0x3f5e   :  { %7709 = vmatpush1.bf16.msra.mxu0 %v9735_v46  ;;  %5884 = vmatprep.mubr.f32.mxu0 %v10164_v56 }
0x3f5f   :  { %7711 = vmatprep.subr.bf16.mxu0 %v9744_v23 }
0x3f62   :  { %7713 = vmatpush1.bf16.msra.mxu0 %v9754_v58 }
0x3f63   :  { %7715 = vmatprep.subr.bf16.mxu0 %v9762_v5 }
0x3f66   :  { %7717 = vmatpush1.bf16.msra.mxu0 %v9773_v39 }
0x3f67   :  { %7719 = vmatprep.subr.bf16.mxu0 %v9781_v4 }
0x3f6a   :  { %7721 = vmatpush1.bf16.msra.mxu0 %v9791_v27 }
0x3f6b   :  { %7739 = vmatprep.subr.bf16.mxu0 %v9726_v33 }
0x4030   :  { %v5661_v26 = vpop.f32.mrb[56].mxu0 }
0x4031   :  { %v5663_v51 = vpop.f32.mrb[57].mxu0  ;;  %v5668_v18 = vrot.slane %v5661_v26, 1 }
0x4032   :  { %v5669_v1 = vrot.slane %v5663_v51, 1 }
0x4033   :  { %v5672_v44 = vadd.f32 %v5668_v18, %v9839_v34 }
0x4034   :  { %v5673_v35 = vadd.f32 %v5669_v1, %v9829_v32 }
0x4035   :  { %v6927_v55 = vmul.f32 -1.442695, %v5672_v44 }
0x4036   :  { %8248 = vtanh.f32 %v5673_v35  ;;  %v6928_v17 = vmul.f32 -1.442695, %v5673_v35 }
0x4037   :  { %8250 = vpow2.f32 %v6927_v55 }
0x4040   :  { %v8249_v60 = vpop.eup %8248 }
0x4041   :  { %5692 = vrot.lane.b32.xlu0 %v8249_v60, %s8415_s26  ;;  %v8251_v36 = vpop.eup %8250 }
0x4042   :  { %v5680_v52 = vadd.f32 1.0, %v8251_v36 }
0x4044   :  { %8252 = vrcp.f32 %v5680_v52 }
0x404e   :  { %v8253_v31 = vpop.eup %8252 }
0x404f   :  { %v5690_v59 = vmul.f32 %v8253_v31, %v5688_v25 }
0x40b3   :  { %v5693_v0 = vpop.permute.xlu0 %5692 }
0x40b4   :  { %v5695_v49 = vmul.f32 %v8253_v31, %v5693_v0 }
0x40b6   :  { %5697 = vrot.lane.b32.xlu1 %v5695_v49, %s8415_s26 }
0x4128   :  { %v5698_v32 = vpop.permute.xlu1 %5697 }
0x4129   :  { %v5700_v19 = vadd.f32 %v5698_v32, %v5690_v59 }
0x412b   :  { %8254 = vtanh.f32 %v5700_v19  ;;  %v5798_v2 = vrot.slane %v5700_v19, 7 }
0x412c   :  { %8256 = vpow2.f32 %v6928_v17 }
0x4135   :  { %v8255_v9 = vpop.eup %8254 }
0x4136   :  { %5703 = vrot.lane.b32.xlu0 %v8255_v9, %s8415_s26  ;;  %v8257_v34 = vpop.eup %8256 }
0x4137   :  { %v5681_v54 = vadd.f32 1.0, %v8257_v34 }
0x4139   :  { %8258 = vrcp.f32 %v5681_v54 }
0x4143   :  { %v8259_v61 = vpop.eup %8258 }
0x41a8   :  { %v5704_v6 = vpop.permute.xlu0 %5703 }
0x41a9   :  { %v5706_v63 = vmul.f32 %v8259_v61, %v5704_v6 }
0x41ab   :  { %v5708_v53 = vrot.slane %v5706_v63, 7 }
0x41ad   :  { %6929 = vmatmul.mubr.msk.f32.vlgmr.msra.gmra.mrb[52].mxu1 %vm2807_vm12, %v5708_v53 }
0x41ae   :  { %7725 = vmatpush1.bf16.msra.mxu1 %v9735_v46  ;;  %6000 = vmatprep.mubr.f32.mxu1 %v10164_v56 }
0x41af   :  { %7727 = vmatprep.subr.bf16.mxu1 %v9744_v23 }
0x41b2   :  { %7729 = vmatpush1.bf16.msra.mxu1 %v9754_v58 }
0x41b3   :  { %7731 = vmatprep.subr.bf16.mxu1 %v9762_v5 }
0x41b6   :  { %7733 = vmatpush1.bf16.msra.mxu1 %v9773_v39 }
0x41b7   :  { %7735 = vmatprep.subr.bf16.mxu1 %v9781_v4 }
0x41ba   :  { %7737 = vmatpush1.bf16.msra.mxu1 %v9791_v27 }
0x41bb   :  { %7755 = vmatprep.subr.bf16.mxu1 %v9726_v33 }
0x4280   :  { %v5777_v13 = vpop.f32.mrb[52].mxu1 }
0x4281   :  { %v5779_v8 = vpop.f32.mrb[53].mxu1  ;;  %v5782_v12 = vadd.f32 %v5777_v13, %v9978_v42 }
0x4282   :  { %v5783_v40 = vadd.f32 %v5779_v8, %v9972_v21 }
0x4283   :  { %v6930_v10 = vmul.f32 -1.442695, %v5782_v12 }
0x4284   :  { %8260 = vtanh.f32 %v5783_v40  ;;  %v6931_v15 = vmul.f32 -1.442695, %v5783_v40 }
0x4285   :  { %8262 = vpow2.f32 %v6930_v10 }
0x428e   :  { %v8261_v41 = vpop.eup %8260 }
0x428f   :  { %5802 = vrot.lane.b32.xlu1 %v8261_v41, %s8415_s26  ;;  %v8263_v30 = vpop.eup %8262 }
0x4290   :  { %v5790_v47 = vadd.f32 1.0, %v8263_v30 }
0x4292   :  { %8264 = vrcp.f32 %v5790_v47 }
0x429c   :  { %v8265_v16 = vpop.eup %8264 }
0x429d   :  { %v5800_v11 = vmul.f32 %v8265_v16, %v5798_v2 }
0x4301   :  { %v5803_v62 = vpop.permute.xlu1 %5802 }
0x4302   :  { %v5805_v57 = vmul.f32 %v8265_v16, %v5803_v62 }
0x4304   :  { %5807 = vrot.lane.b32.xlu0 %v5805_v57, %s8415_s26 }
0x4376   :  { %v5808_v45 = vpop.permute.xlu0 %5807 }
0x4377   :  { %v5810_v3 = vadd.f32 %v5808_v45, %v5800_v11 }
0x4379   :  { %8266 = vtanh.f32 %v5810_v3  ;;  %v5913_v55 = vrot.slane %v5810_v3, 7 }
0x437a   :  { %8268 = vpow2.f32 %v6931_v15 }
0x4383   :  { %v8267_v24 = vpop.eup %8266 }
0x4384   :  { %5813 = vrot.lane.b32.xlu1 %v8267_v24, %s8415_s26  ;;  %v8269_v20 = vpop.eup %8268 }
0x4385   :  { %v5791_v48 = vadd.f32 1.0, %v8269_v20 }
0x4387   :  { %8270 = vrcp.f32 %v5791_v48 }
0x4391   :  { %v8271_v14 = vpop.eup %8270 }
0x43f6   :  { %v5814_v50 = vpop.permute.xlu1 %5813 }
0x43f7   :  { %v5816_v29 = vmul.f32 %v8271_v14, %v5814_v50 }
0x43f9   :  { %6932 = vmatmul.mubr.msk.f32.vlgmr.msra.gmra.mrb[58].mxu0 %vm2807_vm12, %v5816_v29 }
0x43fa   :  { %7741 = vmatpush1.bf16.msra.mxu0 %v9735_v46  ;;  %6116 = vmatprep.mubr.f32.mxu0 %v10164_v56 }
0x43fb   :  { %7743 = vmatprep.subr.bf16.mxu0 %v9744_v23 }
0x43fe   :  { %7745 = vmatpush1.bf16.msra.mxu0 %v9754_v58 }
0x43ff   :  { %7747 = vmatprep.subr.bf16.mxu0 %v9762_v5 }
0x4402   :  { %7749 = vmatpush1.bf16.msra.mxu0 %v9773_v39 }
0x4403   :  { %7751 = vmatprep.subr.bf16.mxu0 %v9781_v4 }
0x4406   :  { %7753 = vmatpush1.bf16.msra.mxu0 %v9791_v27 }
0x4407   :  { %7771 = vmatprep.subr.bf16.mxu0 %v9726_v33 }
0x44cc   :  { %v5886_v7 = vpop.f32.mrb[58].mxu0 }
0x44cd   :  { %v5888_v37 = vpop.f32.mrb[59].mxu0  ;;  %v5893_v43 = vrot.slane %v5886_v7, 7 }
0x44ce   :  { %v5894_v38 = vrot.slane %v5888_v37, 7 }
0x44cf   :  { %v5897_v26 = vadd.f32 %v5893_v43, %v9978_v42 }
0x44d0   :  { %v5898_v28 = vadd.f32 %v5894_v38, %v9972_v21 }
0x44d1   :  { %v6933_v51 = vmul.f32 -1.442695, %v5897_v26 }
0x44d2   :  { %8272 = vtanh.f32 %v5898_v28  ;;  %v6934_v49 = vmul.f32 -1.442695, %v5898_v28 }
0x44d3   :  { %8274 = vpow2.f32 %v6933_v51 }
0x44dc   :  { %v8273_v22 = vpop.eup %8272 }
0x44dd   :  { %5917 = vrot.lane.b32.xlu0 %v8273_v22, %s8415_s26  ;;  %v8275_v1 = vpop.eup %8274 }
0x44de   :  { %v5905_v35 = vadd.f32 1.0, %v8275_v1 }
0x44e0   :  { %8276 = vrcp.f32 %v5905_v35 }
0x44ea   :  { %v8277_v60 = vpop.eup %8276 }
0x44eb   :  { %v5915_v36 = vmul.f32 %v8277_v60, %v5913_v55 }
0x454f   :  { %v5918_v18 = vpop.permute.xlu0 %5917 }
0x4550   :  { %v5920_v44 = vmul.f32 %v8277_v60, %v5918_v18 }
0x4552   :  { %5922 = vrot.lane.b32.xlu1 %v5920_v44, %s8415_s26 }
0x45c4   :  { %v5923_v52 = vpop.permute.xlu1 %5922 }
0x45c5   :  { %v5925_v31 = vadd.f32 %v5923_v52, %v5915_v36 }
0x45c7   :  { %8278 = vtanh.f32 %v5925_v31  ;;  %v6029_v47 = vrot.slane %v5925_v31, 7 }
0x45c8   :  { %8280 = vpow2.f32 %v6934_v49 }
0x45d1   :  { %v8279_v0 = vpop.eup %8278 }
0x45d2   :  { %5928 = vrot.lane.b32.xlu0 %v8279_v0, %s8415_s26  ;;  %v8281_v25 = vpop.eup %8280 }
0x45d3   :  { %v5906_v59 = vadd.f32 1.0, %v8281_v25 }
0x45d5   :  { %8282 = vrcp.f32 %v5906_v59 }
0x45df   :  { %v8283_v32 = vpop.eup %8282 }
0x4644   :  { %v5929_v19 = vpop.permute.xlu0 %5928 }
0x4645   :  { %v5931_v9 = vmul.f32 %v8283_v32, %v5929_v19 }
0x4647   :  { %v5933_v17 = vrot.slane %v5931_v9, 1 }
0x4649   :  { %6935 = vmatmul.mubr.msk.f32.vlgmr.msra.gmra.mrb[54].mxu1 %vm2807_vm12, %v5933_v17 }
0x464a   :  { %7757 = vmatpush1.bf16.msra.mxu1 %v9735_v46  ;;  %6232 = vmatprep.mubr.f32.mxu1 %v10164_v56 }
0x464b   :  { %7759 = vmatprep.subr.bf16.mxu1 %v9744_v23 }
0x464e   :  { %7761 = vmatpush1.bf16.msra.mxu1 %v9754_v58 }
0x464f   :  { %7763 = vmatprep.subr.bf16.mxu1 %v9762_v5 }
0x4652   :  { %7765 = vmatpush1.bf16.msra.mxu1 %v9773_v39 }
0x4653   :  { %7767 = vmatprep.subr.bf16.mxu1 %v9781_v4 }
0x4656   :  { %7769 = vmatpush1.bf16.msra.mxu1 %v9791_v27 }
0x4657   :  { %7787 = vmatprep.subr.bf16.mxu1 %v9726_v33 }
0x471c   :  { %v6002_v34 = vpop.f32.mrb[54].mxu1 }
0x471d   :  { %v6004_v54 = vpop.f32.mrb[55].mxu1  ;;  %v6009_v53 = vrot.slane %v6002_v34, 6 }
0x471e   :  { %v6010_v61 = vrot.slane %v6004_v54, 6 }
0x471f   :  { %v6013_v13 = vadd.f32 %v6009_v53, %v9978_v42 }
0x4720   :  { %v6014_v6 = vadd.f32 %v6010_v61, %v9972_v21 }
0x4721   :  { %v6936_v8 = vmul.f32 -1.442695, %v6013_v13 }
0x4722   :  { %8284 = vtanh.f32 %v6014_v6  ;;  %v6937_v11 = vmul.f32 -1.442695, %v6014_v6 }
0x4723   :  { %8286 = vpow2.f32 %v6936_v8 }
0x472c   :  { %v8285_v63 = vpop.eup %8284 }
0x472d   :  { %6033 = vrot.lane.b32.xlu1 %v8285_v63, %s8415_s26  ;;  %v8287_v40 = vpop.eup %8286 }
0x472e   :  { %v6021_v41 = vadd.f32 1.0, %v8287_v40 }
0x4730   :  { %8288 = vrcp.f32 %v6021_v41 }
0x473a   :  { %v8289_v12 = vpop.eup %8288 }
0x473b   :  { %v6031_v16 = vmul.f32 %v8289_v12, %v6029_v47 }
0x479f   :  { %v6034_v10 = vpop.permute.xlu1 %6033 }
0x47a0   :  { %v6036_v30 = vmul.f32 %v8289_v12, %v6034_v10 }
0x47a2   :  { %6038 = vrot.lane.b32.xlu0 %v6036_v30, %s8415_s26 }
0x4814   :  { %v6039_v62 = vpop.permute.xlu0 %6038 }
0x4815   :  { %v6041_v57 = vadd.f32 %v6039_v62, %v6031_v16 }
0x4817   :  { %8290 = vtanh.f32 %v6041_v57  ;;  %v6145_v35 = vrot.slane %v6041_v57, 7 }
0x4818   :  { %8292 = vpow2.f32 %v6937_v11 }
0x4821   :  { %v8291_v2 = vpop.eup %8290 }
0x4822   :  { %6044 = vrot.lane.b32.xlu1 %v8291_v2, %s8415_s26  ;;  %v8293_v45 = vpop.eup %8292 }
0x4823   :  { %v6022_v3 = vadd.f32 1.0, %v8293_v45 }
0x4825   :  { %8294 = vrcp.f32 %v6022_v3 }
0x482f   :  { %v8295_v24 = vpop.eup %8294 }
0x4894   :  { %v6045_v15 = vpop.permute.xlu1 %6044 }
0x4895   :  { %v6047_v20 = vmul.f32 %v8295_v24, %v6045_v15 }
0x4897   :  { %v6049_v48 = vrot.slane %v6047_v20, 2 }
0x4899   :  { %6938 = vmatmul.mubr.msk.f32.vlgmr.msra.gmra.mrb[60].mxu0 %vm2807_vm12, %v6049_v48 }
0x489a   :  { %7773 = vmatpush1.bf16.msra.mxu0 %v9735_v46  ;;  %6348 = vmatprep.mubr.f32.mxu0 %v10164_v56 }
0x489b   :  { %7775 = vmatprep.subr.bf16.mxu0 %v9744_v23 }
0x489e   :  { %7777 = vmatpush1.bf16.msra.mxu0 %v9754_v58 }
0x489f   :  { %7779 = vmatprep.subr.bf16.mxu0 %v9762_v5 }
0x48a2   :  { %7781 = vmatpush1.bf16.msra.mxu0 %v9773_v39 }
0x48a3   :  { %7783 = vmatprep.subr.bf16.mxu0 %v9781_v4 }
0x48a6   :  { %7785 = vmatpush1.bf16.msra.mxu0 %v9791_v27 }
0x48a7   :  { %7803 = vmatprep.subr.bf16.mxu0 %v9726_v33 }
0x496c   :  { %v6118_v14 = vpop.f32.mrb[60].mxu0 }
0x496d   :  { %v6120_v50 = vpop.f32.mrb[61].mxu0  ;;  %v6125_v38 = vrot.slane %v6118_v14, 5 }
0x496e   :  { %v6126_v29 = vrot.slane %v6120_v50, 5 }
0x496f   :  { %v6129_v28 = vadd.f32 %v6125_v38, %v9978_v42 }
0x4970   :  { %v6130_v7 = vadd.f32 %v6126_v29, %v9972_v21 }
0x4971   :  { %v6939_v22 = vmul.f32 -1.442695, %v6129_v28 }
0x4972   :  { %8296 = vtanh.f32 %v6130_v7  ;;  %v6940_v36 = vmul.f32 -1.442695, %v6130_v7 }
0x4973   :  { %8298 = vpow2.f32 %v6939_v22 }
0x497c   :  { %v8297_v37 = vpop.eup %8296 }
0x497d   :  { %6149 = vrot.lane.b32.xlu0 %v8297_v37, %s8415_s26  ;;  %v8299_v43 = vpop.eup %8298 }
0x497e   :  { %v6137_v26 = vadd.f32 1.0, %v8299_v43 }
0x4980   :  { %8300 = vrcp.f32 %v6137_v26 }
0x498a   :  { %v8301_v51 = vpop.eup %8300 }
0x498b   :  { %v6147_v60 = vmul.f32 %v8301_v51, %v6145_v35 }
0x49ef   :  { %v6150_v1 = vpop.permute.xlu0 %6149 }
0x49f0   :  { %v6152_v33 = vmul.f32 %v8301_v51, %v6150_v1 }
0x49f2   :  { %6154 = vrot.lane.b32.xlu1 %v6152_v33, %s8415_s26 }
0x4a64   :  { %v6155_v18 = vpop.permute.xlu1 %6154 }
0x4a65   :  { %v6157_v44 = vadd.f32 %v6155_v18, %v6147_v60 }
0x4a67   :  { %8302 = vtanh.f32 %v6157_v44  ;;  %v6261_v41 = vrot.slane %v6157_v44, 7 }
0x4a68   :  { %8304 = vpow2.f32 %v6940_v36 }
0x4a71   :  { %v8303_v55 = vpop.eup %8302 }
0x4a72   :  { %6160 = vrot.lane.b32.xlu0 %v8303_v55, %s8415_s26  ;;  %v8305_v52 = vpop.eup %8304 }
0x4a73   :  { %v6138_v31 = vadd.f32 1.0, %v8305_v52 }
0x4a75   :  { %8306 = vrcp.f32 %v6138_v31 }
0x4a7f   :  { %v8307_v0 = vpop.eup %8306 }
0x4ae4   :  { %v6161_v49 = vpop.permute.xlu0 %6160 }
0x4ae5   :  { %v6163_v25 = vmul.f32 %v8307_v0, %v6161_v49 }
0x4ae7   :  { %v6165_v59 = vrot.slane %v6163_v25, 3 }
0x4ae9   :  { %6941 = vmatmul.mubr.msk.f32.vlgmr.msra.gmra.mrb[56].mxu1 %vm2807_vm12, %v6165_v59 }
0x4aea   :  { %7789 = vmatpush1.bf16.msra.mxu1 %v9735_v46  ;;  %6464 = vmatprep.mubr.f32.mxu1 %v10164_v56 }
0x4aeb   :  { %7791 = vmatprep.subr.bf16.mxu1 %v9744_v23 }
0x4aee   :  { %7793 = vmatpush1.bf16.msra.mxu1 %v9754_v58 }
0x4aef   :  { %7795 = vmatprep.subr.bf16.mxu1 %v9762_v5 }
0x4af2   :  { %7797 = vmatpush1.bf16.msra.mxu1 %v9773_v39 }
0x4af3   :  { %7799 = vmatprep.subr.bf16.mxu1 %v9781_v4 }
0x4af6   :  { %7801 = vmatpush1.bf16.msra.mxu1 %v9791_v27 }
0x4bbc   :  { %v6234_v32 = vpop.f32.mrb[56].mxu1 }
0x4bbd   :  { %v6236_v19 = vpop.f32.mrb[57].mxu1  ;;  %v6241_v54 = vrot.slane %v6234_v32, 4 }
0x4bbe   :  { %v6242_v9 = vrot.slane %v6236_v19, 4 }
0x4bbf   :  { %v6245_v61 = vadd.f32 %v6241_v54, %v9978_v42 }
0x4bc0   :  { %v6246_v17 = vadd.f32 %v6242_v9, %v9972_v21 }
0x4bc1   :  { %v6942_v6 = vmul.f32 -1.442695, %v6245_v61 }
0x4bc2   :  { %8308 = vtanh.f32 %v6246_v17  ;;  %v6943_v16 = vmul.f32 -1.442695, %v6246_v17 }
0x4bc3   :  { %8310 = vpow2.f32 %v6942_v6 }
0x4bcc   :  { %v8309_v34 = vpop.eup %8308 }
0x4bcd   :  { %6265 = vrot.lane.b32.xlu1 %v8309_v34, %s8415_s26  ;;  %v8311_v63 = vpop.eup %8310 }
0x4bce   :  { %v6253_v53 = vadd.f32 1.0, %v8311_v63 }
0x4bd0   :  { %8312 = vrcp.f32 %v6253_v53 }
0x4bda   :  { %v8313_v13 = vpop.eup %8312 }
0x4bdb   :  { %v6263_v12 = vmul.f32 %v8313_v13, %v6261_v41 }
0x4c3f   :  { %v6266_v8 = vpop.permute.xlu1 %6265 }
0x4c40   :  { %v6268_v40 = vmul.f32 %v8313_v13, %v6266_v8 }
0x4c42   :  { %6270 = vrot.lane.b32.xlu0 %v6268_v40, %s8415_s26 }
0x4cb4   :  { %v6271_v10 = vpop.permute.xlu0 %6270 }
0x4cb5   :  { %v6273_v30 = vadd.f32 %v6271_v10, %v6263_v12 }
0x4cb7   :  { %8314 = vtanh.f32 %v6273_v30  ;;  %v6377_v29 = vrot.slane %v6273_v30, 7 }
0x4cb8   :  { %8316 = vpow2.f32 %v6943_v16 }
0x4cc1   :  { %v8315_v47 = vpop.eup %8314 }
0x4cc2   :  { %6276 = vrot.lane.b32.xlu1 %v8315_v47, %s8415_s26  ;;  %v8317_v62 = vpop.eup %8316 }
0x4cc3   :  { %v6254_v57 = vadd.f32 1.0, %v8317_v62 }
0x4cc5   :  { %8318 = vrcp.f32 %v6254_v57 }
0x4ccf   :  { %v8319_v2 = vpop.eup %8318 }
0x4d34   :  { %v6277_v11 = vpop.permute.xlu1 %6276 }
0x4d35   :  { %v6279_v45 = vmul.f32 %v8319_v2, %v6277_v11 }
0x4d37   :  { %v6281_v3 = vrot.slane %v6279_v45, 4 }
0x4d39   :  { %6944 = vmatmul.mubr.msk.f32.vlgmr.msra.gmra.mrb[62].mxu0 %vm2807_vm12, %v6281_v3 }
0x4d3a   :  { %7805 = vmatpush1.bf16.msra.mxu0 %v9735_v46  ;;  %6580 = vmatprep.mubr.f32.mxu0 %v10164_v56 }
0x4d3b   :  { %7807 = vmatprep.subr.bf16.mxu0 %v9744_v23 }
0x4d3e   :  { %7809 = vmatpush1.bf16.msra.mxu0 %v9754_v58 }
0x4d3f   :  { %7811 = vmatprep.subr.bf16.mxu0 %v9762_v5 }
0x4d42   :  { %7813 = vmatpush1.bf16.msra.mxu0 %v9773_v39 }
0x4d43   :  { %7815 = vmatprep.subr.bf16.mxu0 %v9781_v4 }
0x4d46   :  { %7817 = vmatpush1.bf16.msra.mxu0 %v9791_v27 }
0x4e0c   :  { %v6350_v24 = vpop.f32.mrb[62].mxu0 }
0x4e0d   :  { %v6352_v15 = vpop.f32.mrb[63].mxu0  ;;  %v6357_v23 = vrot.slane %v6350_v24, 3 }
0x4e0e   :  { %v6358_v20 = vrot.slane %v6352_v15, 3 }
0x4e0f   :  { %v6361_v58 = vadd.f32 %v6357_v23, %v9978_v42  ;;  %v6636_v23 = vld [vmem:[%s10139_s21] sm:$0xff] }
0x4e10   :  { %v6362_v48 = vadd.f32 %v6358_v20, %v9972_v21 }
0x4e11   :  { %v6945_v14 = vmul.f32 -1.442695, %v6361_v58  ;;  %v6638_v58 = vld [vmem:[%s10139_s21 + $0x10] sm:$0xff] }
0x4e12   :  { %8320 = vtanh.f32 %v6362_v48  ;;  %v6946_v22 = vmul.f32 -1.442695, %v6362_v48 }
0x4e13   :  { %8322 = vpow2.f32 %v6945_v14  ;;  %v8416_v14 = vmov 0.0|0.0  }
0x4e14   :  { %7818 = vmatprep.subr.bf16.mxu1 %v8416_v14 }
0x4e1c   :  { %v8321_v46 = vpop.eup %8320 }
0x4e1d   :  { %6381 = vrot.lane.b32.xlu0 %v8321_v46, %s8415_s26  ;;  %v8323_v5 = vpop.eup %8322 }
0x4e1e   :  { %v6369_v39 = vadd.f32 1.0, %v8323_v5 }
0x4e20   :  { %8324 = vrcp.f32 %v6369_v39  ;;  %v6639_v39 = vld [vmem:[%s10139_s21 + $0x18] sm:$0xff] }
0x4e2a   :  { %v8325_v4 = vpop.eup %8324 }
0x4e2b   :  { %v6379_v7 = vmul.f32 %v8325_v4, %v6377_v29 }
0x4e8f   :  { %v6382_v50 = vpop.permute.xlu0 %6381 }
0x4e90   :  { %v6384_v27 = vmul.f32 %v8325_v4, %v6382_v50  ;;  %v7822_v4 = vpack.c.bf16 %v6639_v39, %v6638_v58 }
0x4e92   :  { %6386 = vrot.lane.b32.xlu1 %v6384_v27, %s8415_s26 }
0x4f04   :  { %v6387_v37 = vpop.permute.xlu1 %6386 }
0x4f05   :  { %v6389_v38 = vadd.f32 %v6387_v37, %v6379_v7 }
0x4f07   :  { %8326 = vtanh.f32 %v6389_v38  ;;  %v6493_v9 = vrot.slane %v6389_v38, 7 }
0x4f08   :  { %8328 = vpow2.f32 %v6946_v22 }
0x4f11   :  { %v8327_v28 = vpop.eup %8326 }
0x4f12   :  { %6392 = vrot.lane.b32.xlu0 %v8327_v28, %s8415_s26  ;;  %v8329_v43 = vpop.eup %8328 }
0x4f13   :  { %v6370_v26 = vadd.f32 1.0, %v8329_v43  ;;  %v6722_v43 = vld [vmem:[%s10141_s23] sm:$0xff] }
0x4f15   :  { %8330 = vrcp.f32 %v6370_v26  ;;  %v6723_v26 = vld [vmem:[%s10141_s23 + $0x8] sm:$0xff] }
0x4f1f   :  { %v8331_v51 = vpop.eup %8330 }
0x4f84   :  { %v6393_v1 = vpop.permute.xlu0 %6392 }
0x4f85   :  { %v6395_v33 = vmul.f32 %v8331_v51, %v6393_v1  ;;  %v7825_v1 = vpack.c.bf16 %v6723_v26, %v6722_v43 }
0x4f87   :  { %v6397_v35 = vrot.slane %v6395_v33, 5 }
0x4f89   :  { %6947 = vmatmul.mubr.msk.f32.vlgmr.msra.gmra.mrb[58].mxu1 %vm2807_vm12, %v6397_v35 }
0x4f8a   :  { %7192 = vmatprep.mubr.msk.f32.mxu1 %vm8381_vm1, %v10164_v56 }
0x505c   :  { %v6466_v60 = vpop.f32.mrb[58].mxu1 }
0x505d   :  { %v6468_v18 = vpop.f32.mrb[59].mxu1  ;;  %v6473_v52 = vrot.slane %v6466_v60, 2  ;;  %v6724_v60 = vld [vmem:[%s10141_s23 + $0x10] sm:$0xff] }
0x505e   :  { %v6474_v44 = vrot.slane %v6468_v18, 2  ;;  %v6725_v18 = vld [vmem:[%s10141_s23 + $0x18] sm:$0xff]  ;;  %s8356_s23 = scalar_lea.vmem %s6815_s6, 32 }
0x505f   :  { %v6477_v31 = vadd.f32 %v6473_v52, %v9978_v42  ;;  %p8357_p0 = scmp.ne.s32.totalorder %s6815_s6, %s8356_s23  ;;  %p8362_p2 = scmp.lt.s32.totalorder %s8356_s23, %s8356_s23 }
0x5060   :  { %v6478_v55 = vadd.f32 %v6474_v44, %v9972_v21  ;;  %v7828_v44 = vpack.c.bf16 %v6725_v18, %v6724_v60 }
0x5061   :  { %v6948_v0 = vmul.f32 -1.442695, %v6477_v31  ;;  %p8363_p3 = por %p8362_p2, %p8361_p1 }
0x5062   :  { %8332 = vtanh.f32 %v6478_v55  ;;  %v6949_v6 = vmul.f32 -1.442695, %v6478_v55  ;;  %v6953_v55 = vld [vmem:[%s10140_s22] ss:$0 sm:$0xff] }
0x5063   :  { %8334 = vpow2.f32 %v6948_v0  ;;  %p8364_p4 = pnand %p8363_p3, %p8357_p0 }
0x506c   :  { %v8333_v36 = vpop.eup %8332 }
0x506d   :  { %6497 = vrot.lane.b32.xlu1 %v8333_v36, %s8415_s26  ;;  %v8335_v49 = vpop.eup %8334 }
0x506e   :  { %v6485_v25 = vadd.f32 1.0, %v8335_v49 }
0x5070   :  { %8336 = vrcp.f32 %v6485_v25 }
0x507a   :  { %v8337_v59 = vpop.eup %8336 }
0x507b   :  { %v6495_v17 = vmul.f32 %v8337_v59, %v6493_v9 }
0x50df   :  { %v6498_v32 = vpop.permute.xlu1 %6497 }
0x50e0   :  { %v6500_v19 = vmul.f32 %v8337_v59, %v6498_v32 }
0x50e2   :  { %6502 = vrot.lane.b32.xlu0 %v6500_v19, %s8415_s26 }
0x5154   :  { %v6503_v34 = vpop.permute.xlu0 %6502 }
0x5155   :  { %v6505_v54 = vadd.f32 %v6503_v34, %v6495_v17 }
0x5157   :  { %8338 = vtanh.f32 %v6505_v54  ;;  %v6609_v20 = vrot.slane %v6505_v54, 7 }
0x5158   :  { %8340 = vpow2.f32 %v6949_v6 }
0x5161   :  { %v8339_v61 = vpop.eup %8338 }
0x5162   :  { %6508 = vrot.lane.b32.xlu1 %v8339_v61, %s8415_s26  ;;  %v8341_v63 = vpop.eup %8340 }
0x5163   :  { %v6486_v53 = vadd.f32 1.0, %v8341_v63 }
0x5165   :  { %8342 = vrcp.f32 %v6486_v53 }
0x516f   :  { %v8343_v13 = vpop.eup %8342 }
0x51d4   :  { %v6509_v8 = vpop.permute.xlu1 %6508 }
0x51d5   :  { %v6511_v40 = vmul.f32 %v8343_v13, %v6509_v8 }
0x51d7   :  { %v6513_v41 = vrot.slane %v6511_v40, 6 }
0x51d9   :  { %6950 = vmatmul.mubr.msk.f32.vlgmr.msra.gmra.mrb[64].mxu0 %vm2807_vm12, %v6513_v41 }
0x52ac   :  { %v6582_v12 = vpop.f32.mrb[64].mxu0 }
0x52ad   :  { %v6584_v10 = vpop.f32.mrb[65].mxu0  ;;  %v6589_v62 = vrot.slane %v6582_v12, 1 }
0x52ae   :  { %v6590_v30 = vrot.slane %v6584_v10, 1 }
0x52af   :  { %v6593_v57 = vadd.f32 %v6589_v62, %v9978_v42  ;;  %v6637_v42 = vld [vmem:[%s10139_s21 + $0x8] sm:$0xff] }
0x52b0   :  { %v6594_v47 = vadd.f32 %v6590_v30, %v9972_v21  ;;  %v7819_v5 = vpack.c.bf16 %v6637_v42, %v6636_v23 }
0x52b1   :  { %v6951_v2 = vmul.f32 -1.442695, %v6593_v57 }
0x52b2   :  { %8344 = vtanh.f32 %v6594_v47  ;;  %7820 = vmatpush3.bf16.msra.mxu1 %v7819_v5  ;;  %v6952_v27 = vmul.f32 -1.442695, %v6594_v47 }
0x52b3   :  { %8346 = vpow2.f32 %v6951_v2  ;;  %7821 = vmatprep.subr.bf16.mxu1 %v8416_v14 }
0x52b6   :  { %7823 = vmatpush3.bf16.msra.mxu1 %v7822_v4 }
0x52b7   :  { %7824 = vmatprep.subr.bf16.mxu1 %v8416_v14 }
0x52bc   :  { %v8345_v16 = vpop.eup %8344 }
0x52bd   :  { %6613 = vrot.lane.b32.xlu0 %v8345_v16, %s8415_s26  ;;  %v8347_v11 = vpop.eup %8346 }
0x52be   :  { %v6601_v45 = vadd.f32 1.0, %v8347_v11 }
0x52c0   :  { %8348 = vrcp.f32 %v6601_v45 }
0x52ca   :  { %v8349_v3 = vpop.eup %8348 }
0x52cb   :  { %v6611_v48 = vmul.f32 %v8349_v3, %v6609_v20 }
0x532f   :  { %v6614_v24 = vpop.permute.xlu0 %6613 }
0x5330   :  { %v6616_v15 = vmul.f32 %v8349_v3, %v6614_v24 }
0x5332   :  { %6618 = vrot.lane.b32.xlu1 %v6616_v15, %s8415_s26 }
0x53a4   :  { %v6619_v21 = vpop.permute.xlu1 %6618 }
0x53a5   :  { %v6621_v46 = vadd.f32 %v6619_v21, %v6611_v48 }
0x53a7   :  { %8350 = vtanh.f32 %v6621_v46 }
0x53a8   :  { %8352 = vpow2.f32 %v6952_v27 }
0x53b1   :  { %v8351_v50 = vpop.eup %8350 }
0x53b2   :  { %6624 = vrot.lane.b32.xlu0 %v8351_v50, %s8415_s26  ;;  %v8353_v29 = vpop.eup %8352 }
0x53b3   :  { %v6602_v7 = vadd.f32 1.0, %v8353_v29 }
0x53b5   :  { %8354 = vrcp.f32 %v6602_v7 }
0x53bf   :  { %v8355_v37 = vpop.eup %8354 }
0x5424   :  { %v6625_v38 = vpop.permute.xlu0 %6624 }
0x5425   :  { %v6627_v28 = vmul.f32 %v8355_v37, %v6625_v38 }
0x5427   :  { %v6631_v22 = vrot.slane %v6627_v28, 6  ;;  %v6629_v51 = vrot.slane %v6627_v28, 7 }
0x5429   :  { %6632 = vrot.lane.b32.xlu1 %v6631_v22, %s8400_s7 }
0x549b   :  { %v6633_v33 = vpop.permute.xlu1 %6632 }
0x549c   :  { %v6635_v35 = vsel %vm4646_vm13, %v6629_v51, %v6633_v33 }
0x549d   :  { %7193 = vmatmul.mubr.msk.f32.vlgmr.msra.gmra.mrb[60].mxu1 %vm6647_vm0, %v6635_v35 }
0x549e   :  { %7826 = vmatpush3.bf16.msra.mxu1 %v7825_v1  ;;  %7203 = vmatprep.mubr.msk.f32.mxu1 %vm8381_vm1, %v10164_v56  ;;  %v6955_v56 = vld [vmem:[%s10142_s24] ss:$0 sm:$0xff]  ;;  %vm6806_vm1 = vcmask 41984  }
0x549f   :  { %7827 = vmatprep.subr.bf16.mxu1 %v8416_v14 }
0x54a2   :  { %7829 = vmatpush3.bf16.msra.mxu1 %v7828_v44 }
0x5570   :  { %v6717_v36 = vpop.f32.mrb[60].mxu1 }
0x5571   :  { %v6718_v52 = vadd.f32 %v6953_v55, %v6717_v36  ;;  %v7194_v31 = vpop.f32.mrb[61].mxu1 }
0x5573   :  { %v6721_v0 = vmax.f32 %v6718_v52, 0.0 }
0x5575   :  { %7204 = vmatmul.mubr.msk.f32.vlgmr.msra.gmra.mrb[62].mxu1 %vm6647_vm0, %v6721_v0 }
0x5648   :  { %v6802_v49 = vpop.f32.mrb[62].mxu1 }
0x5649   :  { %v6803_v25 = vadd.f32 %v6955_v56, %v6802_v49  ;;  %v7205_v59 = vpop.f32.mrb[63].mxu1 }
0x564b   :  { %6807 = vst.msk [vmem:[#allocation2] sm:$0x3] %vm6806_vm1, %v6803_v25 }
0x564c   :  { %8367 = shalt.err (!%p8364_p4)
}
0x564d   :  { %s8368_s3 = scalar_lea.hbm %s10143_s25, 32 }
0x564e   :  { %p8369_p5 = scmp.ne.s32.totalorder %s10143_s25, %s8368_s3  ;;  %p8372_p6 = scmp.lt.u32.totalorder %s8368_s3, %s10143_s25 }
0x5650   :  { %p8374_p7 = pnand %p8372_p6, %p8369_p5 }
0x5652   :  { %8377 = shalt.err (!%p8374_p7)
}
0x5653   :  { %6817 = dma.vmem_to_hbm [thread:$0]  %s6815_s6, 32, %s10143_s25, [#allocation3]  }
0x5654   :  { %8378 = dma.done.wait [#allocation3], 32  }
0x5655   :  { %8379 = vsyncadd [#allocation3], 4294967264 }
0x5656   :  { %6821 = vsyncpa [#allocation3], 1 }

</bundles_post_ra>
